<compile_context>
chip_gen: v5e
topology: v5e:2x2
jax: 0.10.0
libtpu: 0.0.40
codegen_flags: <defaults>
</compile_context>

<pallas_src>
import jax
import jax.numpy as jnp
from jax.experimental import pallas as pl
from jax.experimental.pallas import tpu as pltpu


# ----------------------------- tile-size selection helpers -----------------------------

def _choose_tj(n_patches, cap):
    """Patch-row tile: full extent when small, else a multiple-of-8 divisor (no padding)."""
    if n_patches <= cap:
        return n_patches
    start = cap - (cap % 8)
    for d in range(start, 7, -8):
        if n_patches % d == 0:
            return d
    # TODO(synk): rare corner (huge n_patches with no multiple-of-8 divisor) falls back to a
    #             full-extent block, which may exceed the VMEM budget for very large images.
    return n_patches


def _choose_tk(K, cap):
    """K tile: a multiple-of-128 divisor of K (K = C*256 always has one), <= cap."""
    if K <= cap:
        return K
    start = cap - (cap % 128)
    for d in range(start, 127, -128):
        if K % d == 0:
            return d
    return 256  # unreachable for K = C*256


def _choose_tb(B, tj, tk, grid_j, *, max_rows=1024, max_bytes=4 * 1024 * 1024):
    """Batch rows per grid step (fast path): amortize per-step overhead while keeping the
    patches block small and keeping >=2 parallel grid steps for v7x's two TensorCores."""
    min_par = min(2, B * grid_j)
    tb = 1
    for cand in range(1, B + 1):
        if B % cand:
            continue
        if cand * tj > max_rows or cand * tj * tk * 2 > max_bytes:
            continue
        if (B // cand) * grid_j < min_par:
            continue
        tb = cand
    return tb


# ---------------------------------------- kernels ----------------------------------------

def _embed_kernel_resident(p_ref, w_ref, pos_ref, o_ref):
    # p_ref:   (TB, TJ, K) bf16    w_ref: (K, D) bf16 (constant block index -> VMEM resident)
    # pos_ref: (TJ, D) f32 (conv bias folded in)        o_ref: (TB, TJ, D)
    w = w_ref[...]
    pos = pos_ref[...]
    for b in range(p_ref.shape[0]):                       # static TB, unrolled
        acc = jnp.dot(p_ref[b], w, preferred_element_type=jnp.float32)
        o_ref[b] = (acc + pos).astype(o_ref.dtype)


def _embed_kernel_ktiled(p_ref, w_ref, pos_ref, o_ref, acc_ref):
    # p_ref: (1, TJ, TK) bf16   w_ref: (TK, D) bf16   pos_ref: (TJ, D) f32
    # o_ref: (1, TJ, D)         acc_ref: (TJ, D) f32 scratch, resident across the K axis
    k = pl.program_id(2)

    @pl.when(k == 0)
    def _():
        acc_ref[...] = jnp.zeros_like(acc_ref)

    acc_ref[...] += jnp.dot(p_ref[0], w_ref[...], preferred_element_type=jnp.float32)

    @pl.when(k == pl.num_programs(2) - 1)
    def _():
        o_ref[0] = (acc_ref[...] + pos_ref[...]).astype(o_ref.dtype)


# ---------------------------------------- wrapper ----------------------------------------

def embeddings_forward(x_nchw, conv_w, conv_b, pos_emb, *,
                       tk_max=4096, k_resident_max=8192,
                       vmem_limit_bytes=48 * 1024 * 1024, out_dtype=None):
    """x_nchw: (B, C, H, W); conv_w: (768, C, 16, 16); conv_b: (768,);
    pos_emb: (1, n_patches, 768).  Returns (B, n_patches, 768)."""
    B, C, H, W = x_nchw.shape
    P = 16
    ph, pw = H // P, W // P
    n_patches = ph * pw
    K = C * P * P
    D = conv_w.shape[0]  # 768

    if out_dtype is None:
        # Guard against integer image inputs silently truncating the f32 result.
        out_dtype = x_nchw.dtype if jnp.issubdtype(x_nchw.dtype, jnp.floating) else jnp.float32

    # --- glue: patch extraction (reshape/transpose only).  allow_input_fusion on this operand
    #     lets XLA fuse the transpose + bf16 cast into the kernel's input DMA under jit. ---
    # Patch-vector order (C, kh, kw), patch order row-major over (ph, pw): identical to
    # torch Conv2d(k=16, s=16) -> flatten(2).transpose(-1, -2).
    patches = x_nchw.reshape(B, C, ph, P, pw, P)
    patches = jnp.transpose(patches, (0, 2, 4, 1, 3, 5)).reshape(B, n_patches, K)
    patches_bf = patches.astype(jnp.bfloat16)

    # --- glue: flattened GEMM weight (K, D); conv bias folded into the pos table (once). ---
    w_flat = conv_w.reshape(D, K).T.astype(jnp.bfloat16)
    pos_b = (pos_emb.reshape(n_patches, D).astype(jnp.float32)
             + conv_b.reshape(1, D).astype(jnp.float32))

    # --- tiling: every tile divides its axis exactly -> no jnp.pad copies anywhere ---
    tj_cap = 512 if K <= 4096 else 256
    TJ = _choose_tj(n_patches, tj_cap)
    grid_j = n_patches // TJ

    out_itemsize = jnp.dtype(out_dtype).itemsize
    cost = pl.CostEstimate(
        flops=2 * B * n_patches * K * D,
        transcendentals=0,
        bytes_accessed=int(B * n_patches * K * 2 + K * D * 2
                           + n_patches * D * 4 + B * n_patches * D * out_itemsize),
    )

    if K <= k_resident_max:
        # Fast path: whole K in one block, weight VMEM-resident, no accumulator scratch.
        TB = _choose_tb(B, TJ, K, grid_j)
        grid = (grid_j, B // TB)
        in_specs = [
            pl.BlockSpec((TB, TJ, K), lambda j, b: (b, j, 0)),   # patches tile
            pl.BlockSpec((K, D), lambda j, b: (0, 0)),           # weight (resident)
            pl.BlockSpec((TJ, D), lambda j, b: (j, 0)),          # pos+bias (batch-invariant)
        ]
        out_specs = pl.BlockSpec((TB, TJ, D), lambda j, b: (b, j, 0))
        scratch_shapes = []
        dims = ("parallel", "parallel")
        kernel = _embed_kernel_resident
    else:
        # Large in_channels: tile K with a trailing "arbitrary" reduction axis + f32 acc.
        TK = _choose_tk(K, tk_max)
        grid_k = K // TK
        grid = (grid_j, B, grid_k)
        in_specs = [
            pl.BlockSpec((1, TJ, TK), lambda j, b, k: (b, j, k)),
            pl.BlockSpec((TK, D), lambda j, b, k: (k, 0)),
            pl.BlockSpec((TJ, D), lambda j, b, k: (j, 0)),
        ]
        out_specs = pl.BlockSpec((1, TJ, D), lambda j, b, k: (b, j, 0))
        scratch_shapes = [pltpu.VMEM((TJ, D), jnp.float32)]
        dims = ("parallel", "parallel", "arbitrary")
        kernel = _embed_kernel_ktiled

    out = pl.pallas_call(
        kernel,
        out_shape=jax.ShapeDtypeStruct((B, n_patches, D), out_dtype),
        grid_spec=pltpu.PrefetchScalarGridSpec(
            num_scalar_prefetch=0,
            grid=grid,
            in_specs=in_specs,
            out_specs=out_specs,
            scratch_shapes=scratch_shapes,
        ),
        compiler_params=pltpu.CompilerParams(
            dimension_semantics=dims,
            vmem_limit_bytes=vmem_limit_bytes,
            allow_input_fusion=[True, False, False],   # fuse patchify+cast into input DMA
        ),
        cost_estimate=cost,
    )(patches_bf, w_flat, pos_b)

    return out


# ----------------------------------------- test -----------------------------------------

if __name__ == "__main__":
    D = 768

    def reference(x, conv_w, conv_b, pos_emb):
        B, C, H, W = x.shape
        P = 16
        ph, pw = H // P, W // P
        n_p = ph * pw
        K = C * P * P
        p = jnp.transpose(x.reshape(B, C, ph, P, pw, P), (0, 2, 4, 1, 3, 5)).reshape(B, n_p, K)
        return p @ conv_w.reshape(D, K).T + conv_b.reshape(1, 1, D) + pos_emb

    key = jax.random.PRNGKey(0)

    # Config 1: fast path (K resident, batch grouped TB=2 per grid step).
    # Config 2: K-tiled accumulator path (forced via small k_resident_max / tk_max).
    configs = [
        (4, 4, 32, 32, {}),
        (2, 8, 32, 32, dict(k_resident_max=1024, tk_max=1024)),
    ]

    for idx, (B, C, H, W, kwargs) in enumerate(configs):
        kx, kw, kb, kp, key = jax.random.split(key, 5)
        n_patches = (H // 16) * (W // 16)

        x = jax.random.normal(kx, (B, C, H, W), dtype=jnp.float32)
        conv_w = jax.random.normal(kw, (D, C, 16, 16), dtype=jnp.float32) * 0.02
        conv_b = jax.random.normal(kb, (D,), dtype=jnp.float32) * 0.02
        # PyTorch inits position_embeddings to zeros; small random values so the add path is
        # actually exercised (deterministic, in-script init).
        pos_emb = jax.random.normal(kp, (1, n_patches, D), dtype=jnp.float32) * 0.02

        fwd = jax.jit(lambda a, w, b, p, kw_=kwargs: embeddings_forward(a, w, b, p, **kw_))
        out = jax.block_until_ready(fwd(x, conv_w, conv_b, pos_emb))

        ref = reference(x, conv_w, conv_b, pos_emb)
        assert out.shape == (B, n_patches, D), f"shape mismatch in config {idx}"
        # bf16 matmul operands (f32 accumulation) -> loose tolerance vs f32 reference.
        assert jnp.allclose(out, ref, atol=5e-2, rtol=5e-2), f"value mismatch in config {idx}"

    print("KERNEL_OK")
</pallas_src>

<mosaic_0001>
module attributes {stable_mosaic.version = 11 : i64} {
  func.func @_embed_kernel_resident(%arg0: i32, %arg1: i32, %arg2: memref<2x4x1024xbf16, #tpu.memory_space<vmem>>, %arg3: memref<1024x768xbf16, #tpu.memory_space<vmem>>, %arg4: memref<4x768xf32, #tpu.memory_space<vmem>>, %arg5: memref<2x4x768xf32, #tpu.memory_space<vmem>>) attributes {dimension_semantics = [#tpu.dimension_semantics<parallel>, #tpu.dimension_semantics<parallel>], iteration_bounds = array<i64: 1, 2>, scalar_prefetch = 0 : i64, scratch_operands = 0 : i64, tpu.core_type = #tpu.core_type<tc>, window_params = [{transform_indices = @transform_0, window_bounds = array<i64: 2, 4, 1024>}, {pipeline_mode = #tpu.pipeline_mode<synchronous>, transform_indices = @transform_1, window_bounds = array<i64: 1024, 768>}, {transform_indices = @transform_2, window_bounds = array<i64: 4, 768>}, {transform_indices = @transform_3, window_bounds = array<i64: 2, 4, 768>}]} {
    %c0 = arith.constant 0 : index
    %c0_0 = arith.constant 0 : index
    %0 = vector.load %arg3[%c0, %c0_0] : memref<1024x768xbf16, #tpu.memory_space<vmem>>, vector<1024x768xbf16>
    %c0_1 = arith.constant 0 : index
    %c0_2 = arith.constant 0 : index
    %1 = vector.load %arg4[%c0_1, %c0_2] : memref<4x768xf32, #tpu.memory_space<vmem>>, vector<4x768xf32>
    %c0_3 = arith.constant 0 : index
    %c0_4 = arith.constant 0 : index
    %c0_5 = arith.constant 0 : index
    %2 = vector.load %arg2[%c0_3, %c0_4, %c0_5] : memref<2x4x1024xbf16, #tpu.memory_space<vmem>>, vector<1x4x1024xbf16>
    %3 = vector.shape_cast %2 : vector<1x4x1024xbf16> to vector<4x1024xbf16>
    %cst = arith.constant dense<0.000000e+00> : vector<4x768xf32>
    %4 = tpu.matmul %3, %0, %cst {dimension_numbers = #tpu.dot_dimension_numbers<[1], [0], [0], [1], [0, 0, 1, 1], [], []>} : vector<4x1024xbf16>, vector<1024x768xbf16>, vector<4x768xf32> -> vector<4x768xf32>
    %5 = arith.addf %4, %1 : vector<4x768xf32>
    %c0_6 = arith.constant 0 : index
    %c0_7 = arith.constant 0 : index
    %c0_8 = arith.constant 0 : index
    %6 = vector.load %arg5[%c0_6, %c0_7, %c0_8] : memref<2x4x768xf32, #tpu.memory_space<vmem>>, vector<1x4x768xf32>
    %7 = vector.shape_cast %6 : vector<1x4x768xf32> to vector<4x768xf32>
    %8 = vector.shape_cast %5 : vector<4x768xf32> to vector<1x4x768xf32>
    tpu.vector_store %arg5[%c0_6, %c0_7, %c0_8], %8 {strides = array<i32>} : memref<2x4x768xf32, #tpu.memory_space<vmem>>, vector<1x4x768xf32>,
    %c1 = arith.constant 1 : index
    %c0_9 = arith.constant 0 : index
    %c0_10 = arith.constant 0 : index
    %9 = vector.load %arg2[%c1, %c0_9, %c0_10] : memref<2x4x1024xbf16, #tpu.memory_space<vmem>>, vector<1x4x1024xbf16>
    %10 = vector.shape_cast %9 : vector<1x4x1024xbf16> to vector<4x1024xbf16>
    %cst_11 = arith.constant dense<0.000000e+00> : vector<4x768xf32>
    %11 = tpu.matmul %10, %0, %cst_11 {dimension_numbers = #tpu.dot_dimension_numbers<[1], [0], [0], [1], [0, 0, 1, 1], [], []>} : vector<4x1024xbf16>, vector<1024x768xbf16>, vector<4x768xf32> -> vector<4x768xf32>
    %12 = arith.addf %11, %1 : vector<4x768xf32>
    %c1_12 = arith.constant 1 : index
    %c0_13 = arith.constant 0 : index
    %c0_14 = arith.constant 0 : index
    %13 = vector.load %arg5[%c1_12, %c0_13, %c0_14] : memref<2x4x768xf32, #tpu.memory_space<vmem>>, vector<1x4x768xf32>
    %14 = vector.shape_cast %13 : vector<1x4x768xf32> to vector<4x768xf32>
    %15 = vector.shape_cast %12 : vector<4x768xf32> to vector<1x4x768xf32>
    tpu.vector_store %arg5[%c1_12, %c0_13, %c0_14], %15 {strides = array<i32>} : memref<2x4x768xf32, #tpu.memory_space<vmem>>, vector<1x4x768xf32>,
    return
  }
  func.func @transform_0(%arg0: i32, %arg1: i32) -> (i32, i32, i32) {
    %c0_i32 = arith.constant 0 : i32
    %c0_i32_0 = arith.constant 0 : i32
    return %arg1, %arg0, %c0_i32 : i32, i32, i32
  }
  func.func @transform_1(%arg0: i32, %arg1: i32) -> (i32, i32) {
    %c0_i32 = arith.constant 0 : i32
    %c0_i32_0 = arith.constant 0 : i32
    %c0_i32_1 = arith.constant 0 : i32
    return %c0_i32, %c0_i32_0 : i32, i32
  }
  func.func @transform_2(%arg0: i32, %arg1: i32) -> (i32, i32) {
    %c0_i32 = arith.constant 0 : i32
    %c0_i32_0 = arith.constant 0 : i32
    return %arg0, %c0_i32 : i32, i32
  }
  func.func @transform_3(%arg0: i32, %arg1: i32) -> (i32, i32, i32) {
    %c0_i32 = arith.constant 0 : i32
    %c0_i32_0 = arith.constant 0 : i32
    return %arg1, %arg0, %c0_i32 : i32, i32, i32
  }
}

</mosaic_0001>

<bundles_post_ra>
// kernel: _lambda_.1
= control target key start
LH: loop header
LB: loop body
LE: loop exit
PB: predicated region body
PF: predicated region fallthrough
CT: control target
= control target key end

     0   :  { %8 = vsyncpa [#allocation3], 0  ;;  %s10337_s0 = inlined_call_operand.vmem [shape: bf16[4,4,1024], index: 0, kind: input, shape index: {}]   ;;  %s10338_s1 = inlined_call_operand.vmem [shape: bf16[1024,768], index: 1, kind: input, shape index: {}]   ;;  %s10339_s2 = inlined_call_operand.vmem [shape: f32[4,768], index: 2, kind: input, shape index: {}]   ;;  %s10340_s3 = inlined_call_operand.hbm [shape: f32[4,4,768], index: 3, kind: output, shape index: {}]  }
   0x1   :  { %10 = vsyncpa [#allocation3 + $0x1], 0  ;;  %s6127_s12 = smov 0   ;;  %s6129_s13 = smov 0  }
   0x2   :  { %s6131_s14 = smov 0   ;;  %s6133_s15 = smov 0  }
   0x3   :  { %s6135_s16 = smov 0   ;;  %s6137_s17 = smov 0  }
   0x4 LB: > { %s4016_s18 = sadd.s32 4294967295, %s6103_s17   ;;  %s4017_s19 = sadd.s32 4294967294, %s6103_s17   ;;  %s6103_s17 = sphi %s6137_s17, %s16_s17   ;;  %s6099_s16 = sphi %s6135_s16, %s11373_s16   ;;  %s6095_s15 = sphi %s6133_s15, %s11372_s15   ;;  %s6091_s14 = sphi %s6131_s14, %s11371_s14   ;;  %s6087_s13 = sphi %s6129_s13, %s11370_s13   ;;  %s6083_s12 = sphi %s6127_s12, %s11369_s12  }
   0x5   : > { %s25_s20 = sadd.s32 1, %s6099_s16  ;;  %s112_s21 = sadd.s32 1, %s6091_s14 }
   0x6   : > { %p26_p0 = scmp.ge.s32.totalorder %s25_s20, 2  ;;  %p122_p1 = scmp.ne.s32.totalorder %s6091_s14, %s6087_s13 }
   0x7   : > { %p123_p2 = scmp.eq.s32.totalorder %s4016_s18, 1  ;;  %p128_p3 = scmp.ne.s32.totalorder %s6087_s13, %s6083_s12 }
   0x8   : > { %s11375_s20 = smov (%p26_p0, %s25_s20), 0  ;;  %p129_p5 = scmp.eq.s32.totalorder %s4017_s19, 1 }
   0x9   : > { %p6167_p4 = por %p123_p2, %p122_p1  ;;  %s107_s23 = ssub.s32 %s6099_s16, %s11375_s20 }
   0xa   : > { %p4021_p6 = scmp.ge.s32.totalorder %s6103_s17, 1  ;;  %p110_p7 = scmp.eq.s32.totalorder %s107_s23, 0 }
   0xb   : > { %p6174_p8 = por %p129_p5, %p128_p3  ;;  %p172_p9 = scmp.lt.s32.totalorder %s6103_s17, 3 }
   0xc   : > { %s6180_s25 = scalar_select %p110_p7, %s6091_s14, %s112_s21  }
   0xd   : > { %p173_p10 = pnand %p4021_p6, %p172_p9 }
   0xf   : > { %176 = sbr.rel (%p173_p10) target bundleno = 937 (0x3a9), region = 32 }
  0x14   : > { %v4195_v0 = vld [vmem:[%s10338_s1 + $0x150] sm:$0xf]  ;;  %v5617_v1 = vld [vmem:[%s10338_s1 + $0x164] sm:$0xf0]  ;;  %v4171_v11 = vld [vmem:[%s10338_s1 + $0x120] sm:$0xf] }
  0x15   : > { %v4387_v2 = vld [vmem:[%s10338_s1 + $0x2d0] sm:$0xf]  ;;  %v6191_v3 = vor.u32 %v5617_v1, %v4195_v0  ;;  %v5665_v4 = vld [vmem:[%s10338_s1 + $0x2e4] sm:$0xf0]  ;;  %v5611_v13 = vld [vmem:[%s10338_s1 + $0x134] sm:$0xf0] }
  0x16   : > { %v4579_v5 = vld [vmem:[%s10338_s1 + $0x450] sm:$0xf]  ;;  %v5713_v6 = vld [vmem:[%s10338_s1 + $0x464] sm:$0xf0]  ;;  %v6202_v7 = vor.u32 %v5665_v4, %v4387_v2  ;;  %v4363_v14 = vld [vmem:[%s10338_s1 + $0x2a0] sm:$0xf]  ;;  %v6229_v16 = vor.u32 %v5611_v13, %v4171_v11 }
  0x17   : > { %v6204_v8 = vor.u32 %v5713_v6, %v4579_v5  ;;  %v4771_v9 = vld [vmem:[%s10338_s1 + $0x5d0] sm:$0xf]  ;;  %v5761_v10 = vld [vmem:[%s10338_s1 + $0x5e4] sm:$0xf0]  ;;  %2573 = vmatpush.bf16.msra.mxu0 %v6191_v3  ;;  %v5659_v15 = vld [vmem:[%s10338_s1 + $0x2b4] sm:$0xf0] }
  0x18   : > { %v6216_v12 = vor.u32 %v5761_v10, %v4771_v9  ;;  %2586 = vmatpush.bf16.msra.mxu1 %v6202_v7  ;;  %v6231_v17 = vor.u32 %v5659_v15, %v4363_v14  ;;  %v4555_v18 = vld [vmem:[%s10338_s1 + $0x420] sm:$0xf]  ;;  %v5707_v19 = vld [vmem:[%s10338_s1 + $0x434] sm:$0xf0]  ;;  %v4147_v23 = vld [vmem:[%s10338_s1 + $0xf0] sm:$0xf] }
  0x19   : > { %2599 = vmatpush.bf16.msra.mxu2 %v6204_v8  ;;  %v4747_v20 = vld [vmem:[%s10338_s1 + $0x5a0] sm:$0xf]  ;;  %v6243_v21 = vor.u32 %v5707_v19, %v4555_v18  ;;  %v5755_v22 = vld [vmem:[%s10338_s1 + $0x5b4] sm:$0xf0]  ;;  %v5605_v24 = vld [vmem:[%s10338_s1 + $0x104] sm:$0xf0] }
  0x1a   : > { %2612 = vmatpush.bf16.msra.mxu3 %v6216_v12  ;;  %v6254_v25 = vor.u32 %v5755_v22, %v4747_v20  ;;  %v4339_v26 = vld [vmem:[%s10338_s1 + $0x270] sm:$0xf]  ;;  %v5653_v27 = vld [vmem:[%s10338_s1 + $0x284] sm:$0xf0]  ;;  %v6266_v29 = vor.u32 %v5605_v24, %v4147_v23  ;;  %v4123_v35 = vld [vmem:[%s10338_s1 + $0xc0] sm:$0xf] }
  0x1b   : > { %v4531_v28 = vld [vmem:[%s10338_s1 + $0x3f0] sm:$0xf]  ;;  %2574 = vmatpush.bf16.msra.mxu0 %v6229_v16  ;;  %v5701_v30 = vld [vmem:[%s10338_s1 + $0x404] sm:$0xf0]  ;;  %v6279_v33 = vor.u32 %v5653_v27, %v4339_v26  ;;  %v5599_v36 = vld [vmem:[%s10338_s1 + $0xd4] sm:$0xf0] }
  0x1c   : > { %v4723_v31 = vld [vmem:[%s10338_s1 + $0x570] sm:$0xf]  ;;  %v5749_v32 = vld [vmem:[%s10338_s1 + $0x584] sm:$0xf0]  ;;  %2587 = vmatpush.bf16.msra.mxu1 %v6231_v17  ;;  %v6281_v34 = vor.u32 %v5701_v30, %v4531_v28  ;;  %v4315_v37 = vld [vmem:[%s10338_s1 + $0x240] sm:$0xf]  ;;  %v6311_v44 = vor.u32 %v5599_v36, %v4123_v35 }
  0x1d   : > { %2600 = vmatpush.bf16.msra.mxu2 %v6243_v21  ;;  %v6293_v38 = vor.u32 %v5749_v32, %v4723_v31  ;;  %v5647_v39 = vld [vmem:[%s10338_s1 + $0x254] sm:$0xf0]  ;;  %v4507_v40 = vld [vmem:[%s10338_s1 + $0x3c0] sm:$0xf]  ;;  %v4099_v47 = vld [vmem:[%s10338_s1 + $0x90] sm:$0xf] }
  0x1e   : > { %2613 = vmatpush.bf16.msra.mxu3 %v6254_v25  ;;  %v5695_v41 = vld [vmem:[%s10338_s1 + $0x3d4] sm:$0xf0]  ;;  %v4699_v42 = vld [vmem:[%s10338_s1 + $0x540] sm:$0xf]  ;;  %v6315_v45 = vor.u32 %v5647_v39, %v4315_v37  ;;  %v5593_v48 = vld [vmem:[%s10338_s1 + $0xa4] sm:$0xf0] }
  0x1f   : > { %v5743_v43 = vld [vmem:[%s10338_s1 + $0x554] sm:$0xf0]  ;;  %2575 = vmatpush.bf16.msra.mxu0 %v6266_v29  ;;  %v6317_v46 = vor.u32 %v5695_v41, %v4507_v40  ;;  %v4291_v49 = vld [vmem:[%s10338_s1 + $0x210] sm:$0xf]  ;;  %v5641_v51 = vld [vmem:[%s10338_s1 + $0x224] sm:$0xf0]  ;;  %v6347_v56 = vor.u32 %v5593_v48, %v4099_v47 }
  0x20   : > { %2588 = vmatpush.bf16.msra.mxu1 %v6279_v33  ;;  %v6329_v50 = vor.u32 %v5743_v43, %v4699_v42  ;;  %v4483_v52 = vld [vmem:[%s10338_s1 + $0x390] sm:$0xf]  ;;  %v5689_v53 = vld [vmem:[%s10338_s1 + $0x3a4] sm:$0xf0]  ;;  %v6351_v57 = vor.u32 %v5641_v51, %v4291_v49  ;;  %v4075_v59 = vld [vmem:[%s10338_s1 + $0x60] sm:$0xf] }
  0x21   : > { %2601 = vmatpush.bf16.msra.mxu2 %v6281_v34  ;;  %v4675_v54 = vld [vmem:[%s10338_s1 + $0x510] sm:$0xf]  ;;  %v5737_v55 = vld [vmem:[%s10338_s1 + $0x524] sm:$0xf0]  ;;  %v6353_v58 = vor.u32 %v5689_v53, %v4483_v52  ;;  %v5587_v60 = vld [vmem:[%s10338_s1 + $0x74] sm:$0xf0] }
  0x22   : > { %2614 = vmatpush.bf16.msra.mxu3 %v6293_v38  ;;  %v4267_v61 = vld [vmem:[%s10338_s1 + $0x1e0] sm:$0xf]  ;;  %v6365_v62 = vor.u32 %v5737_v55, %v4675_v54  ;;  %v5635_v63 = vld [vmem:[%s10338_s1 + $0x1f4] sm:$0xf0]  ;;  %v6383_v5 = vor.u32 %v5587_v60, %v4075_v59  ;;  %v4051_v10 = vld [vmem:[%s10338_s1 + $0x30] sm:$0xf] }
  0x23   : > { %2576 = vmatpush.bf16.msra.mxu0 %v6311_v44  ;;  %v4459_v0 = vld [vmem:[%s10338_s1 + $0x360] sm:$0xf]  ;;  %v5683_v1 = vld [vmem:[%s10338_s1 + $0x374] sm:$0xf0]  ;;  %v6387_v6 = vor.u32 %v5635_v63, %v4267_v61  ;;  %v5581_v11 = vld [vmem:[%s10338_s1 + $0x44] sm:$0xf0] }
  0x24   : > { %2589 = vmatpush.bf16.msra.mxu1 %v6315_v45  ;;  %v4651_v2 = vld [vmem:[%s10338_s1 + $0x4e0] sm:$0xf]  ;;  %v5731_v4 = vld [vmem:[%s10338_s1 + $0x4f4] sm:$0xf0]  ;;  %v6389_v9 = vor.u32 %v5683_v1, %v4459_v0  ;;  %v4243_v13 = vld [vmem:[%s10338_s1 + $0x1b0] sm:$0xf]  ;;  %v6419_v23 = vor.u32 %v5581_v11, %v4051_v10 }
  0x25   : > { %2602 = vmatpush.bf16.msra.mxu2 %v6317_v46  ;;  %v6401_v14 = vor.u32 %v5731_v4, %v4651_v2  ;;  %v5629_v15 = vld [vmem:[%s10338_s1 + $0x1c4] sm:$0xf0]  ;;  %v4435_v18 = vld [vmem:[%s10338_s1 + $0x330] sm:$0xf]  ;;  %v4027_v24 = vld [vmem:[%s10338_s1] sm:$0xf] }
  0x26   : > { %2615 = vmatpush.bf16.msra.mxu3 %v6329_v50  ;;  %v5677_v19 = vld [vmem:[%s10338_s1 + $0x344] sm:$0xf0]  ;;  %v4627_v20 = vld [vmem:[%s10338_s1 + $0x4b0] sm:$0xf]  ;;  %10685 = vst [vmem:[#allocation5_spill] sm:$0xff] %v6419_v23  ;;  %v6429_v27 = vor.u32 %v5629_v15, %v4243_v13  ;;  %s4022_s21 = sshll.u32 %s6095_s15, 1 }
  0x27   : > { %2577 = vmatpush.bf16.msra.mxu0 %v6347_v56  ;;  %v5725_v22 = vld [vmem:[%s10338_s1 + $0x4c4] sm:$0xf0]  ;;  %v5575_v26 = vld [vmem:[%s10338_s1 + $0x14] sm:$0xf0]  ;;  %v6431_v28 = vor.u32 %v5677_v19, %v4435_v18  ;;  %v4219_v30 = vld [vmem:[%s10338_s1 + $0x180] sm:$0xf] }
  0x28   : > { %2590 = vmatpush.bf16.msra.mxu1 %v6351_v57  ;;  %10686 = vst [vmem:[#allocation6_spill] sm:$0xff] %v6429_v27  ;;  %v5623_v31 = vld [vmem:[%s10338_s1 + $0x194] sm:$0xf0]  ;;  %v4411_v32 = vld [vmem:[%s10338_s1 + $0x300] sm:$0xf]  ;;  %v6443_v35 = vor.u32 %v5725_v22, %v4627_v20  ;;  %v6464_v43 = vor.u32 %v5575_v26, %v4027_v24  ;;  %p207_p11 = scmp.lt.s32.totalorder %s4022_s21, 3 }
  0x29   : > { %2603 = vmatpush.bf16.msra.mxu2 %v6353_v58  ;;  %10687 = vst [vmem:[#allocation7_spill] sm:$0xff] %v6431_v28  ;;  %v5671_v36 = vld [vmem:[%s10338_s1 + $0x314] sm:$0xf0]  ;;  %v4603_v37 = vld [vmem:[%s10338_s1 + $0x480] sm:$0xf]  ;;  %v6477_v51 = vor.u32 %v5623_v31, %v4219_v30  ;;  %s203_s11 = sand.u32 1, %s6087_s13  }
  0x2a   : > { %2616 = vmatpush.bf16.msra.mxu3 %v6365_v62  ;;  %10688 = vst [vmem:[#allocation8_spill] sm:$0xff] %v6443_v35  ;;  %v5719_v39 = vld [vmem:[%s10338_s1 + $0x494] sm:$0xf0]  ;;  %v4963_v40 = vld [vmem:[%s10338_s1 + $0x750] sm:$0xf]  ;;  %v6479_v52 = vor.u32 %v5671_v36, %v4411_v32  ;;  %s11377_s21 = smov (!%p207_p11, %s4022_s21), 3 }
  0x2b   : > { %2578 = vmatpush.bf16.msra.mxu0 %v6383_v5  ;;  %v5809_v41 = vld [vmem:[%s10338_s1 + $0x764] sm:$0xf0]  ;;  %v5155_v42 = vld [vmem:[%s10338_s1 + $0x8d0] sm:$0xf]  ;;  %10689 = vst [vmem:[#allocation9_spill] sm:$0xff] %v6464_v43  ;;  %v6488_v55 = vor.u32 %v5719_v39, %v4603_v37  ;;  %s5571_s29 = sshll.u32 %s11377_s21, 4 }
  0x2c   : > { %2591 = vmatpush.bf16.msra.mxu1 %v6387_v6  ;;  %v5857_v47 = vld [vmem:[%s10338_s1 + $0x8e4] sm:$0xf0]  ;;  %v5347_v48 = vld [vmem:[%s10338_s1 + $0xa50] sm:$0xf]  ;;  %10690 = vst [vmem:[#allocation10_spill] sm:$0xff] %v6477_v51  ;;  %v6490_v59 = vor.u32 %v5809_v41, %v4963_v40  ;;  %s6602_s9 = scalar_lea.vmem %s10337_s0, %s5571_s29  ;;  %s8755_s19 = smul.u32 48, %s203_s11 }
  0x2d   : > { %2604 = vmatpush.bf16.msra.mxu2 %v6389_v9  ;;  %v5905_v49 = vld [vmem:[%s10338_s1 + $0xa64] sm:$0xf0]  ;;  %10691 = vst [vmem:[#allocation11_spill] sm:$0xff] %v6479_v52  ;;  %v5539_v53 = vld [vmem:[%s10338_s1 + $0xbd0] sm:$0xf]  ;;  %v6492_v60 = vor.u32 %v5857_v47, %v5155_v42  ;;  %vm3206_vm0 = vcmask 1043456  }
  0x2e   : > { %2617 = vmatpush.bf16.msra.mxu3 %v6401_v14  ;;  %v5953_v54 = vld [vmem:[%s10338_s1 + $0xbe4] sm:$0xf0]  ;;  %10692 = vst [vmem:[#allocation12_spill] sm:$0xff] %v6488_v55  ;;  %v6494_v61 = vor.u32 %v5905_v49, %v5347_v48  ;;  %v4939_v63 = vld [vmem:[%s10338_s1 + $0x720] sm:$0xf]  ;;  %s8839_s6 = scalar_lea.vmem [#allocation2], %s8755_s19 }
  0x2f   : > { %2579 = vmatpush.bf16.msra.mxu0 %v6419_v23  ;;  %10693 = vst [vmem:[#allocation13_spill] sm:$0xff] %v6490_v59  ;;  %v5803_v0 = vld [vmem:[%s10338_s1 + $0x734] sm:$0xf0]  ;;  %v5131_v1 = vld [vmem:[%s10338_s1 + $0x8a0] sm:$0xf]  ;;  %v6506_v2 = vor.u32 %v5953_v54, %v5539_v53  ;;  %s3916_s30 = sshll.u32 %s8839_s6, 4  ;;  %s3917_s30 = int_to_ptr.vmem [resolvable:$true] %s3916_s30 }
  0x30   : > { %2592 = vmatpush.bf16.msra.mxu1 %v6429_v27  ;;  %10694 = vst [vmem:[#allocation14_spill] sm:$0xff] %v6492_v60  ;;  %v5851_v4 = vld [vmem:[%s10338_s1 + $0x8b4] sm:$0xf0]  ;;  %v5323_v10 = vld [vmem:[%s10338_s1 + $0xa20] sm:$0xf]  ;;  %v6527_v18 = vor.u32 %v5803_v0, %v4939_v63  ;;  %s6045_s21 = scalar_lea.hbm %s10340_s3, 96 }
  0x31   : > { %2605 = vmatpush.bf16.msra.mxu2 %v6431_v28  ;;  %10695 = vst [vmem:[#allocation15_spill] sm:$0xff] %v6494_v61  ;;  %v5899_v11 = vld [vmem:[%s10338_s1 + $0xa34] sm:$0xf0]  ;;  %v5515_v13 = vld [vmem:[%s10338_s1 + $0xba0] sm:$0xf]  ;;  %v6537_v22 = vor.u32 %v5851_v4, %v5131_v1 }
  0x32   : > { %2618 = vmatpush.bf16.msra.mxu3 %v6443_v35  ;;  %10696 = vst [vmem:[#allocation16_spill] sm:$0xff] %v6506_v2  ;;  %v5947_v15 = vld [vmem:[%s10338_s1 + $0xbb4] sm:$0xf0]  ;;  %v4915_v19 = vld [vmem:[%s10338_s1 + $0x6f0] sm:$0xf]  ;;  %v6539_v24 = vor.u32 %v5899_v11, %v5323_v10 }
  0x33   : > { %2580 = vmatpush.bf16.msra.mxu0 %v6464_v43  ;;  %10697 = vst [vmem:[#allocation17_spill] sm:$0xff] %v6527_v18  ;;  %v5797_v20 = vld [vmem:[%s10338_s1 + $0x704] sm:$0xf0]  ;;  %v5107_v26 = vld [vmem:[%s10338_s1 + $0x870] sm:$0xf]  ;;  %v6549_v31 = vor.u32 %v5947_v15, %v5515_v13  ;;  %v610_v13 = vld [vmem:[%s6602_s9] sm:$0xff] }
  0x34   : > { %2593 = vmatpush.bf16.msra.mxu1 %v6477_v51  ;;  %10698 = vst [vmem:[#allocation18_spill] sm:$0xff] %v6537_v22  ;;  %v5845_v30 = vld [vmem:[%s10338_s1 + $0x884] sm:$0xf0]  ;;  %v5299_v32 = vld [vmem:[%s10338_s1 + $0x9f0] sm:$0xf]  ;;  %v6564_v40 = vor.u32 %v5797_v20, %v4915_v19 }
  0x35   : > { %2606 = vmatpush.bf16.msra.mxu2 %v6479_v52  ;;  %10699 = vst [vmem:[#allocation19_spill] sm:$0xff] %v6539_v24  ;;  %v5893_v36 = vld [vmem:[%s10338_s1 + $0xa04] sm:$0xf0]  ;;  %v5491_v37 = vld [vmem:[%s10338_s1 + $0xb70] sm:$0xf]  ;;  %v6571_v42 = vor.u32 %v5845_v30, %v5107_v26 }
  0x36   : > { %2619 = vmatpush.bf16.msra.mxu3 %v6488_v55  ;;  %10700 = vst [vmem:[#allocation20_spill] sm:$0xff] %v6549_v31  ;;  %v5941_v39 = vld [vmem:[%s10338_s1 + $0xb84] sm:$0xf0]  ;;  %v4891_v41 = vld [vmem:[%s10338_s1 + $0x6c0] sm:$0xf]  ;;  %v6573_v47 = vor.u32 %v5893_v36, %v5299_v32 }
  0x37   : > { %2625 = vmatpush.bf16.msrb.mxu0 %v6490_v59  ;;  %10701 = vst [vmem:[#allocation21_spill] sm:$0xff] %v6564_v40  ;;  %v5791_v48 = vld [vmem:[%s10338_s1 + $0x6d4] sm:$0xf0]  ;;  %v5083_v49 = vld [vmem:[%s10338_s1 + $0x840] sm:$0xf]  ;;  %v6585_v54 = vor.u32 %v5941_v39, %v5491_v37 }
  0x38   : > { %2638 = vmatpush.bf16.msrb.mxu1 %v6492_v60  ;;  %10702 = vst [vmem:[#allocation22_spill] sm:$0xff] %v6571_v42  ;;  %v5839_v53 = vld [vmem:[%s10338_s1 + $0x854] sm:$0xf0]  ;;  %v5275_v63 = vld [vmem:[%s10338_s1 + $0x9c0] sm:$0xf]  ;;  %v6605_v10 = vor.u32 %v5791_v48, %v4891_v41 }
  0x39   : > { %2651 = vmatpush.bf16.msrb.mxu2 %v6494_v61  ;;  %10703 = vst [vmem:[#allocation23_spill] sm:$0xff] %v6573_v47  ;;  %v5887_v0 = vld [vmem:[%s10338_s1 + $0x9d4] sm:$0xf0]  ;;  %v5467_v1 = vld [vmem:[%s10338_s1 + $0xb40] sm:$0xf]  ;;  %v6613_v15 = vor.u32 %v5839_v53, %v5083_v49 }
  0x3a   : > { %2664 = vmatpush.bf16.msrb.mxu3 %v6506_v2  ;;  %10704 = vst [vmem:[#allocation24_spill] sm:$0xff] %v6585_v54  ;;  %v5935_v4 = vld [vmem:[%s10338_s1 + $0xb54] sm:$0xf0]  ;;  %v4867_v11 = vld [vmem:[%s10338_s1 + $0x690] sm:$0xf]  ;;  %v6615_v19 = vor.u32 %v5887_v0, %v5275_v63 }
  0x3b   : > { %2626 = vmatpush.bf16.msrb.mxu0 %v6527_v18  ;;  %10705 = vst [vmem:[#allocation25_spill] sm:$0xff] %v6605_v10  ;;  %v5785_v20 = vld [vmem:[%s10338_s1 + $0x6a4] sm:$0xf0]  ;;  %v5059_v26 = vld [vmem:[%s10338_s1 + $0x810] sm:$0xf]  ;;  %v6624_v30 = vor.u32 %v5935_v4, %v5467_v1 }
  0x3c   : > { %2639 = vmatpush.bf16.msrb.mxu1 %v6537_v22  ;;  %10706 = vst [vmem:[#allocation26_spill] sm:$0xff] %v6613_v15  ;;  %v5833_v32 = vld [vmem:[%s10338_s1 + $0x824] sm:$0xf0]  ;;  %v5251_v36 = vld [vmem:[%s10338_s1 + $0x990] sm:$0xf]  ;;  %v6642_v48 = vor.u32 %v5785_v20, %v4867_v11 }
  0x3d   : > { %2652 = vmatpush.bf16.msrb.mxu2 %v6539_v24  ;;  %10707 = vst [vmem:[#allocation27_spill] sm:$0xff] %v6615_v19  ;;  %v5881_v37 = vld [vmem:[%s10338_s1 + $0x9a4] sm:$0xf0]  ;;  %v5443_v39 = vld [vmem:[%s10338_s1 + $0xb10] sm:$0xf]  ;;  %v6649_v53 = vor.u32 %v5833_v32, %v5059_v26 }
  0x3e   : > { %2665 = vmatpush.bf16.msrb.mxu3 %v6549_v31  ;;  %613 = vst [vmem:[#allocation1] ss:$4 sm:$0xff] %v610_v13  ;;  %v5929_v41 = vld [vmem:[%s10338_s1 + $0xb24] sm:$0xf0]  ;;  %v4843_v49 = vld [vmem:[%s10338_s1 + $0x660] sm:$0xf]  ;;  %v6651_v63 = vor.u32 %v5881_v37, %v5251_v36 }
  0x3f   : > { %2627 = vmatpush.bf16.msrb.mxu0 %v6564_v40  ;;  %10708 = vst [vmem:[#allocation28_spill] sm:$0xff] %v6624_v30  ;;  %v5779_v0 = vld [vmem:[%s10338_s1 + $0x674] sm:$0xf0]  ;;  %v5035_v1 = vld [vmem:[%s10338_s1 + $0x7e0] sm:$0xf]  ;;  %v6663_v11 = vor.u32 %v5929_v41, %v5443_v39 }
  0x40   : > { %2640 = vmatpush.bf16.msrb.mxu1 %v6571_v42  ;;  %10709 = vst [vmem:[#allocation29_spill] sm:$0xff] %v6642_v48  ;;  %v5827_v4 = vld [vmem:[%s10338_s1 + $0x7f4] sm:$0xf0]  ;;  %v5227_v13 = vld [vmem:[%s10338_s1 + $0x960] sm:$0xf]  ;;  %v6686_v41 = vor.u32 %v5779_v0, %v4843_v49 }
  0x41   : > { %2653 = vmatpush.bf16.msrb.mxu2 %v6573_v47  ;;  %10710 = vst [vmem:[#allocation30_spill] sm:$0xff] %v6649_v53  ;;  %v5875_v20 = vld [vmem:[%s10338_s1 + $0x974] sm:$0xf0]  ;;  %v5419_v26 = vld [vmem:[%s10338_s1 + $0xae0] sm:$0xf] }
  0x42   : > { %2666 = vmatpush.bf16.msrb.mxu3 %v6585_v54  ;;  %10711 = vst [vmem:[#allocation31_spill] sm:$0xff] %v6651_v63  ;;  %v5923_v32 = vld [vmem:[%s10338_s1 + $0xaf4] sm:$0xf0]  ;;  %v4819_v36 = vld [vmem:[%s10338_s1 + $0x630] sm:$0xf] }
  0x43   : > { %2628 = vmatpush.bf16.msrb.mxu0 %v6605_v10  ;;  %10712 = vst [vmem:[#allocation32_spill] sm:$0xff] %v6663_v11  ;;  %v5773_v37 = vld [vmem:[%s10338_s1 + $0x644] sm:$0xf0]  ;;  %v6697_v10 = vor.u32 %v5875_v20, %v5227_v13  ;;  %v6705_v49 = vor.u32 %v5923_v32, %v5419_v26  ;;  %v5395_v13 = vld [vmem:[%s10338_s1 + $0xab0] sm:$0xf] }
  0x44   : > { %2641 = vmatpush.bf16.msrb.mxu1 %v6613_v15  ;;  %10713 = vst [vmem:[#allocation33_spill] sm:$0xff] %v6686_v41  ;;  %v6695_v15 = vor.u32 %v5827_v4, %v5035_v1  ;;  %v5821_v0 = vld [vmem:[%s10338_s1 + $0x7c4] sm:$0xf0]  ;;  %v5203_v1 = vld [vmem:[%s10338_s1 + $0x930] sm:$0xf]  ;;  %v6727_v32 = vor.u32 %v5773_v37, %v4819_v36 }
  0x45   : > { %2654 = vmatpush.bf16.msrb.mxu2 %v6615_v19  ;;  %v6684_v39 = vld.sshfl [vmem:[#allocation1 + $0x10] sm:$0xff pattern:$0x73625140]  ;;  %10715 = vst [vmem:[#allocation35_spill] sm:$0xff] %v6697_v10  ;;  %v5869_v4 = vld [vmem:[%s10338_s1 + $0x944] sm:$0xf0] }
  0x46   : > { %2667 = vmatpush.bf16.msrb.mxu3 %v6624_v30  ;;  %v6688_v30 = vld.sshfl [vmem:[#allocation1] sm:$0xff pattern:$0x73625140]  ;;  %v5011_v19 = vld [vmem:[%s10338_s1 + $0x7b0] sm:$0xf]  ;;  %10714 = vst [vmem:[#allocation34_spill] sm:$0xff] %v6695_v15  ;;  %2607 = vmatmul.bf16.vlgmr.msra.gmra.mxu2 %v6684_v39 }
  0x47   : > { %2629 = vmatpush.bf16.msrb.mxu0 %v6642_v48  ;;  %v6699_v48 = vld.sshfl [vmem:[#allocation1 + $0x18] sm:$0xff pattern:$0x73625140]  ;;  %v6701_v54 = vld.sshfl [vmem:[#allocation1 + $0x8] sm:$0xff pattern:$0x73625140] }
  0x48   : > { %2642 = vmatpush.bf16.msrb.mxu1 %v6649_v53  ;;  %10716 = vst [vmem:[#allocation36_spill] sm:$0xff] %v6705_v49  ;;  %2581 = vmatmul.bf16.vlgmr.msra.gmra.mxu0 %v6688_v30  ;;  %v5917_v20 = vld [vmem:[%s10338_s1 + $0xac4] sm:$0xf0]  ;;  %v6737_v53 = vor.u32 %v5821_v0, %v5011_v19  ;;  %v4987_v36 = vld [vmem:[%s10338_s1 + $0x780] sm:$0xf] }
  0x49   : > { %2655 = vmatpush.bf16.msrb.mxu2 %v6651_v63  ;;  %2620 = vmatmul.bf16.vlgmr.msra.gmra.mxu3 %v6699_v48  ;;  %v611_v26 = vld [vmem:[%s6602_s9 + $0x8] sm:$0xff]  ;;  %10717 = vst [vmem:[#allocation37_spill] sm:$0xff] %v6727_v32  ;;  %v5767_v63 = vld [vmem:[%s10338_s1 + $0x614] sm:$0xf0]  ;;  %v5371_v0 = vld [vmem:[%s10338_s1 + $0xa80] sm:$0xf] }
  0x4a   : > { %2668 = vmatpush.bf16.msrb.mxu3 %v6663_v11  ;;  %2594 = vmatmul.bf16.vlgmr.msra.gmra.mxu1 %v6701_v54  ;;  %v4795_v11 = vld [vmem:[%s10338_s1 + $0x600] sm:$0xf]  ;;  %616 = vst [vmem:[#allocation1 + $0x20] ss:$4 sm:$0xff] %v611_v26  ;;  %v5815_v37 = vld [vmem:[%s10338_s1 + $0x794] sm:$0xf0] }
  0x4b   : > { %2630 = vmatpush.bf16.msrb.mxu0 %v6686_v41  ;;  %10718 = vst [vmem:[#allocation38_spill] sm:$0xff] %v6737_v53  ;;  %v6739_v41 = vor.u32 %v5869_v4, %v5203_v1  ;;  %v5179_v26 = vld [vmem:[%s10338_s1 + $0x900] sm:$0xf]  ;;  %v5863_v19 = vld [vmem:[%s10338_s1 + $0x914] sm:$0xf0]  ;;  %v6785_v40 = vor.u32 %v5815_v37, %v4987_v36 }
  0x4c   : > { %2643 = vmatpush.bf16.msrb.mxu1 %v6695_v15  ;;  %v6751_v15 = vor.u32 %v5917_v20, %v5395_v13  ;;  %v5911_v1 = vld [vmem:[%s10338_s1 + $0xa94] sm:$0xf0]  ;;  %v5614_v4 = vld [vmem:[%s10338_s1 + $0x154] sm:$0xf]  ;;  %v4197_v13 = vld [vmem:[%s10338_s1 + $0x168] sm:$0xf0] }
  0x4d   : > { %2656 = vmatpush.bf16.msrb.mxu2 %v6697_v10  ;;  %10719 = vst [vmem:[#allocation39_spill] sm:$0xff] %v6739_v41  ;;  %v5662_v20 = vld [vmem:[%s10338_s1 + $0x2d4] sm:$0xf]  ;;  %v4389_v10 = vld [vmem:[%s10338_s1 + $0x2e8] sm:$0xf0]  ;;  %v6796_v31 = vor.u32 %v5911_v1, %v5371_v0  ;;  %v6798_v24 = vor.u32 %v5614_v4, %v4197_v13 }
  0x4e   : > { %2669 = vmatpush.bf16.msrb.mxu3 %v6705_v49  ;;  %10720 = vst [vmem:[#allocation40_spill] sm:$0xff] %v6751_v15  ;;  %v6772_v49 = vor.u32 %v5767_v63, %v4795_v11  ;;  %v5710_v47 = vld [vmem:[%s10338_s1 + $0x454] sm:$0xf]  ;;  %v4581_v42 = vld [vmem:[%s10338_s1 + $0x468] sm:$0xf0]  ;;  %v6787_v63 = vor.u32 %v5863_v19, %v5179_v26 }
  0x4f   : > { %2631 = vmatpush.bf16.msrb.mxu0 %v6727_v32  ;;  %10722 = vst [vmem:[#allocation42_spill] sm:$0xff] %v6785_v40  ;;  %v5758_v11 = vld [vmem:[%s10338_s1 + $0x5d4] sm:$0xf]  ;;  %v4773_v32 = vld [vmem:[%s10338_s1 + $0x5e8] sm:$0xf0]  ;;  %v6802_v36 = vor.u32 %v5710_v47, %v4581_v42 }
  0x50   : > { %10721 = vst [vmem:[#allocation41_spill] sm:$0xff] %v6772_v49  ;;  %2644 = vmatpush.bf16.msrb.mxu1 %v6737_v53  ;;  %v6800_v53 = vor.u32 %v5662_v20, %v4389_v10  ;;  %v5608_v37 = vld [vmem:[%s10338_s1 + $0x124] sm:$0xf]  ;;  %v4173_v26 = vld [vmem:[%s10338_s1 + $0x138] sm:$0xf0]  ;;  %v6814_v0 = vor.u32 %v5758_v11, %v4773_v32 }
  0x51   : > { %2657 = vmatpush.bf16.msrb.mxu2 %v6739_v41  ;;  %10723 = vst [vmem:[#allocation43_spill] sm:$0xff] %v6787_v63  ;;  %v5656_v19 = vld [vmem:[%s10338_s1 + $0x2a4] sm:$0xf]  ;;  %v4365_v42 = vld [vmem:[%s10338_s1 + $0x2b8] sm:$0xf0]  ;;  %v6835_v4 = vor.u32 %v5608_v37, %v4173_v26 }
  0x52   : > { %2670 = vmatpush.bf16.msrb.mxu3 %v6751_v15  ;;  %10724 = vst [vmem:[#allocation44_spill] sm:$0xff] %v6796_v31  ;;  %v5704_v47 = vld [vmem:[%s10338_s1 + $0x424] sm:$0xf]  ;;  %v4557_v10 = vld [vmem:[%s10338_s1 + $0x438] sm:$0xf0] }
  0x53   : > { %10725 = vst [vmem:[#allocation45_spill] sm:$0xff] %v6798_v24  ;;  %2632 = vmatpush.bf16.msrb.mxu0 %v6772_v49  ;;  %v5752_v32 = vld [vmem:[%s10338_s1 + $0x5a4] sm:$0xf]  ;;  %v4749_v1 = vld [vmem:[%s10338_s1 + $0x5b8] sm:$0xf0]  ;;  %v6850_v37 = vor.u32 %v5704_v47, %v4557_v10 }
  0x54   : > { %10726 = vst [vmem:[#allocation46_spill] sm:$0xff] %v6800_v53  ;;  %2645 = vmatpush.bf16.msrb.mxu1 %v6785_v40  ;;  %v5602_v13 = vld [vmem:[%s10338_s1 + $0xf4] sm:$0xf]  ;;  %v4149_v20 = vld [vmem:[%s10338_s1 + $0x108] sm:$0xf0] }
  0x55   : > { %10727 = vst [vmem:[#allocation47_spill] sm:$0xff] %v6802_v36  ;;  %2658 = vmatpush.bf16.msrb.mxu2 %v6787_v63  ;;  %v5650_v11 = vld [vmem:[%s10338_s1 + $0x274] sm:$0xf]  ;;  %v6858_v63 = vor.u32 %v5752_v32, %v4749_v1  ;;  %v4725_v47 = vld [vmem:[%s10338_s1 + $0x588] sm:$0xf0]  ;;  %v6876_v32 = vor.u32 %v5602_v13, %v4149_v20 }
  0x56   : > { %10728 = vst [vmem:[#allocation48_spill] sm:$0xff] %v6814_v0  ;;  %2671 = vmatpush.bf16.msrb.mxu3 %v6796_v31  ;;  %v6848_v31 = vor.u32 %v5656_v19, %v4365_v42  ;;  %v6852_v26 = vld.sshfl [vmem:[#allocation1 + $0x30] sm:$0xff pattern:$0x73625140]  ;;  %v4533_v19 = vld [vmem:[%s10338_s1 + $0x408] sm:$0xf0] }
  0x57   : > { %2677 = vmatpush.bf16.msra.mxu0 %v6798_v24  ;;  %10729 = vst [vmem:[#allocation49_spill] sm:$0xff] %v6835_v4  ;;  %v4341_v24 = vld [vmem:[%s10338_s1 + $0x288] sm:$0xf0]  ;;  %v5746_v42 = vld [vmem:[%s10338_s1 + $0x574] sm:$0xf] }
  0x58   : > { %2690 = vmatpush.bf16.msra.mxu1 %v6800_v53  ;;  %10730 = vst [vmem:[#allocation50_spill] sm:$0xff] %v6848_v31  ;;  %v5698_v53 = vld [vmem:[%s10338_s1 + $0x3f4] sm:$0xf]  ;;  %v6872_v10 = vld.sshfl [vmem:[#allocation1 + $0x20] sm:$0xff pattern:$0x73625140]  ;;  %2659 = vmatmul.bf16.vlgmr.msrb.gmra.mxu2 %v6852_v26 }
  0x59   : > { %2703 = vmatpush.bf16.msra.mxu2 %v6802_v36  ;;  %10731 = vst [vmem:[#allocation51_spill] sm:$0xff] %v6850_v37  ;;  %v6878_v1 = vld.sshfl [vmem:[#allocation1 + $0x38] sm:$0xff pattern:$0x73625140]  ;;  %v6884_v36 = vor.u32 %v5650_v11, %v4341_v24  ;;  %v6886_v40 = vor.u32 %v5698_v53, %v4533_v19  ;;  %v5644_v20 = vld [vmem:[%s10338_s1 + $0x244] sm:$0xf]  ;;  %2633 = vmatmul.bf16.vlgmr.msrb.gmra.mxu0 %v6872_v10 }
  0x5a   : > { %2716 = vmatpush.bf16.msra.mxu3 %v6814_v0  ;;  %10732 = vst [vmem:[#allocation52_spill] sm:$0xff] %v6858_v63  ;;  %v6880_v0 = vld.sshfl [vmem:[#allocation1 + $0x28] sm:$0xff pattern:$0x73625140]  ;;  %v4125_v13 = vld [vmem:[%s10338_s1 + $0xd8] sm:$0xf0] }
  0x5b   : > { %2678 = vmatpush.bf16.msra.mxu0 %v6835_v4  ;;  %10733 = vst [vmem:[#allocation53_spill] sm:$0xff] %v6876_v32  ;;  %v5596_v4 = vld [vmem:[%s10338_s1 + $0xc4] sm:$0xf]  ;;  %v4317_v24 = vld [vmem:[%s10338_s1 + $0x258] sm:$0xf0]  ;;  %2672 = vmatmul.bf16.vlgmr.msrb.gmra.mxu3 %v6878_v1 }
  0x5c   : > { %2691 = vmatpush.bf16.msra.mxu1 %v6848_v31  ;;  %10734 = vst [vmem:[#allocation54_spill] sm:$0xff] %v6884_v36  ;;  %v6898_v31 = vor.u32 %v5746_v42, %v4725_v47  ;;  %v5692_v53 = vld [vmem:[%s10338_s1 + $0x3c4] sm:$0xf]  ;;  %v4509_v11 = vld [vmem:[%s10338_s1 + $0x3d8] sm:$0xf0]  ;;  %v6919_v47 = vor.u32 %v5596_v4, %v4125_v13 }
  0x5d   : > { %2704 = vmatpush.bf16.msra.mxu2 %v6850_v37  ;;  %10735 = vst [vmem:[#allocation55_spill] sm:$0xff] %v6886_v40  ;;  %2646 = vmatmul.bf16.vlgmr.msrb.gmra.mxu1 %v6880_v0  ;;  %v5740_v19 = vld [vmem:[%s10338_s1 + $0x544] sm:$0xf]  ;;  %v4701_v42 = vld [vmem:[%s10338_s1 + $0x558] sm:$0xf0]  ;;  %v6925_v37 = vor.u32 %v5692_v53, %v4509_v11 }
  0x5e   : > { %2717 = vmatpush.bf16.msra.mxu3 %v6858_v63  ;;  %10736 = vst [vmem:[#allocation56_spill] sm:$0xff] %v6898_v31  ;;  %v6923_v63 = vor.u32 %v5644_v20, %v4317_v24  ;;  %v5590_v49 = vld [vmem:[%s10338_s1 + $0x94] sm:$0xf]  ;;  %v4101_v15 = vld [vmem:[%s10338_s1 + $0xa8] sm:$0xf0]  ;;  %v6937_v13 = vor.u32 %v5740_v19, %v4701_v42 }
  0x5f   : > { %2679 = vmatpush.bf16.msra.mxu0 %v6876_v32  ;;  %10737 = vst [vmem:[#allocation57_spill] sm:$0xff] %v6919_v47  ;;  %v5638_v4 = vld [vmem:[%s10338_s1 + $0x214] sm:$0xf]  ;;  %v4293_v20 = vld [vmem:[%s10338_s1 + $0x228] sm:$0xf0]  ;;  %v6955_v42 = vor.u32 %v5590_v49, %v4101_v15 }
  0x60   : > { %2692 = vmatpush.bf16.msra.mxu1 %v6884_v36  ;;  %10738 = vst [vmem:[#allocation58_spill] sm:$0xff] %v6923_v63  ;;  %v5686_v24 = vld [vmem:[%s10338_s1 + $0x394] sm:$0xf]  ;;  %v4485_v53 = vld [vmem:[%s10338_s1 + $0x3a8] sm:$0xf0] }
  0x61   : > { %2705 = vmatpush.bf16.msra.mxu2 %v6886_v40  ;;  %10739 = vst [vmem:[#allocation59_spill] sm:$0xff] %v6925_v37  ;;  %v5734_v11 = vld [vmem:[%s10338_s1 + $0x514] sm:$0xf]  ;;  %v4677_v19 = vld [vmem:[%s10338_s1 + $0x528] sm:$0xf0]  ;;  %v6961_v40 = vor.u32 %v5686_v24, %v4485_v53 }
  0x62   : > { %2718 = vmatpush.bf16.msra.mxu3 %v6898_v31  ;;  %10740 = vst [vmem:[#allocation60_spill] sm:$0xff] %v6937_v13  ;;  %v6959_v31 = vor.u32 %v5638_v4, %v4293_v20  ;;  %v5584_v36 = vld [vmem:[%s10338_s1 + $0x64] sm:$0xf]  ;;  %v4077_v32 = vld [vmem:[%s10338_s1 + $0x78] sm:$0xf0]  ;;  %v6973_v49 = vor.u32 %v5734_v11, %v4677_v19 }
  0x63   : > { %2680 = vmatpush.bf16.msra.mxu0 %v6919_v47  ;;  %10741 = vst [vmem:[#allocation61_spill] sm:$0xff] %v6955_v42  ;;  %v5632_v15 = vld [vmem:[%s10338_s1 + $0x1e4] sm:$0xf]  ;;  %v4269_v4 = vld [vmem:[%s10338_s1 + $0x1f8] sm:$0xf0]  ;;  %v6991_v19 = vor.u32 %v5584_v36, %v4077_v32 }
  0x64   : > { %2693 = vmatpush.bf16.msra.mxu1 %v6923_v63  ;;  %10742 = vst [vmem:[#allocation62_spill] sm:$0xff] %v6959_v31  ;;  %v5680_v20 = vld [vmem:[%s10338_s1 + $0x364] sm:$0xf]  ;;  %v4461_v24 = vld [vmem:[%s10338_s1 + $0x378] sm:$0xf0] }
  0x65   : > { %2706 = vmatpush.bf16.msra.mxu2 %v6925_v37  ;;  %10743 = vst [vmem:[#allocation63_spill] sm:$0xff] %v6961_v40  ;;  %v5728_v53 = vld [vmem:[%s10338_s1 + $0x4e4] sm:$0xf]  ;;  %v4653_v11 = vld [vmem:[%s10338_s1 + $0x4f8] sm:$0xf0]  ;;  %v6997_v37 = vor.u32 %v5680_v20, %v4461_v24 }
  0x66   : > { %2719 = vmatpush.bf16.msra.mxu3 %v6937_v13  ;;  %10744 = vst [vmem:[#allocation64_spill] sm:$0xff] %v6973_v49  ;;  %v6995_v13 = vor.u32 %v5632_v15, %v4269_v4  ;;  %v5578_v63 = vld [vmem:[%s10338_s1 + $0x34] sm:$0xf]  ;;  %v4053_v47 = vld [vmem:[%s10338_s1 + $0x48] sm:$0xf0]  ;;  %v7009_v32 = vor.u32 %v5728_v53, %v4653_v11 }
  0x67   : > { %2681 = vmatpush.bf16.msra.mxu0 %v6955_v42  ;;  %10745 = vst [vmem:[#allocation65_spill] sm:$0xff] %v6991_v19  ;;  %v5626_v36 = vld [vmem:[%s10338_s1 + $0x1b4] sm:$0xf]  ;;  %v4245_v15 = vld [vmem:[%s10338_s1 + $0x1c8] sm:$0xf0]  ;;  %v7027_v11 = vor.u32 %v5578_v63, %v4053_v47 }
  0x68   : > { %2694 = vmatpush.bf16.msra.mxu1 %v6959_v31  ;;  %10746 = vst [vmem:[#allocation66_spill] sm:$0xff] %v6995_v13  ;;  %v5674_v4 = vld [vmem:[%s10338_s1 + $0x334] sm:$0xf]  ;;  %v4437_v20 = vld [vmem:[%s10338_s1 + $0x348] sm:$0xf0]  ;;  %v7037_v31 = vor.u32 %v5626_v36, %v4245_v15 }
  0x69   : > { %2707 = vmatpush.bf16.msra.mxu2 %v6961_v40  ;;  %10747 = vst [vmem:[#allocation67_spill] sm:$0xff] %v6997_v37  ;;  %v5722_v24 = vld [vmem:[%s10338_s1 + $0x4b4] sm:$0xf]  ;;  %v4629_v53 = vld [vmem:[%s10338_s1 + $0x4c8] sm:$0xf0]  ;;  %v7039_v42 = vor.u32 %v5674_v4, %v4437_v20 }
  0x6a   : > { %2720 = vmatpush.bf16.msra.mxu3 %v6973_v49  ;;  %10748 = vst [vmem:[#allocation68_spill] sm:$0xff] %v7009_v32  ;;  %v5572_v49 = vld [vmem:[%s10338_s1 + $0x4] sm:$0xf]  ;;  %v4029_v40 = vld [vmem:[%s10338_s1 + $0x18] sm:$0xf0] }
  0x6b   : > { %2682 = vmatpush.bf16.msra.mxu0 %v6991_v19  ;;  %10749 = vst [vmem:[#allocation69_spill] sm:$0xff] %v7027_v11  ;;  %v5620_v63 = vld [vmem:[%s10338_s1 + $0x184] sm:$0xf]  ;;  %v4221_v47 = vld [vmem:[%s10338_s1 + $0x198] sm:$0xf0] }
  0x6c   : > { %2695 = vmatpush.bf16.msra.mxu1 %v6995_v13  ;;  %10750 = vst [vmem:[#allocation70_spill] sm:$0xff] %v7037_v31  ;;  %v5668_v19 = vld [vmem:[%s10338_s1 + $0x304] sm:$0xf]  ;;  %v7051_v13 = vor.u32 %v5722_v24, %v4629_v53  ;;  %v4413_v36 = vld [vmem:[%s10338_s1 + $0x318] sm:$0xf0]  ;;  %v7085_v18 = vor.u32 %v5620_v63, %v4221_v47 }
  0x6d   : > { %2708 = vmatpush.bf16.msra.mxu2 %v6997_v37  ;;  %10751 = vst [vmem:[#allocation71_spill] sm:$0xff] %v7039_v42  ;;  %v5716_v15 = vld [vmem:[%s10338_s1 + $0x484] sm:$0xf]  ;;  %v4605_v4 = vld [vmem:[%s10338_s1 + $0x498] sm:$0xf0] }
  0x6e   : > { %2721 = vmatpush.bf16.msra.mxu3 %v7009_v32  ;;  %10752 = vst [vmem:[#allocation72_spill] sm:$0xff] %v7051_v13  ;;  %v5806_v20 = vld [vmem:[%s10338_s1 + $0x754] sm:$0xf]  ;;  %v4965_v24 = vld [vmem:[%s10338_s1 + $0x768] sm:$0xf0]  ;;  %v7072_v32 = vor.u32 %v5572_v49, %v4029_v40  ;;  %v7087_v40 = vor.u32 %v5668_v19, %v4413_v36  ;;  %v7096_v2 = vor.u32 %v5716_v15, %v4605_v4 }
  0x6f   : > { %v5854_v53 = vld [vmem:[%s10338_s1 + $0x8d4] sm:$0xf]  ;;  %2683 = vmatpush.bf16.msra.mxu0 %v7027_v11  ;;  %v5157_v37 = vld [vmem:[%s10338_s1 + $0x8e8] sm:$0xf0]  ;;  %10754 = vst [vmem:[#allocation74_spill] sm:$0xff] %v7085_v18  ;;  %v7098_v61 = vor.u32 %v5806_v20, %v4965_v24 }
  0x70   : > { %10753 = vst [vmem:[#allocation73_spill] sm:$0xff] %v7072_v32  ;;  %v5902_v41 = vld [vmem:[%s10338_s1 + $0xa54] sm:$0xf]  ;;  %v5349_v22 = vld [vmem:[%s10338_s1 + $0xa68] sm:$0xf0]  ;;  %2696 = vmatpush.bf16.msra.mxu1 %v7037_v31  ;;  %v7100_v31 = vor.u32 %v5854_v53, %v5157_v37 }
  0x71   : > { %2709 = vmatpush.bf16.msra.mxu2 %v7039_v42  ;;  %10755 = vst [vmem:[#allocation75_spill] sm:$0xff] %v7087_v40  ;;  %v5950_v49 = vld [vmem:[%s10338_s1 + $0xbd4] sm:$0xf]  ;;  %v5541_v11 = vld [vmem:[%s10338_s1 + $0xbe8] sm:$0xf0]  ;;  %v7102_v63 = vor.u32 %v5902_v41, %v5349_v22 }
  0x72   : > { %2722 = vmatpush.bf16.msra.mxu3 %v7051_v13  ;;  %10756 = vst [vmem:[#allocation76_spill] sm:$0xff] %v7096_v2  ;;  %v5800_v19 = vld [vmem:[%s10338_s1 + $0x724] sm:$0xf]  ;;  %v4941_v47 = vld [vmem:[%s10338_s1 + $0x738] sm:$0xf0]  ;;  %v7114_v15 = vor.u32 %v5950_v49, %v5541_v11 }
  0x73   : > { %10757 = vst [vmem:[#allocation77_spill] sm:$0xff] %v7098_v61  ;;  %v5848_v36 = vld [vmem:[%s10338_s1 + $0x8a4] sm:$0xf]  ;;  %2684 = vmatpush.bf16.msra.mxu0 %v7072_v32  ;;  %v5133_v22 = vld [vmem:[%s10338_s1 + $0x8b8] sm:$0xf0]  ;;  %v7135_v20 = vor.u32 %v5800_v19, %v4941_v47 }
  0x74   : > { %10758 = vst [vmem:[#allocation78_spill] sm:$0xff] %v7100_v31  ;;  %v5896_v41 = vld [vmem:[%s10338_s1 + $0xa24] sm:$0xf]  ;;  %v5325_v37 = vld [vmem:[%s10338_s1 + $0xa38] sm:$0xf0]  ;;  %2697 = vmatpush.bf16.msra.mxu1 %v7085_v18  ;;  %v7139_v24 = vor.u32 %v5848_v36, %v5133_v22 }
  0x75   : > { %10759 = vst [vmem:[#allocation79_spill] sm:$0xff] %v7102_v63  ;;  %2710 = vmatpush.bf16.msra.mxu2 %v7087_v40  ;;  %v5944_v11 = vld [vmem:[%s10338_s1 + $0xba4] sm:$0xf]  ;;  %v5517_v4 = vld [vmem:[%s10338_s1 + $0xbb8] sm:$0xf0]  ;;  %v7141_v53 = vor.u32 %v5896_v41, %v5325_v37 }
  0x76   : > { %10760 = vst [vmem:[#allocation80_spill] sm:$0xff] %v7114_v15  ;;  %2723 = vmatpush.bf16.msra.mxu3 %v7096_v2  ;;  %v5794_v49 = vld [vmem:[%s10338_s1 + $0x6f4] sm:$0xf]  ;;  %v4917_v2 = vld [vmem:[%s10338_s1 + $0x708] sm:$0xf0]  ;;  %v7153_v47 = vor.u32 %v5944_v11, %v5517_v4  ;;  %2685 = vmatmul.bf16.vlgmr.msra.gmra.mxu0 %v6688_v30 }
  0x77   : > { %2729 = vmatpush.bf16.msrb.mxu0 %v7098_v61  ;;  %10761 = vst [vmem:[#allocation81_spill] sm:$0xff] %v7135_v20  ;;  %v5842_v19 = vld [vmem:[%s10338_s1 + $0x874] sm:$0xf]  ;;  %v5109_v36 = vld [vmem:[%s10338_s1 + $0x888] sm:$0xf0]  ;;  %v7174_v4 = vor.u32 %v5794_v49, %v4917_v2  ;;  %2698 = vmatmul.bf16.vlgmr.msra.gmra.mxu1 %v6701_v54 }
  0x78   : > { %2742 = vmatpush.bf16.msrb.mxu1 %v7100_v31  ;;  %10762 = vst [vmem:[#allocation82_spill] sm:$0xff] %v7139_v24  ;;  %v5890_v22 = vld [vmem:[%s10338_s1 + $0x9f4] sm:$0xf]  ;;  %v5301_v41 = vld [vmem:[%s10338_s1 + $0xa08] sm:$0xf0]  ;;  %2711 = vmatmul.bf16.vlgmr.msra.gmra.mxu2 %v6684_v39 }
  0x79   : > { %2755 = vmatpush.bf16.msrb.mxu2 %v7102_v63  ;;  %10763 = vst [vmem:[#allocation83_spill] sm:$0xff] %v7141_v53  ;;  %v5938_v37 = vld [vmem:[%s10338_s1 + $0xb74] sm:$0xf]  ;;  %v5493_v11 = vld [vmem:[%s10338_s1 + $0xb88] sm:$0xf0]  ;;  %2724 = vmatmul.bf16.vlgmr.msra.gmra.mxu3 %v6699_v48  ;;  %v7181_v63 = vor.u32 %v5890_v22, %v5301_v41 }
  0x7a   : > { %2768 = vmatpush.bf16.msrb.mxu3 %v7114_v15  ;;  %10764 = vst [vmem:[#allocation84_spill] sm:$0xff] %v7153_v47  ;;  %v7179_v15 = vor.u32 %v5842_v19, %v5109_v36  ;;  %v5788_v31 = vld [vmem:[%s10338_s1 + $0x6c4] sm:$0xf]  ;;  %v7193_v49 = vor.u32 %v5938_v37, %v5493_v11  ;;  %v5085_v19 = vld [vmem:[%s10338_s1 + $0x858] sm:$0xf0] }
  0x7b   : > { %2730 = vmatpush.bf16.msrb.mxu0 %v7135_v20  ;;  %10765 = vst [vmem:[#allocation85_spill] sm:$0xff] %v7174_v4  ;;  %v4893_v20 = vld [vmem:[%s10338_s1 + $0x6d8] sm:$0xf0]  ;;  %v5836_v2 = vld [vmem:[%s10338_s1 + $0x844] sm:$0xf] }
  0x7c   : > { %2743 = vmatpush.bf16.msrb.mxu1 %v7139_v24  ;;  %10766 = vst [vmem:[#allocation86_spill] sm:$0xff] %v7179_v15  ;;  %v5884_v36 = vld [vmem:[%s10338_s1 + $0x9c4] sm:$0xf]  ;;  %v5277_v22 = vld [vmem:[%s10338_s1 + $0x9d8] sm:$0xf0]  ;;  %v7211_v11 = vor.u32 %v5788_v31, %v4893_v20 }
  0x7d   : > { %2756 = vmatpush.bf16.msrb.mxu2 %v7141_v53  ;;  %10767 = vst [vmem:[#allocation87_spill] sm:$0xff] %v7181_v63  ;;  %v5932_v41 = vld [vmem:[%s10338_s1 + $0xb44] sm:$0xf]  ;;  %v5469_v37 = vld [vmem:[%s10338_s1 + $0xb58] sm:$0xf0]  ;;  %v7217_v53 = vor.u32 %v5884_v36, %v5277_v22 }
  0x7e   : > { %2769 = vmatpush.bf16.msrb.mxu3 %v7153_v47  ;;  %10768 = vst [vmem:[#allocation88_spill] sm:$0xff] %v7193_v49  ;;  %v7215_v47 = vor.u32 %v5836_v2, %v5085_v19  ;;  %v5782_v24 = vld [vmem:[%s10338_s1 + $0x694] sm:$0xf]  ;;  %v4869_v61 = vld [vmem:[%s10338_s1 + $0x6a8] sm:$0xf0]  ;;  %v7229_v20 = vor.u32 %v5932_v41, %v5469_v37 }
  0x7f   : > { %2731 = vmatpush.bf16.msrb.mxu0 %v7174_v4  ;;  %10769 = vst [vmem:[#allocation89_spill] sm:$0xff] %v7211_v11  ;;  %v5830_v31 = vld [vmem:[%s10338_s1 + $0x814] sm:$0xf]  ;;  %v5061_v2 = vld [vmem:[%s10338_s1 + $0x828] sm:$0xf0]  ;;  %v7247_v37 = vor.u32 %v5782_v24, %v4869_v61 }
  0x80   : > { %2744 = vmatpush.bf16.msrb.mxu1 %v7179_v15  ;;  %10770 = vst [vmem:[#allocation90_spill] sm:$0xff] %v7215_v47  ;;  %v5878_v19 = vld [vmem:[%s10338_s1 + $0x994] sm:$0xf]  ;;  %v5253_v36 = vld [vmem:[%s10338_s1 + $0x9a8] sm:$0xf0] }
  0x81   : > { %2757 = vmatpush.bf16.msrb.mxu2 %v7181_v63  ;;  %10771 = vst [vmem:[#allocation91_spill] sm:$0xff] %v7217_v53  ;;  %v5926_v22 = vld [vmem:[%s10338_s1 + $0xb14] sm:$0xf]  ;;  %v5445_v41 = vld [vmem:[%s10338_s1 + $0xb28] sm:$0xf0]  ;;  %v7253_v63 = vor.u32 %v5878_v19, %v5253_v36 }
  0x82   : > { %2770 = vmatpush.bf16.msrb.mxu3 %v7193_v49  ;;  %10772 = vst [vmem:[#allocation92_spill] sm:$0xff] %v7229_v20  ;;  %v7251_v49 = vor.u32 %v5830_v31, %v5061_v2  ;;  %v5776_v15 = vld [vmem:[%s10338_s1 + $0x664] sm:$0xf]  ;;  %v4845_v4 = vld [vmem:[%s10338_s1 + $0x678] sm:$0xf0]  ;;  %v7265_v24 = vor.u32 %v5926_v22, %v5445_v41 }
  0x83   : > { %2732 = vmatpush.bf16.msrb.mxu0 %v7211_v11  ;;  %10773 = vst [vmem:[#allocation93_spill] sm:$0xff] %v7247_v37  ;;  %v5824_v61 = vld [vmem:[%s10338_s1 + $0x7e4] sm:$0xf]  ;;  %v5037_v31 = vld [vmem:[%s10338_s1 + $0x7f8] sm:$0xf0]  ;;  %v7283_v41 = vor.u32 %v5776_v15, %v4845_v4 }
  0x84   : > { %2745 = vmatpush.bf16.msrb.mxu1 %v7215_v47  ;;  %10774 = vst [vmem:[#allocation94_spill] sm:$0xff] %v7251_v49  ;;  %v5872_v2 = vld [vmem:[%s10338_s1 + $0x964] sm:$0xf]  ;;  %v5229_v19 = vld [vmem:[%s10338_s1 + $0x978] sm:$0xf0] }
  0x85   : > { %2758 = vmatpush.bf16.msrb.mxu2 %v7217_v53  ;;  %10775 = vst [vmem:[#allocation95_spill] sm:$0xff] %v7253_v63  ;;  %v5920_v36 = vld [vmem:[%s10338_s1 + $0xae4] sm:$0xf]  ;;  %v5421_v22 = vld [vmem:[%s10338_s1 + $0xaf8] sm:$0xf0]  ;;  %v7289_v53 = vor.u32 %v5872_v2, %v5229_v19 }
  0x86   : > { %2771 = vmatpush.bf16.msrb.mxu3 %v7229_v20  ;;  %10776 = vst [vmem:[#allocation96_spill] sm:$0xff] %v7265_v24  ;;  %v7287_v20 = vor.u32 %v5824_v61, %v5037_v31  ;;  %v5770_v47 = vld [vmem:[%s10338_s1 + $0x634] sm:$0xf]  ;;  %v4821_v11 = vld [vmem:[%s10338_s1 + $0x648] sm:$0xf0]  ;;  %v7301_v4 = vor.u32 %v5920_v36, %v5421_v22 }
  0x87   : > { %2733 = vmatpush.bf16.msrb.mxu0 %v7247_v37  ;;  %10777 = vst [vmem:[#allocation97_spill] sm:$0xff] %v7283_v41  ;;  %v5818_v15 = vld [vmem:[%s10338_s1 + $0x7b4] sm:$0xf]  ;;  %v5013_v61 = vld [vmem:[%s10338_s1 + $0x7c8] sm:$0xf0]  ;;  %v7319_v22 = vor.u32 %v5770_v47, %v4821_v11 }
  0x88   : > { %2746 = vmatpush.bf16.msrb.mxu1 %v7251_v49  ;;  %10778 = vst [vmem:[#allocation98_spill] sm:$0xff] %v7287_v20  ;;  %v5866_v31 = vld [vmem:[%s10338_s1 + $0x934] sm:$0xf]  ;;  %v5205_v2 = vld [vmem:[%s10338_s1 + $0x948] sm:$0xf0]  ;;  %v7329_v49 = vor.u32 %v5818_v15, %v5013_v61 }
  0x89   : > { %2759 = vmatpush.bf16.msrb.mxu2 %v7253_v63  ;;  %10779 = vst [vmem:[#allocation99_spill] sm:$0xff] %v7289_v53  ;;  %v5914_v19 = vld [vmem:[%s10338_s1 + $0xab4] sm:$0xf]  ;;  %v5397_v36 = vld [vmem:[%s10338_s1 + $0xac8] sm:$0xf0]  ;;  %v7331_v37 = vor.u32 %v5866_v31, %v5205_v2 }
  0x8a   : > { %2772 = vmatpush.bf16.msrb.mxu3 %v7265_v24  ;;  %10780 = vst [vmem:[#allocation100_spill] sm:$0xff] %v7301_v4  ;;  %v5764_v24 = vld [vmem:[%s10338_s1 + $0x604] sm:$0xf]  ;;  %v4797_v63 = vld [vmem:[%s10338_s1 + $0x618] sm:$0xf0] }
  0x8b   : > { %2734 = vmatpush.bf16.msrb.mxu0 %v7283_v41  ;;  %10781 = vst [vmem:[#allocation101_spill] sm:$0xff] %v7319_v22  ;;  %v5812_v47 = vld [vmem:[%s10338_s1 + $0x784] sm:$0xf]  ;;  %v4989_v11 = vld [vmem:[%s10338_s1 + $0x798] sm:$0xf0] }
  0x8c   : > { %2747 = vmatpush.bf16.msrb.mxu1 %v7287_v20  ;;  %10782 = vst [vmem:[#allocation102_spill] sm:$0xff] %v7329_v49  ;;  %v5860_v41 = vld [vmem:[%s10338_s1 + $0x904] sm:$0xf]  ;;  %v7343_v20 = vor.u32 %v5914_v19, %v5397_v36  ;;  %v5181_v15 = vld [vmem:[%s10338_s1 + $0x918] sm:$0xf0]  ;;  %v7377_v32 = vor.u32 %v5812_v47, %v4989_v11 }
  0x8d   : > { %2760 = vmatpush.bf16.msrb.mxu2 %v7289_v53  ;;  %10783 = vst [vmem:[#allocation103_spill] sm:$0xff] %v7331_v37  ;;  %v5908_v61 = vld [vmem:[%s10338_s1 + $0xa84] sm:$0xf]  ;;  %v5373_v31 = vld [vmem:[%s10338_s1 + $0xa98] sm:$0xf0] }
  0x8e   : > { %2773 = vmatpush.bf16.msrb.mxu3 %v7301_v4  ;;  %10784 = vst [vmem:[#allocation104_spill] sm:$0xff] %v7343_v20  ;;  %v4203_v2 = vld [vmem:[%s10338_s1 + $0x158] sm:$0xf]  ;;  %v5618_v19 = vld [vmem:[%s10338_s1 + $0x16c] sm:$0xf0]  ;;  %v7364_v4 = vor.u32 %v5764_v24, %v4797_v63  ;;  %v7379_v63 = vor.u32 %v5860_v41, %v5181_v15  ;;  %v7388_v13 = vor.u32 %v5908_v61, %v5373_v31 }
  0x8f   : > { %v4395_v36 = vld [vmem:[%s10338_s1 + $0x2d8] sm:$0xf]  ;;  %2735 = vmatpush.bf16.msrb.mxu0 %v7319_v22  ;;  %v5666_v53 = vld [vmem:[%s10338_s1 + $0x2ec] sm:$0xf0]  ;;  %10786 = vst [vmem:[#allocation106_spill] sm:$0xff] %v7377_v32  ;;  %v7390_v42 = vor.u32 %v5618_v19, %v4203_v2 }
  0x90   : > { %10785 = vst [vmem:[#allocation105_spill] sm:$0xff] %v7364_v4  ;;  %v4587_v40 = vld [vmem:[%s10338_s1 + $0x458] sm:$0xf]  ;;  %v5714_v18 = vld [vmem:[%s10338_s1 + $0x46c] sm:$0xf0]  ;;  %2748 = vmatpush.bf16.msrb.mxu1 %v7329_v49  ;;  %v7392_v49 = vor.u32 %v5666_v53, %v4395_v36 }
  0x91   : > { %2761 = vmatpush.bf16.msrb.mxu2 %v7331_v37  ;;  %10787 = vst [vmem:[#allocation107_spill] sm:$0xff] %v7379_v63  ;;  %v4779_v24 = vld [vmem:[%s10338_s1 + $0x5d8] sm:$0xf]  ;;  %v5762_v22 = vld [vmem:[%s10338_s1 + $0x5ec] sm:$0xf0]  ;;  %v7394_v47 = vor.u32 %v5714_v18, %v4587_v40 }
  0x92   : > { %2774 = vmatpush.bf16.msrb.mxu3 %v7343_v20  ;;  %10788 = vst [vmem:[#allocation108_spill] sm:$0xff] %v7388_v13  ;;  %v4179_v41 = vld [vmem:[%s10338_s1 + $0x128] sm:$0xf]  ;;  %v5612_v11 = vld [vmem:[%s10338_s1 + $0x13c] sm:$0xf0]  ;;  %v7406_v61 = vor.u32 %v5762_v22, %v4779_v24 }
  0x93   : > { %10789 = vst [vmem:[#allocation109_spill] sm:$0xff] %v7390_v42  ;;  %v4371_v15 = vld [vmem:[%s10338_s1 + $0x2a8] sm:$0xf]  ;;  %2736 = vmatpush.bf16.msrb.mxu0 %v7364_v4  ;;  %v5660_v18 = vld [vmem:[%s10338_s1 + $0x2bc] sm:$0xf0]  ;;  %v7427_v2 = vor.u32 %v5612_v11, %v4179_v41 }
  0x94   : > { %10790 = vst [vmem:[#allocation110_spill] sm:$0xff] %v7392_v49  ;;  %v4563_v40 = vld [vmem:[%s10338_s1 + $0x428] sm:$0xf]  ;;  %v5708_v53 = vld [vmem:[%s10338_s1 + $0x43c] sm:$0xf0]  ;;  %2749 = vmatpush.bf16.msrb.mxu1 %v7377_v32  ;;  %v7431_v19 = vor.u32 %v5660_v18, %v4371_v15 }
  0x95   : > { %10791 = vst [vmem:[#allocation111_spill] sm:$0xff] %v7394_v47  ;;  %2762 = vmatpush.bf16.msrb.mxu2 %v7379_v63  ;;  %v4755_v22 = vld [vmem:[%s10338_s1 + $0x5a8] sm:$0xf]  ;;  %v5756_v31 = vld [vmem:[%s10338_s1 + $0x5bc] sm:$0xf0]  ;;  %v7433_v36 = vor.u32 %v5708_v53, %v4563_v40 }
  0x96   : > { %10792 = vst [vmem:[#allocation112_spill] sm:$0xff] %v7406_v61  ;;  %2775 = vmatpush.bf16.msrb.mxu3 %v7388_v13  ;;  %v4155_v24 = vld [vmem:[%s10338_s1 + $0xf8] sm:$0xf]  ;;  %v5606_v13 = vld [vmem:[%s10338_s1 + $0x10c] sm:$0xf0]  ;;  %v7446_v11 = vor.u32 %v5756_v31, %v4755_v22  ;;  %2737 = vmatmul.bf16.vlgmr.msrb.gmra.mxu0 %v6872_v10 }
  0x97   : > { %2781 = vmatpush.bf16.msra.mxu0 %v7390_v42  ;;  %10793 = vst [vmem:[#allocation113_spill] sm:$0xff] %v7427_v2  ;;  %v4347_v41 = vld [vmem:[%s10338_s1 + $0x278] sm:$0xf]  ;;  %v5654_v15 = vld [vmem:[%s10338_s1 + $0x28c] sm:$0xf0]  ;;  %2750 = vmatmul.bf16.vlgmr.msrb.gmra.mxu1 %v6880_v0  ;;  %v7467_v22 = vor.u32 %v5606_v13, %v4155_v24 }
  0x98   : > { %2794 = vmatpush.bf16.msra.mxu1 %v7392_v49  ;;  %10794 = vst [vmem:[#allocation114_spill] sm:$0xff] %v7431_v19  ;;  %2763 = vmatmul.bf16.vlgmr.msrb.gmra.mxu2 %v6852_v26  ;;  %v4539_v18 = vld [vmem:[%s10338_s1 + $0x3f8] sm:$0xf]  ;;  %v5702_v40 = vld [vmem:[%s10338_s1 + $0x40c] sm:$0xf0]  ;;  %v7471_v10 = vor.u32 %v5654_v15, %v4347_v41 }
  0x99   : > { %2807 = vmatpush.bf16.msra.mxu2 %v7394_v47  ;;  %10795 = vst [vmem:[#allocation115_spill] sm:$0xff] %v7433_v36  ;;  %2776 = vmatmul.bf16.vlgmr.msrb.gmra.mxu3 %v6878_v1  ;;  %v4731_v26 = vld [vmem:[%s10338_s1 + $0x578] sm:$0xf]  ;;  %v5750_v53 = vld [vmem:[%s10338_s1 + $0x58c] sm:$0xf0]  ;;  %v7473_v1 = vor.u32 %v5702_v40, %v4539_v18 }
  0x9a   : > { %2820 = vmatpush.bf16.msra.mxu3 %v7406_v61  ;;  %10796 = vst [vmem:[#allocation116_spill] sm:$0xff] %v7446_v11  ;;  %v4131_v31 = vld [vmem:[%s10338_s1 + $0xc8] sm:$0xf]  ;;  %v7485_v13 = vor.u32 %v5750_v53, %v4731_v26  ;;  %v5648_v24 = vld [vmem:[%s10338_s1 + $0x25c] sm:$0xf0] }
  0x9b   : > { %2782 = vmatpush.bf16.msra.mxu0 %v7427_v2  ;;  %10797 = vst [vmem:[#allocation117_spill] sm:$0xff] %v7467_v22  ;;  %v5600_v2 = vld [vmem:[%s10338_s1 + $0xdc] sm:$0xf0]  ;;  %v4323_v0 = vld [vmem:[%s10338_s1 + $0x248] sm:$0xf] }
  0x9c   : > { %2795 = vmatpush.bf16.msra.mxu1 %v7431_v19  ;;  %10798 = vst [vmem:[#allocation118_spill] sm:$0xff] %v7471_v10  ;;  %v4515_v41 = vld [vmem:[%s10338_s1 + $0x3c8] sm:$0xf]  ;;  %v5696_v15 = vld [vmem:[%s10338_s1 + $0x3dc] sm:$0xf0]  ;;  %v7503_v26 = vor.u32 %v5600_v2, %v4131_v31  ;;  %v7507_v53 = vor.u32 %v5648_v24, %v4323_v0 }
  0x9d   : > { %2808 = vmatpush.bf16.msra.mxu2 %v7433_v36  ;;  %10799 = vst [vmem:[#allocation119_spill] sm:$0xff] %v7473_v1  ;;  %v4707_v18 = vld [vmem:[%s10338_s1 + $0x548] sm:$0xf]  ;;  %v5744_v40 = vld [vmem:[%s10338_s1 + $0x55c] sm:$0xf0] }
  0x9e   : > { %2821 = vmatpush.bf16.msra.mxu3 %v7446_v11  ;;  %10800 = vst [vmem:[#allocation120_spill] sm:$0xff] %v7485_v13  ;;  %v7509_v11 = vor.u32 %v5696_v15, %v4515_v41  ;;  %v4107_v36 = vld [vmem:[%s10338_s1 + $0x98] sm:$0xf]  ;;  %v5594_v19 = vld [vmem:[%s10338_s1 + $0xac] sm:$0xf0]  ;;  %v7521_v31 = vor.u32 %v5744_v40, %v4707_v18 }
  0x9f   : > { %2783 = vmatpush.bf16.msra.mxu0 %v7467_v22  ;;  %10801 = vst [vmem:[#allocation121_spill] sm:$0xff] %v7503_v26  ;;  %v4299_v2 = vld [vmem:[%s10338_s1 + $0x218] sm:$0xf]  ;;  %v5642_v0 = vld [vmem:[%s10338_s1 + $0x22c] sm:$0xf0]  ;;  %v7539_v40 = vor.u32 %v5594_v19, %v4107_v36 }
  0xa0   : > { %2796 = vmatpush.bf16.msra.mxu1 %v7471_v10  ;;  %10802 = vst [vmem:[#allocation122_spill] sm:$0xff] %v7507_v53  ;;  %v4491_v24 = vld [vmem:[%s10338_s1 + $0x398] sm:$0xf]  ;;  %v5690_v41 = vld [vmem:[%s10338_s1 + $0x3ac] sm:$0xf0] }
  0xa1   : > { %2809 = vmatpush.bf16.msra.mxu2 %v7473_v1  ;;  %10803 = vst [vmem:[#allocation123_spill] sm:$0xff] %v7509_v11  ;;  %v4683_v15 = vld [vmem:[%s10338_s1 + $0x518] sm:$0xf]  ;;  %v5738_v18 = vld [vmem:[%s10338_s1 + $0x52c] sm:$0xf0]  ;;  %v7545_v1 = vor.u32 %v5690_v41, %v4491_v24 }
  0xa2   : > { %2822 = vmatpush.bf16.msra.mxu3 %v7485_v13  ;;  %10804 = vst [vmem:[#allocation124_spill] sm:$0xff] %v7521_v31  ;;  %v7543_v13 = vor.u32 %v5642_v0, %v4299_v2  ;;  %v4083_v10 = vld [vmem:[%s10338_s1 + $0x68] sm:$0xf]  ;;  %v5588_v22 = vld [vmem:[%s10338_s1 + $0x7c] sm:$0xf0]  ;;  %v7557_v36 = vor.u32 %v5738_v18, %v4683_v15 }
  0xa3   : > { %2784 = vmatpush.bf16.msra.mxu0 %v7503_v26  ;;  %10805 = vst [vmem:[#allocation125_spill] sm:$0xff] %v7539_v40  ;;  %v4275_v19 = vld [vmem:[%s10338_s1 + $0x1e8] sm:$0xf]  ;;  %v5636_v2 = vld [vmem:[%s10338_s1 + $0x1fc] sm:$0xf0]  ;;  %v7575_v18 = vor.u32 %v5588_v22, %v4083_v10 }
  0xa4   : > { %2797 = vmatpush.bf16.msra.mxu1 %v7507_v53  ;;  %10806 = vst [vmem:[#allocation126_spill] sm:$0xff] %v7543_v13  ;;  %v4467_v0 = vld [vmem:[%s10338_s1 + $0x368] sm:$0xf]  ;;  %v5684_v24 = vld [vmem:[%s10338_s1 + $0x37c] sm:$0xf0] }
  0xa5   : > { %2810 = vmatpush.bf16.msra.mxu2 %v7509_v11  ;;  %10807 = vst [vmem:[#allocation127_spill] sm:$0xff] %v7545_v1  ;;  %v4659_v41 = vld [vmem:[%s10338_s1 + $0x4e8] sm:$0xf]  ;;  %v5732_v15 = vld [vmem:[%s10338_s1 + $0x4fc] sm:$0xf0]  ;;  %v7581_v11 = vor.u32 %v5684_v24, %v4467_v0 }
  0xa6   : > { %2823 = vmatpush.bf16.msra.mxu3 %v7521_v31  ;;  %10808 = vst [vmem:[#allocation128_spill] sm:$0xff] %v7557_v36  ;;  %v7579_v31 = vor.u32 %v5636_v2, %v4275_v19  ;;  %v4059_v53 = vld [vmem:[%s10338_s1 + $0x38] sm:$0xf]  ;;  %v5582_v26 = vld [vmem:[%s10338_s1 + $0x4c] sm:$0xf0]  ;;  %v7593_v10 = vor.u32 %v5732_v15, %v4659_v41 }
  0xa7   : > { %2785 = vmatpush.bf16.msra.mxu0 %v7539_v40  ;;  %10809 = vst [vmem:[#allocation129_spill] sm:$0xff] %v7575_v18  ;;  %v4251_v22 = vld [vmem:[%s10338_s1 + $0x1b8] sm:$0xf]  ;;  %v5630_v19 = vld [vmem:[%s10338_s1 + $0x1cc] sm:$0xf0]  ;;  %v7611_v15 = vor.u32 %v5582_v26, %v4059_v53 }
  0xa8   : > { %2798 = vmatpush.bf16.msra.mxu1 %v7543_v13  ;;  %10810 = vst [vmem:[#allocation130_spill] sm:$0xff] %v7579_v31  ;;  %v4443_v2 = vld [vmem:[%s10338_s1 + $0x338] sm:$0xf]  ;;  %v5678_v0 = vld [vmem:[%s10338_s1 + $0x34c] sm:$0xf0]  ;;  %v7621_v13 = vor.u32 %v5630_v19, %v4251_v22 }
  0xa9   : > { %2811 = vmatpush.bf16.msra.mxu2 %v7545_v1  ;;  %10811 = vst [vmem:[#allocation131_spill] sm:$0xff] %v7581_v11  ;;  %v4635_v24 = vld [vmem:[%s10338_s1 + $0x4b8] sm:$0xf]  ;;  %v5726_v41 = vld [vmem:[%s10338_s1 + $0x4cc] sm:$0xf0]  ;;  %v7623_v40 = vor.u32 %v5678_v0, %v4443_v2 }
  0xaa   : > { %2824 = vmatpush.bf16.msra.mxu3 %v7557_v36  ;;  %10812 = vst [vmem:[#allocation132_spill] sm:$0xff] %v7593_v10  ;;  %v4035_v36 = vld [vmem:[%s10338_s1 + $0x8] sm:$0xf]  ;;  %v5576_v1 = vld [vmem:[%s10338_s1 + $0x1c] sm:$0xf0] }
  0xab   : > { %2786 = vmatpush.bf16.msra.mxu0 %v7575_v18  ;;  %10813 = vst [vmem:[#allocation133_spill] sm:$0xff] %v7611_v15  ;;  %v4227_v26 = vld [vmem:[%s10338_s1 + $0x188] sm:$0xf]  ;;  %v5624_v53 = vld [vmem:[%s10338_s1 + $0x19c] sm:$0xf0] }
  0xac   : > { %2799 = vmatpush.bf16.msra.mxu1 %v7579_v31  ;;  %10814 = vst [vmem:[#allocation134_spill] sm:$0xff] %v7621_v13  ;;  %v4419_v18 = vld [vmem:[%s10338_s1 + $0x308] sm:$0xf]  ;;  %v7635_v31 = vor.u32 %v5726_v41, %v4635_v24  ;;  %v5672_v22 = vld [vmem:[%s10338_s1 + $0x31c] sm:$0xf0]  ;;  %v7669_v49 = vor.u32 %v5624_v53, %v4227_v26 }
  0xad   : > { %2812 = vmatpush.bf16.msra.mxu2 %v7581_v11  ;;  %10815 = vst [vmem:[#allocation135_spill] sm:$0xff] %v7623_v40  ;;  %v4611_v19 = vld [vmem:[%s10338_s1 + $0x488] sm:$0xf]  ;;  %v5720_v2 = vld [vmem:[%s10338_s1 + $0x49c] sm:$0xf0] }
  0xae   : > { %2825 = vmatpush.bf16.msra.mxu3 %v7593_v10  ;;  %10816 = vst [vmem:[#allocation136_spill] sm:$0xff] %v7635_v31  ;;  %v4971_v0 = vld [vmem:[%s10338_s1 + $0x758] sm:$0xf]  ;;  %v5810_v24 = vld [vmem:[%s10338_s1 + $0x76c] sm:$0xf0]  ;;  %v7656_v10 = vor.u32 %v5576_v1, %v4035_v36  ;;  %v7671_v1 = vor.u32 %v5672_v22, %v4419_v18  ;;  %v7680_v42 = vor.u32 %v5720_v2, %v4611_v19 }
  0xaf   : > { %v5163_v41 = vld [vmem:[%s10338_s1 + $0x8d8] sm:$0xf]  ;;  %2787 = vmatpush.bf16.msra.mxu0 %v7611_v15  ;;  %v5858_v11 = vld [vmem:[%s10338_s1 + $0x8ec] sm:$0xf0]  ;;  %10818 = vst [vmem:[#allocation138_spill] sm:$0xff] %v7669_v49  ;;  %v7682_v63 = vor.u32 %v5810_v24, %v4971_v0 }
  0xb0   : > { %10817 = vst [vmem:[#allocation137_spill] sm:$0xff] %v7656_v10  ;;  %v5355_v61 = vld [vmem:[%s10338_s1 + $0xa58] sm:$0xf]  ;;  %v5906_v47 = vld [vmem:[%s10338_s1 + $0xa6c] sm:$0xf0]  ;;  %2800 = vmatpush.bf16.msra.mxu1 %v7621_v13  ;;  %v7684_v13 = vor.u32 %v5858_v11, %v5163_v41  ;;  %v7727_v41 = vld [vmem:[%s10339_s2] sm:$0xff] }
  0xb1   : > { %2813 = vmatpush.bf16.msra.mxu2 %v7623_v40  ;;  %10819 = vst [vmem:[#allocation139_spill] sm:$0xff] %v7671_v1  ;;  %v5547_v36 = vld [vmem:[%s10338_s1 + $0xbd8] sm:$0xf]  ;;  %v5954_v15 = vld [vmem:[%s10338_s1 + $0xbec] sm:$0xf0]  ;;  %v7686_v26 = vor.u32 %v5906_v47, %v5355_v61 }
  0xb2   : > { %2826 = vmatpush.bf16.msra.mxu3 %v7635_v31  ;;  %10820 = vst [vmem:[#allocation140_spill] sm:$0xff] %v7680_v42  ;;  %v4947_v18 = vld [vmem:[%s10338_s1 + $0x728] sm:$0xf]  ;;  %v5804_v53 = vld [vmem:[%s10338_s1 + $0x73c] sm:$0xf0]  ;;  %v7698_v19 = vor.u32 %v5954_v15, %v5547_v36 }
  0xb3   : > { %10821 = vst [vmem:[#allocation141_spill] sm:$0xff] %v7682_v63  ;;  %v5139_v22 = vld [vmem:[%s10338_s1 + $0x8a8] sm:$0xf]  ;;  %2788 = vmatpush.bf16.msra.mxu0 %v7656_v10  ;;  %v5852_v47 = vld [vmem:[%s10338_s1 + $0x8bc] sm:$0xf0]  ;;  %v7719_v0 = vor.u32 %v5804_v53, %v4947_v18 }
  0xb4   : > { %10822 = vst [vmem:[#allocation142_spill] sm:$0xff] %v7684_v13  ;;  %v5331_v61 = vld [vmem:[%s10338_s1 + $0xa28] sm:$0xf]  ;;  %v5900_v11 = vld [vmem:[%s10338_s1 + $0xa3c] sm:$0xf0]  ;;  %2801 = vmatpush.bf16.msra.mxu1 %v7669_v49  ;;  %v7731_v36 = vor.u32 %v5852_v47, %v5139_v22 }
  0xb5   : > { %10823 = vst [vmem:[#allocation143_spill] sm:$0xff] %v7686_v26  ;;  %2814 = vmatpush.bf16.msra.mxu2 %v7671_v1  ;;  %v5523_v15 = vld [vmem:[%s10338_s1 + $0xba8] sm:$0xf]  ;;  %v5948_v2 = vld [vmem:[%s10338_s1 + $0xbbc] sm:$0xf0] }
  0xb6   : > { %10824 = vst [vmem:[#allocation144_spill] sm:$0xff] %v7698_v19  ;;  %2827 = vmatpush.bf16.msra.mxu3 %v7680_v42  ;;  %v4923_v24 = vld [vmem:[%s10338_s1 + $0x6f8] sm:$0xf]  ;;  %v7733_v42 = vor.u32 %v5900_v11, %v5331_v61  ;;  %v5798_v18 = vld [vmem:[%s10338_s1 + $0x70c] sm:$0xf0]  ;;  %2789 = vmatmul.bf16.vlgmr.msra.gmra.mxu0 %v6688_v30 }
  0xb7   : > { %2833 = vmatpush.bf16.msrb.mxu0 %v7682_v63  ;;  %10825 = vst [vmem:[#allocation145_spill] sm:$0xff] %v7719_v0  ;;  %v5115_v53 = vld [vmem:[%s10338_s1 + $0x878] sm:$0xf]  ;;  %v7743_v63 = vor.u32 %v5948_v2, %v5523_v15  ;;  %v5846_v22 = vld [vmem:[%s10338_s1 + $0x88c] sm:$0xf0]  ;;  %v7764_v2 = vor.u32 %v5798_v18, %v4923_v24  ;;  %2802 = vmatmul.bf16.vlgmr.msra.gmra.mxu1 %v6701_v54 }
  0xb8   : > { %2846 = vmatpush.bf16.msrb.mxu1 %v7684_v13  ;;  %10826 = vst [vmem:[#allocation146_spill] sm:$0xff] %v7731_v36  ;;  %v5307_v47 = vld [vmem:[%s10338_s1 + $0x9f8] sm:$0xf]  ;;  %v5894_v61 = vld [vmem:[%s10338_s1 + $0xa0c] sm:$0xf0]  ;;  %2815 = vmatmul.bf16.vlgmr.msra.gmra.mxu2 %v6684_v39  ;;  %v7769_v39 = vor.u32 %v5846_v22, %v5115_v53 }
  0xb9   : > { %2859 = vmatpush.bf16.msrb.mxu2 %v7686_v26  ;;  %10827 = vst [vmem:[#allocation147_spill] sm:$0xff] %v7733_v42  ;;  %v5499_v11 = vld [vmem:[%s10338_s1 + $0xb78] sm:$0xf]  ;;  %v5942_v15 = vld [vmem:[%s10338_s1 + $0xb8c] sm:$0xf0]  ;;  %2828 = vmatmul.bf16.vlgmr.msra.gmra.mxu3 %v6699_v48 }
  0xba   : > { %2556 = vst [vmem:[#allocation1] ss:$2 sm:$0xff] %v7727_v41  ;;  %2872 = vmatpush.bf16.msrb.mxu3 %v7698_v19  ;;  %v7771_v19 = vor.u32 %v5894_v61, %v5307_v47  ;;  %v4899_v26 = vld [vmem:[%s10338_s1 + $0x6c8] sm:$0xf]  ;;  %v5792_v48 = vld [vmem:[%s10338_s1 + $0x6dc] sm:$0xf0]  ;;  %v7783_v18 = vor.u32 %v5942_v15, %v5499_v11 }
  0xbb   : > { %10828 = vst [vmem:[#allocation148_spill] sm:$0xff] %v7743_v63  ;;  %2834 = vmatpush.bf16.msrb.mxu0 %v7719_v0  ;;  %v5091_v24 = vld [vmem:[%s10338_s1 + $0x848] sm:$0xf]  ;;  %v5840_v53 = vld [vmem:[%s10338_s1 + $0x85c] sm:$0xf0]  ;;  %v7801_v15 = vor.u32 %v5792_v48, %v4899_v26 }
  0xbc   : > { %10829 = vst [vmem:[#allocation149_spill] sm:$0xff] %v7764_v2  ;;  %2847 = vmatpush.bf16.msrb.mxu1 %v7731_v36  ;;  %v5283_v22 = vld [vmem:[%s10338_s1 + $0x9c8] sm:$0xf]  ;;  %v5888_v47 = vld [vmem:[%s10338_s1 + $0x9dc] sm:$0xf0] }
  0xbd   : > { %2860 = vmatpush.bf16.msrb.mxu2 %v7733_v42  ;;  %10830 = vst [vmem:[#allocation150_spill] sm:$0xff] %v7769_v39  ;;  %v5475_v61 = vld [vmem:[%s10338_s1 + $0xb48] sm:$0xf]  ;;  %v5936_v11 = vld [vmem:[%s10338_s1 + $0xb5c] sm:$0xf0]  ;;  %v7807_v42 = vor.u32 %v5888_v47, %v5283_v22 }
  0xbe   : > { %10831 = vst [vmem:[#allocation151_spill] sm:$0xff] %v7771_v19  ;;  %2873 = vmatpush.bf16.msrb.mxu3 %v7743_v63  ;;  %v7805_v63 = vor.u32 %v5840_v53, %v5091_v24  ;;  %v4875_v36 = vld [vmem:[%s10338_s1 + $0x698] sm:$0xf]  ;;  %v5786_v0 = vld [vmem:[%s10338_s1 + $0x6ac] sm:$0xf0]  ;;  %v7819_v48 = vor.u32 %v5936_v11, %v5475_v61 }
  0xbf   : > { %10832 = vst [vmem:[#allocation152_spill] sm:$0xff] %v7783_v18  ;;  %2835 = vmatpush.bf16.msrb.mxu0 %v7764_v2  ;;  %v5067_v26 = vld [vmem:[%s10338_s1 + $0x818] sm:$0xf]  ;;  %v5834_v24 = vld [vmem:[%s10338_s1 + $0x82c] sm:$0xf0]  ;;  %v7837_v11 = vor.u32 %v5786_v0, %v4875_v36 }
  0xc0   : > { %10833 = vst [vmem:[#allocation153_spill] sm:$0xff] %v7801_v15  ;;  %2848 = vmatpush.bf16.msrb.mxu1 %v7769_v39  ;;  %v5259_v53 = vld [vmem:[%s10338_s1 + $0x998] sm:$0xf]  ;;  %v5882_v22 = vld [vmem:[%s10338_s1 + $0x9ac] sm:$0xf0] }
  0xc1   : > { %2861 = vmatpush.bf16.msrb.mxu2 %v7771_v19  ;;  %10834 = vst [vmem:[#allocation154_spill] sm:$0xff] %v7805_v63  ;;  %v5451_v47 = vld [vmem:[%s10338_s1 + $0xb18] sm:$0xf]  ;;  %v5930_v61 = vld [vmem:[%s10338_s1 + $0xb2c] sm:$0xf0]  ;;  %v7843_v19 = vor.u32 %v5882_v22, %v5259_v53 }
  0xc2   : > { %10835 = vst [vmem:[#allocation155_spill] sm:$0xff] %v7807_v42  ;;  %2874 = vmatpush.bf16.msrb.mxu3 %v7783_v18  ;;  %v7841_v18 = vor.u32 %v5834_v24, %v5067_v26  ;;  %v4851_v39 = vld [vmem:[%s10338_s1 + $0x668] sm:$0xf]  ;;  %v5780_v2 = vld [vmem:[%s10338_s1 + $0x67c] sm:$0xf0]  ;;  %v7855_v36 = vor.u32 %v5930_v61, %v5451_v47 }
  0xc3   : > { %10836 = vst [vmem:[#allocation156_spill] sm:$0xff] %v7819_v48  ;;  %2836 = vmatpush.bf16.msrb.mxu0 %v7801_v15  ;;  %v5043_v0 = vld [vmem:[%s10338_s1 + $0x7e8] sm:$0xf]  ;;  %v5828_v26 = vld [vmem:[%s10338_s1 + $0x7fc] sm:$0xf0]  ;;  %v7873_v61 = vor.u32 %v5780_v2, %v4851_v39 }
  0xc4   : > { %10837 = vst [vmem:[#allocation157_spill] sm:$0xff] %v7837_v11  ;;  %2849 = vmatpush.bf16.msrb.mxu1 %v7805_v63  ;;  %v5235_v24 = vld [vmem:[%s10338_s1 + $0x968] sm:$0xf]  ;;  %v5876_v53 = vld [vmem:[%s10338_s1 + $0x97c] sm:$0xf0] }
  0xc5   : > { %2862 = vmatpush.bf16.msrb.mxu2 %v7807_v42  ;;  %10838 = vst [vmem:[#allocation158_spill] sm:$0xff] %v7841_v18  ;;  %v5427_v22 = vld [vmem:[%s10338_s1 + $0xae8] sm:$0xf]  ;;  %v5924_v47 = vld [vmem:[%s10338_s1 + $0xafc] sm:$0xf0]  ;;  %v7879_v42 = vor.u32 %v5876_v53, %v5235_v24  ;;  %v2582_v10 = vpop.f32.mrf.mxu0 }
  0xc6   : > { %10839 = vst [vmem:[#allocation159_spill] sm:$0xff] %v7843_v19  ;;  %2875 = vmatpush.bf16.msrb.mxu3 %v7819_v48  ;;  %v7877_v48 = vor.u32 %v5828_v26, %v5043_v0  ;;  %v4827_v63 = vld [vmem:[%s10338_s1 + $0x638] sm:$0xf]  ;;  %v5774_v15 = vld [vmem:[%s10338_s1 + $0x64c] sm:$0xf0]  ;;  %v7891_v39 = vor.u32 %v5924_v47, %v5427_v22 }
  0xc7   : > { %10840 = vst [vmem:[#allocation160_spill] sm:$0xff] %v7855_v36  ;;  %2837 = vmatpush.bf16.msrb.mxu0 %v7837_v11  ;;  %v5019_v2 = vld [vmem:[%s10338_s1 + $0x7b8] sm:$0xf]  ;;  %v5822_v0 = vld [vmem:[%s10338_s1 + $0x7cc] sm:$0xf0]  ;;  %v2595_v32 = vpop.f32.mrf.mxu1 }
  0xc8   : > { %10841 = vst [vmem:[#allocation161_spill] sm:$0xff] %v7873_v61  ;;  %2850 = vmatpush.bf16.msrb.mxu1 %v7841_v18  ;;  %v5211_v26 = vld [vmem:[%s10338_s1 + $0x938] sm:$0xf]  ;;  %v5870_v24 = vld [vmem:[%s10338_s1 + $0x94c] sm:$0xf0]  ;;  %v7925_v13 = vor.u32 %v5822_v0, %v5019_v2 }
  0xc9   : > { %2863 = vmatpush.bf16.msrb.mxu2 %v7843_v19  ;;  %10842 = vst [vmem:[#allocation162_spill] sm:$0xff] %v7877_v48  ;;  %v5403_v53 = vld [vmem:[%s10338_s1 + $0xab8] sm:$0xf]  ;;  %v5918_v22 = vld [vmem:[%s10338_s1 + $0xacc] sm:$0xf0] }
  0xca   : > { %10843 = vst [vmem:[#allocation163_spill] sm:$0xff] %v7879_v42  ;;  %2876 = vmatpush.bf16.msrb.mxu3 %v7855_v36  ;;  %v4803_v47 = vld [vmem:[%s10338_s1 + $0x608] sm:$0xf]  ;;  %v7912_v36 = vor.u32 %v5774_v15, %v4827_v63  ;;  %v5768_v19 = vld [vmem:[%s10338_s1 + $0x61c] sm:$0xf0]  ;;  %v7927_v63 = vor.u32 %v5870_v24, %v5211_v26 }
  0xcb   : > { %10844 = vst [vmem:[#allocation164_spill] sm:$0xff] %v7891_v39  ;;  %2838 = vmatpush.bf16.msrb.mxu0 %v7873_v61  ;;  %v4995_v18 = vld [vmem:[%s10338_s1 + $0x788] sm:$0xf]  ;;  %v5816_v11 = vld [vmem:[%s10338_s1 + $0x79c] sm:$0xf0] }
  0xcc   : > { %10845 = vst [vmem:[#allocation165_spill] sm:$0xff] %v7912_v36  ;;  %2851 = vmatpush.bf16.msrb.mxu1 %v7877_v48  ;;  %v5187_v15 = vld [vmem:[%s10338_s1 + $0x908] sm:$0xf]  ;;  %v5864_v61 = vld [vmem:[%s10338_s1 + $0x91c] sm:$0xf0]  ;;  %v7939_v48 = vor.u32 %v5918_v22, %v5403_v53  ;;  %v7954_v53 = vor.u32 %v5768_v19, %v4803_v47 }
  0xcd   : > { %2864 = vmatpush.bf16.msrb.mxu2 %v7879_v42  ;;  %10846 = vst [vmem:[#allocation166_spill] sm:$0xff] %v7925_v13  ;;  %v5379_v1 = vld [vmem:[%s10338_s1 + $0xa88] sm:$0xf]  ;;  %v5912_v2 = vld [vmem:[%s10338_s1 + $0xa9c] sm:$0xf0]  ;;  %v7969_v19 = vor.u32 %v5864_v61, %v5187_v15 }
  0xce   : > { %10847 = vst [vmem:[#allocation167_spill] sm:$0xff] %v7927_v63  ;;  %2877 = vmatpush.bf16.msrb.mxu3 %v7891_v39  ;;  %v2561_v0 = vld.sshfl [vmem:[#allocation1] sm:$0xff pattern:$0x75316420]  ;;  %v5615_v26 = vld [vmem:[%s10338_s1 + $0x15c] sm:$0xf]  ;;  %v7978_v4 = vor.u32 %v5912_v2, %v5379_v1 }
  0xcf   : > { %10848 = vst [vmem:[#allocation168_spill] sm:$0xff] %v7939_v48  ;;  %v4205_v24 = vld [vmem:[%s10338_s1 + $0x170] sm:$0xf0]  ;;  %v5663_v42 = vld [vmem:[%s10338_s1 + $0x2dc] sm:$0xf]  ;;  %2839 = vmatpush.bf16.msrb.mxu0 %v7912_v36  ;;  %v7967_v36 = vor.u32 %v5816_v11, %v4995_v18  ;;  %v2583_v40 = vadd.f32 %v2582_v10, %v2561_v0 }
  0xd0   : > { %10849 = vst [vmem:[#allocation169_spill] sm:$0xff] %v7954_v53  ;;  %v4397_v22 = vld [vmem:[%s10338_s1 + $0x2f0] sm:$0xf0]  ;;  %v5711_v39 = vld [vmem:[%s10338_s1 + $0x45c] sm:$0xf]  ;;  %2852 = vmatpush.bf16.msrb.mxu1 %v7925_v13  ;;  %v7980_v13 = vor.u32 %v5615_v26, %v4205_v24  ;;  %v2621_v24 = vpop.f32.mrf.mxu3 }
  0xd1   : > { %v4589_v49 = vld [vmem:[%s10338_s1 + $0x470] sm:$0xf0]  ;;  %2865 = vmatpush.bf16.msrb.mxu2 %v7927_v63  ;;  %10850 = vst [vmem:[#allocation170_spill] sm:$0xff] %v7967_v36  ;;  %v5759_v47 = vld [vmem:[%s10338_s1 + $0x5dc] sm:$0xf]  ;;  %v7982_v18 = vor.u32 %v5663_v42, %v4397_v22  ;;  %v2596_v61 = vadd.f32 %v2595_v32, %v2583_v40 }
  0xd2   : > { %10851 = vst [vmem:[#allocation171_spill] sm:$0xff] %v7969_v19  ;;  %v4781_v31 = vld [vmem:[%s10338_s1 + $0x5f0] sm:$0xf0]  ;;  %2878 = vmatpush.bf16.msrb.mxu3 %v7939_v48  ;;  %v7984_v11 = vor.u32 %v5711_v39, %v4589_v49  ;;  %v5609_v15 = vld [vmem:[%s10338_s1 + $0x12c] sm:$0xf]  ;;  %v2608_v39 = vpop.f32.mrf.mxu2 }
  0xd3   : > { %10852 = vst [vmem:[#allocation172_spill] sm:$0xff] %v7978_v4  ;;  %v4181_v10 = vld [vmem:[%s10338_s1 + $0x140] sm:$0xf0]  ;;  %v5657_v1 = vld [vmem:[%s10338_s1 + $0x2ac] sm:$0xf]  ;;  %2840 = vmatpush.bf16.msrb.mxu0 %v7954_v53  ;;  %v7996_v2 = vor.u32 %v5759_v47, %v4781_v31  ;;  %v2609_v26 = vadd.f32 %v2608_v39, %v2596_v61 }
  0xd4   : > { %10853 = vst [vmem:[#allocation173_spill] sm:$0xff] %v7980_v13  ;;  %v4373_v42 = vld [vmem:[%s10338_s1 + $0x2c0] sm:$0xf0]  ;;  %v5705_v32 = vld [vmem:[%s10338_s1 + $0x42c] sm:$0xf]  ;;  %2853 = vmatpush.bf16.msrb.mxu1 %v7967_v36  ;;  %v8017_v0 = vor.u32 %v5609_v15, %v4181_v10 }
  0xd5   : > { %10854 = vst [vmem:[#allocation174_spill] sm:$0xff] %v7982_v18  ;;  %v4565_v49 = vld [vmem:[%s10338_s1 + $0x440] sm:$0xf0]  ;;  %2866 = vmatpush.bf16.msrb.mxu2 %v7969_v19  ;;  %v5753_v31 = vld [vmem:[%s10338_s1 + $0x5ac] sm:$0xf]  ;;  %v8021_v22 = vor.u32 %v5657_v1, %v4373_v42  ;;  %v8040_v1 = vadd.f32 %v2621_v24, %v2609_v26 }
  0xd6   : > { %10855 = vst [vmem:[#allocation175_spill] sm:$0xff] %v7984_v11  ;;  %v4757_v40 = vld [vmem:[%s10338_s1 + $0x5c0] sm:$0xf0]  ;;  %2879 = vmatpush.bf16.msrb.mxu3 %v7978_v4  ;;  %v8023_v47 = vor.u32 %v5705_v32, %v4565_v49  ;;  %v5603_v19 = vld [vmem:[%s10338_s1 + $0xfc] sm:$0xf] }
  0xd7   : > { %10856 = vst [vmem:[#allocation176_spill] sm:$0xff] %v7996_v2  ;;  %2885 = vmatpush.bf16.msra.mxu0 %v7980_v13  ;;  %v4157_v13 = vld [vmem:[%s10338_s1 + $0x110] sm:$0xf0]  ;;  %v5651_v61 = vld [vmem:[%s10338_s1 + $0x27c] sm:$0xf]  ;;  %v8035_v15 = vor.u32 %v5753_v31, %v4757_v40  ;;  %v2584_v31 = vpop.f32.mrf.mxu0 }
  0xd8   : > { %10857 = vst [vmem:[#allocation177_spill] sm:$0xff] %v8017_v0  ;;  %2898 = vmatpush.bf16.msra.mxu1 %v7982_v18  ;;  %v8037_v10 = vld.sshfl [vmem:[#allocation1 + $0x30] sm:$0xff pattern:$0x73625140]  ;;  %v5699_v32 = vld [vmem:[%s10338_s1 + $0x3fc] sm:$0xf]  ;;  %v8064_v31 = vor.u32 %v5603_v19, %v4157_v13 }
  0xd9   : > { %2911 = vmatpush.bf16.msra.mxu2 %v7984_v11  ;;  %10858 = vst [vmem:[#allocation178_spill] sm:$0xff] %v8021_v22  ;;  %v4349_v42 = vld [vmem:[%s10338_s1 + $0x290] sm:$0xf0]  ;;  %v5747_v40 = vld [vmem:[%s10338_s1 + $0x57c] sm:$0xf] }
  0xda   : > { %10859 = vst [vmem:[#allocation179_spill] sm:$0xff] %v8023_v47  ;;  %2924 = vmatpush.bf16.msra.mxu3 %v7996_v2  ;;  %2867 = vmatmul.bf16.vlgmr.msrb.gmra.mxu2 %v8037_v10  ;;  %v4541_v49 = vld [vmem:[%s10338_s1 + $0x410] sm:$0xf0]  ;;  %v8057_v26 = vld.sshfl [vmem:[#allocation1 + $0x20] sm:$0xff pattern:$0x73625140]  ;;  %v2597_v2 = vpop.f32.mrf.mxu1  ;;  %v8071_v18 = vor.u32 %v5651_v61, %v4349_v42 }
  0xdb   : > { %10860 = vst [vmem:[#allocation180_spill] sm:$0xff] %v8035_v15  ;;  %v4733_v39 = vld [vmem:[%s10338_s1 + $0x590] sm:$0xf0]  ;;  %2841 = vmatmul.bf16.vlgmr.msrb.gmra.mxu0 %v8057_v26  ;;  %v8060_v24 = vld.sshfl [vmem:[#allocation1 + $0x38] sm:$0xff pattern:$0x73625140]  ;;  %v8073_v4 = vor.u32 %v5699_v32, %v4541_v49 }
  0xdc   : > { %2880 = vmatmul.bf16.vlgmr.msrb.gmra.mxu3 %v8060_v24  ;;  %2886 = vmatpush.bf16.msra.mxu0 %v8017_v0  ;;  %10861 = vst [vmem:[#allocation181_spill] sm:$0xff] %v8064_v31  ;;  %v8066_v11 = vld.sshfl [vmem:[#allocation1 + $0x28] sm:$0xff pattern:$0x73625140]  ;;  %v4133_v13 = vld [vmem:[%s10338_s1 + $0xe0] sm:$0xf0] }
  0xdd   : > { %2854 = vmatmul.bf16.vlgmr.msrb.gmra.mxu1 %v8066_v11  ;;  %2912 = vmatpush.bf16.msra.mxu2 %v8023_v47  ;;  %10862 = vst [vmem:[#allocation182_spill] sm:$0xff] %v8071_v18  ;;  %v5597_v2 = vld [vmem:[%s10338_s1 + $0xcc] sm:$0xf]  ;;  %v4325_v61 = vld [vmem:[%s10338_s1 + $0x260] sm:$0xf0]  ;;  %v2623_v47 = vpop.f32.mrf.mxu3 }
  0xde   : > { %2899 = vmatpush.bf16.msra.mxu1 %v8021_v22  ;;  %10863 = vst [vmem:[#allocation183_spill] sm:$0xff] %v8073_v4  ;;  %v5645_v19 = vld [vmem:[%s10338_s1 + $0x24c] sm:$0xf]  ;;  %2925 = vmatpush.bf16.msra.mxu3 %v8035_v15  ;;  %v8085_v22 = vor.u32 %v5747_v40, %v4733_v39  ;;  %v4517_v32 = vld [vmem:[%s10338_s1 + $0x3e0] sm:$0xf0]  ;;  %v2610_v39 = vpop.f32.mrf.mxu2  ;;  %v8103_v15 = vor.u32 %v5597_v2, %v4133_v13 }
  0xdf   : > { %v5693_v42 = vld [vmem:[%s10338_s1 + $0x3cc] sm:$0xf]  ;;  %v4709_v40 = vld [vmem:[%s10338_s1 + $0x560] sm:$0xf0]  ;;  %v8107_v0 = vor.u32 %v5645_v19, %v4325_v61  ;;  %v5591_v53 = vld [vmem:[%s10338_s1 + $0x9c] sm:$0xf] }
  0xe0   : > { %10864 = vst [vmem:[#allocation184_spill] sm:$0xff] %v8085_v22  ;;  %v5741_v49 = vld [vmem:[%s10338_s1 + $0x54c] sm:$0xf]  ;;  %2887 = vmatpush.bf16.msra.mxu0 %v8064_v31  ;;  %v8109_v36 = vor.u32 %v5693_v42, %v4517_v32  ;;  %v4109_v39 = vld [vmem:[%s10338_s1 + $0xb0] sm:$0xf0] }
  0xe1   : > { %10865 = vst [vmem:[#allocation185_spill] sm:$0xff] %v8103_v15  ;;  %2913 = vmatpush.bf16.msra.mxu2 %v8073_v4  ;;  %v5639_v47 = vld [vmem:[%s10338_s1 + $0x21c] sm:$0xf]  ;;  %v8121_v2 = vor.u32 %v5741_v49, %v4709_v40  ;;  %v4301_v13 = vld [vmem:[%s10338_s1 + $0x230] sm:$0xf0]  ;;  %v8138_v49 = vpop.f32.mrf.mxu0  ;;  %v8141_v40 = vor.u32 %v5591_v53, %v4109_v39 }
  0xe2   : > { %2900 = vmatpush.bf16.msra.mxu1 %v8071_v18  ;;  %10866 = vst [vmem:[#allocation186_spill] sm:$0xff] %v8107_v0  ;;  %2926 = vmatpush.bf16.msra.mxu3 %v8085_v22  ;;  %v5687_v19 = vld [vmem:[%s10338_s1 + $0x39c] sm:$0xf]  ;;  %v4493_v61 = vld [vmem:[%s10338_s1 + $0x3b0] sm:$0xf0]  ;;  %v8143_v22 = vpop.f32.mrf.mxu1  ;;  %v8147_v4 = vor.u32 %v5639_v47, %v4301_v13 }
  0xe3   : > { %10867 = vst [vmem:[#allocation187_spill] sm:$0xff] %v8109_v36  ;;  %v5735_v42 = vld [vmem:[%s10338_s1 + $0x51c] sm:$0xf]  ;;  %v4685_v32 = vld [vmem:[%s10338_s1 + $0x530] sm:$0xf0]  ;;  %v8149_v18 = vor.u32 %v5687_v19, %v4493_v61 }
  0xe4   : > { %10868 = vst [vmem:[#allocation188_spill] sm:$0xff] %v8121_v2  ;;  %2888 = vmatpush.bf16.msra.mxu0 %v8103_v15  ;;  %v5585_v31 = vld [vmem:[%s10338_s1 + $0x6c] sm:$0xf]  ;;  %v4085_v15 = vld [vmem:[%s10338_s1 + $0x80] sm:$0xf0]  ;;  %v8161_v39 = vor.u32 %v5735_v42, %v4685_v32 }
  0xe5   : > { %10869 = vst [vmem:[#allocation189_spill] sm:$0xff] %v8141_v40  ;;  %2914 = vmatpush.bf16.msra.mxu2 %v8109_v36  ;;  %v5633_v53 = vld [vmem:[%s10338_s1 + $0x1ec] sm:$0xf]  ;;  %v4277_v47 = vld [vmem:[%s10338_s1 + $0x200] sm:$0xf0] }
  0xe6   : > { %2901 = vmatpush.bf16.msra.mxu1 %v8107_v0  ;;  %10870 = vst [vmem:[#allocation190_spill] sm:$0xff] %v8147_v4  ;;  %2927 = vmatpush.bf16.msra.mxu3 %v8121_v2  ;;  %v5681_v13 = vld [vmem:[%s10338_s1 + $0x36c] sm:$0xf]  ;;  %v4469_v19 = vld [vmem:[%s10338_s1 + $0x380] sm:$0xf0]  ;;  %v8178_v32 = vpop.f32.mrf.mxu2  ;;  %v8181_v2 = vor.u32 %v5585_v31, %v4085_v15  ;;  %v8185_v36 = vor.u32 %v5633_v53, %v4277_v47  ;;  %v8201_v53 = vpop.f32.mrf.mxu3 }
  0xe7   : > { %10871 = vst [vmem:[#allocation191_spill] sm:$0xff] %v8149_v18  ;;  %v5729_v61 = vld [vmem:[%s10338_s1 + $0x4ec] sm:$0xf]  ;;  %v4661_v42 = vld [vmem:[%s10338_s1 + $0x500] sm:$0xf0]  ;;  %v8187_v0 = vor.u32 %v5681_v13, %v4469_v19 }
  0xe8   : > { %10872 = vst [vmem:[#allocation192_spill] sm:$0xff] %v8161_v39  ;;  %2889 = vmatpush.bf16.msra.mxu0 %v8141_v40  ;;  %v5579_v48 = vld [vmem:[%s10338_s1 + $0x3c] sm:$0xf]  ;;  %v4061_v63 = vld [vmem:[%s10338_s1 + $0x50] sm:$0xf0]  ;;  %v8199_v31 = vor.u32 %v5729_v61, %v4661_v42 }
  0xe9   : > { %10873 = vst [vmem:[#allocation193_spill] sm:$0xff] %v8181_v2  ;;  %2915 = vmatpush.bf16.msra.mxu2 %v8149_v18  ;;  %v5627_v15 = vld [vmem:[%s10338_s1 + $0x1bc] sm:$0xf]  ;;  %v4253_v47 = vld [vmem:[%s10338_s1 + $0x1d0] sm:$0xf0]  ;;  %v2636_v42 = vpop.f32.mrf.mxu0  ;;  %v8219_v18 = vor.u32 %v5579_v48, %v4061_v63 }
  0xea   : > { %2902 = vmatpush.bf16.msra.mxu1 %v8147_v4  ;;  %10874 = vst [vmem:[#allocation194_spill] sm:$0xff] %v8185_v36  ;;  %2928 = vmatpush.bf16.msra.mxu3 %v8161_v39  ;;  %v5675_v13 = vld [vmem:[%s10338_s1 + $0x33c] sm:$0xf]  ;;  %v4445_v19 = vld [vmem:[%s10338_s1 + $0x350] sm:$0xf0]  ;;  %v2649_v20 = vpop.f32.mrf.mxu1  ;;  %v8229_v37 = vor.u32 %v5627_v15, %v4253_v47 }
  0xeb   : > { %10875 = vst [vmem:[#allocation195_spill] sm:$0xff] %v8187_v0  ;;  %v5723_v39 = vld [vmem:[%s10338_s1 + $0x4bc] sm:$0xf]  ;;  %v4637_v61 = vld [vmem:[%s10338_s1 + $0x4d0] sm:$0xf0]  ;;  %v8231_v42 = vor.u32 %v5675_v13, %v4445_v19 }
  0xec   : > { %10876 = vst [vmem:[#allocation196_spill] sm:$0xff] %v8199_v31  ;;  %2890 = vmatpush.bf16.msra.mxu0 %v8181_v2  ;;  %v5573_v4 = vld [vmem:[%s10338_s1 + $0xc] sm:$0xf]  ;;  %v4037_v40 = vld [vmem:[%s10338_s1 + $0x20] sm:$0xf0] }
  0xed   : > { %10877 = vst [vmem:[#allocation197_spill] sm:$0xff] %v8219_v18  ;;  %2916 = vmatpush.bf16.msra.mxu2 %v8187_v0  ;;  %v5621_v48 = vld [vmem:[%s10338_s1 + $0x18c] sm:$0xf]  ;;  %v4229_v63 = vld [vmem:[%s10338_s1 + $0x1a0] sm:$0xf0]  ;;  %v8264_v0 = vor.u32 %v5573_v4, %v4037_v40 }
  0xee   : > { %2903 = vmatpush.bf16.msra.mxu1 %v8185_v36  ;;  %10878 = vst [vmem:[#allocation198_spill] sm:$0xff] %v8229_v37  ;;  %v5669_v20 = vld [vmem:[%s10338_s1 + $0x30c] sm:$0xf]  ;;  %2929 = vmatpush.bf16.msra.mxu3 %v8199_v31  ;;  %v8243_v36 = vor.u32 %v5723_v39, %v4637_v61  ;;  %v4421_v15 = vld [vmem:[%s10338_s1 + $0x320] sm:$0xf0]  ;;  %v2662_v31 = vpop.f32.mrf.mxu2 }
  0xef   : > { %10879 = vst [vmem:[#allocation199_spill] sm:$0xff] %v8231_v42  ;;  %v5717_v47 = vld [vmem:[%s10338_s1 + $0x48c] sm:$0xf]  ;;  %v4613_v13 = vld [vmem:[%s10338_s1 + $0x4a0] sm:$0xf0]  ;;  %v8277_v31 = vor.u32 %v5621_v48, %v4229_v63  ;;  %v8279_v4 = vor.u32 %v5669_v20, %v4421_v15 }
  0xf0   : > { %10880 = vst [vmem:[#allocation200_spill] sm:$0xff] %v8243_v36  ;;  %v5807_v19 = vld [vmem:[%s10338_s1 + $0x75c] sm:$0xf]  ;;  %v4973_v39 = vld [vmem:[%s10338_s1 + $0x770] sm:$0xf0]  ;;  %2891 = vmatpush.bf16.msra.mxu0 %v8219_v18  ;;  %v8288_v55 = vor.u32 %v5717_v47, %v4613_v13 }
  0xf1   : > { %v5855_v61 = vld [vmem:[%s10338_s1 + $0x8dc] sm:$0xf]  ;;  %10881 = vst [vmem:[#allocation201_spill] sm:$0xff] %v8264_v0  ;;  %v5165_v2 = vld [vmem:[%s10338_s1 + $0x8f0] sm:$0xf0]  ;;  %2917 = vmatpush.bf16.msra.mxu2 %v8231_v42  ;;  %v8290_v52 = vor.u32 %v5807_v19, %v4973_v39 }
  0xf2   : > { %v5903_v60 = vld [vmem:[%s10338_s1 + $0xa5c] sm:$0xf]  ;;  %v5357_v59 = vld [vmem:[%s10338_s1 + $0xa70] sm:$0xf0]  ;;  %2904 = vmatpush.bf16.msra.mxu1 %v8229_v37  ;;  %10882 = vst [vmem:[#allocation202_spill] sm:$0xff] %v8277_v31  ;;  %2930 = vmatpush.bf16.msra.mxu3 %v8243_v36  ;;  %v2675_v37 = vpop.f32.mrf.mxu3  ;;  %v8292_v42 = vor.u32 %v5855_v61, %v5165_v2 }
  0xf3   : > { %10883 = vst [vmem:[#allocation203_spill] sm:$0xff] %v8279_v4  ;;  %v5951_v40 = vld [vmem:[%s10338_s1 + $0xbdc] sm:$0xf]  ;;  %v5549_v18 = vld [vmem:[%s10338_s1 + $0xbf0] sm:$0xf0]  ;;  %v8294_v48 = vor.u32 %v5903_v60, %v5357_v59 }
  0xf4   : > { %10884 = vst [vmem:[#allocation204_spill] sm:$0xff] %v8288_v55  ;;  %v5801_v63 = vld [vmem:[%s10338_s1 + $0x72c] sm:$0xf]  ;;  %v4949_v20 = vld [vmem:[%s10338_s1 + $0x740] sm:$0xf0]  ;;  %2892 = vmatpush.bf16.msra.mxu0 %v8264_v0  ;;  %v8306_v47 = vor.u32 %v5951_v40, %v5549_v18 }
  0xf5   : > { %10885 = vst [vmem:[#allocation205_spill] sm:$0xff] %v8290_v52  ;;  %v5849_v15 = vld [vmem:[%s10338_s1 + $0x8ac] sm:$0xf]  ;;  %v5141_v59 = vld [vmem:[%s10338_s1 + $0x8c0] sm:$0xf0]  ;;  %2918 = vmatpush.bf16.msra.mxu2 %v8279_v4  ;;  %v8327_v13 = vor.u32 %v5801_v63, %v4949_v20 }
  0xf6   : > { %10886 = vst [vmem:[#allocation206_spill] sm:$0xff] %v8292_v42  ;;  %v5897_v60 = vld [vmem:[%s10338_s1 + $0xa2c] sm:$0xf]  ;;  %v5333_v37 = vld [vmem:[%s10338_s1 + $0xa40] sm:$0xf0]  ;;  %2905 = vmatpush.bf16.msra.mxu1 %v8277_v31  ;;  %2931 = vmatpush.bf16.msra.mxu3 %v8288_v55  ;;  %v8331_v19 = vor.u32 %v5849_v15, %v5141_v59 }
  0xf7   : > { %10887 = vst [vmem:[#allocation207_spill] sm:$0xff] %v8294_v48  ;;  %v5945_v18 = vld [vmem:[%s10338_s1 + $0xbac] sm:$0xf]  ;;  %v5525_v2 = vld [vmem:[%s10338_s1 + $0xbc0] sm:$0xf0]  ;;  %v8333_v39 = vor.u32 %v5897_v60, %v5333_v37  ;;  %2893 = vmatmul.bf16.vlgmr.msra.gmra.mxu0 %v6688_v30 }
  0xf8   : > { %10888 = vst [vmem:[#allocation208_spill] sm:$0xff] %v8306_v47  ;;  %2937 = vmatpush.bf16.msrb.mxu0 %v8290_v52  ;;  %v5795_v61 = vld [vmem:[%s10338_s1 + $0x6fc] sm:$0xf]  ;;  %v4925_v40 = vld [vmem:[%s10338_s1 + $0x710] sm:$0xf0]  ;;  %v8345_v20 = vor.u32 %v5945_v18, %v5525_v2 }
  0xf9   : > { %10889 = vst [vmem:[#allocation209_spill] sm:$0xff] %v8327_v13  ;;  %2963 = vmatpush.bf16.msrb.mxu2 %v8294_v48  ;;  %v5843_v63 = vld [vmem:[%s10338_s1 + $0x87c] sm:$0xf]  ;;  %v5117_v15 = vld [vmem:[%s10338_s1 + $0x890] sm:$0xf0]  ;;  %v8370_v48 = vor.u32 %v5795_v61, %v4925_v40  ;;  %2906 = vmatmul.bf16.vlgmr.msra.gmra.mxu1 %v6701_v54 }
  0xfa   : > { %2950 = vmatpush.bf16.msrb.mxu1 %v8292_v42  ;;  %10890 = vst [vmem:[#allocation210_spill] sm:$0xff] %v8331_v19  ;;  %2976 = vmatpush.bf16.msrb.mxu3 %v8306_v47  ;;  %v5891_v59 = vld [vmem:[%s10338_s1 + $0x9fc] sm:$0xf]  ;;  %v5309_v60 = vld [vmem:[%s10338_s1 + $0xa10] sm:$0xf0]  ;;  %v8375_v42 = vor.u32 %v5843_v63, %v5117_v15 }
  0xfb   : > { %10891 = vst [vmem:[#allocation211_spill] sm:$0xff] %v8333_v39  ;;  %v8356_v37 = vld.sshfl [vmem:[#allocation1 + $0x10] sm:$0xff pattern:$0x73625140]  ;;  %v5939_v18 = vld [vmem:[%s10338_s1 + $0xb7c] sm:$0xf]  ;;  %v8377_v52 = vor.u32 %v5891_v59, %v5309_v60 }
  0xfc   : > { %10892 = vst [vmem:[#allocation212_spill] sm:$0xff] %v8345_v20  ;;  %2919 = vmatmul.bf16.vlgmr.msra.gmra.mxu2 %v8356_v37  ;;  %v5501_v2 = vld [vmem:[%s10338_s1 + $0xb90] sm:$0xf0]  ;;  %v8366_v47 = vld.sshfl [vmem:[#allocation1 + $0x18] sm:$0xff pattern:$0x73625140]  ;;  %2938 = vmatpush.bf16.msrb.mxu0 %v8327_v13 }
  0xfd   : > { %2932 = vmatmul.bf16.vlgmr.msra.gmra.mxu3 %v8366_v47  ;;  %10893 = vst [vmem:[#allocation213_spill] sm:$0xff] %v8370_v48  ;;  %2964 = vmatpush.bf16.msrb.mxu2 %v8333_v39  ;;  %v5789_v55 = vld [vmem:[%s10338_s1 + $0x6cc] sm:$0xf]  ;;  %v4901_v13 = vld [vmem:[%s10338_s1 + $0x6e0] sm:$0xf0]  ;;  %v8389_v40 = vor.u32 %v5939_v18, %v5501_v2 }
  0xfe   : > { %2951 = vmatpush.bf16.msrb.mxu1 %v8331_v19  ;;  %10894 = vst [vmem:[#allocation214_spill] sm:$0xff] %v8375_v42  ;;  %v5837_v61 = vld [vmem:[%s10338_s1 + $0x84c] sm:$0xf]  ;;  %2977 = vmatpush.bf16.msrb.mxu3 %v8345_v20  ;;  %v5093_v63 = vld [vmem:[%s10338_s1 + $0x860] sm:$0xf0]  ;;  %v8407_v2 = vor.u32 %v5789_v55, %v4901_v13  ;;  %v8409_v20 = vpop.f32.mrf.mxu0  ;;  %v8426_v13 = vpop.f32.mrf.mxu1 }
  0xff   : > { %10895 = vst [vmem:[#allocation215_spill] sm:$0xff] %v8377_v52  ;;  %v5885_v15 = vld [vmem:[%s10338_s1 + $0x9cc] sm:$0xf]  ;;  %v5285_v59 = vld [vmem:[%s10338_s1 + $0x9e0] sm:$0xf0]  ;;  %v8413_v39 = vor.u32 %v5837_v61, %v5093_v63 }
 0x100   : > { %10896 = vst [vmem:[#allocation216_spill] sm:$0xff] %v8389_v40  ;;  %v5933_v60 = vld [vmem:[%s10338_s1 + $0xb4c] sm:$0xf]  ;;  %v5477_v18 = vld [vmem:[%s10338_s1 + $0xb60] sm:$0xf0]  ;;  %2939 = vmatpush.bf16.msrb.mxu0 %v8370_v48  ;;  %v8415_v19 = vor.u32 %v5885_v15, %v5285_v59 }
 0x101   : > { %10897 = vst [vmem:[#allocation217_spill] sm:$0xff] %v8407_v2  ;;  %2965 = vmatpush.bf16.msrb.mxu2 %v8377_v52  ;;  %v5783_v4 = vld [vmem:[%s10338_s1 + $0x69c] sm:$0xf]  ;;  %v4877_v48 = vld [vmem:[%s10338_s1 + $0x6b0] sm:$0xf0]  ;;  %v8429_v61 = vor.u32 %v5933_v60, %v5477_v18 }
 0x102   : > { %2952 = vmatpush.bf16.msrb.mxu1 %v8375_v42  ;;  %10898 = vst [vmem:[#allocation218_spill] sm:$0xff] %v8413_v39  ;;  %v5831_v55 = vld [vmem:[%s10338_s1 + $0x81c] sm:$0xf]  ;;  %2978 = vmatpush.bf16.msrb.mxu3 %v8389_v40  ;;  %v5069_v63 = vld [vmem:[%s10338_s1 + $0x830] sm:$0xf0]  ;;  %v8447_v18 = vor.u32 %v5783_v4, %v4877_v48  ;;  %v8464_v48 = vpop.f32.mrf.mxu2 }
 0x103   : > { %10899 = vst [vmem:[#allocation219_spill] sm:$0xff] %v8415_v19  ;;  %v5879_v15 = vld [vmem:[%s10338_s1 + $0x99c] sm:$0xf]  ;;  %v5261_v59 = vld [vmem:[%s10338_s1 + $0x9b0] sm:$0xf0]  ;;  %v8451_v40 = vor.u32 %v5831_v55, %v5069_v63 }
 0x104   : > { %10900 = vst [vmem:[#allocation220_spill] sm:$0xff] %v8429_v61  ;;  %v5927_v52 = vld [vmem:[%s10338_s1 + $0xb1c] sm:$0xf]  ;;  %v5453_v60 = vld [vmem:[%s10338_s1 + $0xb30] sm:$0xf0]  ;;  %2940 = vmatpush.bf16.msrb.mxu0 %v8407_v2  ;;  %v8453_v42 = vor.u32 %v5879_v15, %v5261_v59 }
 0x105   : > { %10901 = vst [vmem:[#allocation221_spill] sm:$0xff] %v8447_v18  ;;  %2966 = vmatpush.bf16.msrb.mxu2 %v8415_v19  ;;  %v5777_v31 = vld [vmem:[%s10338_s1 + $0x66c] sm:$0xf]  ;;  %v4853_v0 = vld [vmem:[%s10338_s1 + $0x680] sm:$0xf0]  ;;  %v8467_v55 = vor.u32 %v5927_v52, %v5453_v60  ;;  %v8478_v19 = vpop.f32.mrf.mxu3 }
 0x106   : > { %2953 = vmatpush.bf16.msrb.mxu1 %v8413_v39  ;;  %10902 = vst [vmem:[#allocation222_spill] sm:$0xff] %v8451_v40  ;;  %v5825_v4 = vld [vmem:[%s10338_s1 + $0x7ec] sm:$0xf]  ;;  %2979 = vmatpush.bf16.msrb.mxu3 %v8429_v61  ;;  %v5045_v63 = vld [vmem:[%s10338_s1 + $0x800] sm:$0xf0]  ;;  %v8487_v60 = vor.u32 %v5777_v31, %v4853_v0  ;;  %v2688_v2 = vpop.f32.mrf.mxu0 }
 0x107   : > { %10903 = vst [vmem:[#allocation223_spill] sm:$0xff] %v8453_v42  ;;  %v5873_v15 = vld [vmem:[%s10338_s1 + $0x96c] sm:$0xf]  ;;  %v5237_v59 = vld [vmem:[%s10338_s1 + $0x980] sm:$0xf0]  ;;  %v8494_v36 = vor.u32 %v5825_v4, %v5045_v63  ;;  %v2701_v2 = vpop.f32.mrf.mxu1 }
 0x108   : > { %10904 = vst [vmem:[#allocation224_spill] sm:$0xff] %v8467_v55  ;;  %v5921_v61 = vld [vmem:[%s10338_s1 + $0xaec] sm:$0xf]  ;;  %v5429_v52 = vld [vmem:[%s10338_s1 + $0xb00] sm:$0xf0]  ;;  %2941 = vmatpush.bf16.msrb.mxu0 %v8447_v18  ;;  %v8496_v51 = vor.u32 %v5873_v15, %v5237_v59 }
 0x109   : > { %10905 = vst [vmem:[#allocation225_spill] sm:$0xff] %v8487_v60  ;;  %v5771_v39 = vld [vmem:[%s10338_s1 + $0x63c] sm:$0xf]  ;;  %2967 = vmatpush.bf16.msrb.mxu2 %v8453_v42  ;;  %v4829_v43 = vld [vmem:[%s10338_s1 + $0x650] sm:$0xf0]  ;;  %v8508_v42 = vor.u32 %v5921_v61, %v5429_v52 }
 0x10a   : > { %2954 = vmatpush.bf16.msrb.mxu1 %v8451_v40  ;;  %10906 = vst [vmem:[#allocation226_spill] sm:$0xff] %v8494_v36  ;;  %v5819_v0 = vld [vmem:[%s10338_s1 + $0x7bc] sm:$0xf]  ;;  %v5021_v31 = vld [vmem:[%s10338_s1 + $0x7d0] sm:$0xf0]  ;;  %2980 = vmatpush.bf16.msrb.mxu3 %v8467_v55  ;;  %v8523_v61 = vor.u32 %v5771_v39, %v4829_v43  ;;  %v2714_v35 = vpop.f32.mrf.mxu2 }
 0x10b   : > { %10907 = vst [vmem:[#allocation227_spill] sm:$0xff] %v8496_v51  ;;  %v5867_v4 = vld [vmem:[%s10338_s1 + $0x93c] sm:$0xf]  ;;  %v5213_v63 = vld [vmem:[%s10338_s1 + $0x950] sm:$0xf0]  ;;  %v8533_v40 = vor.u32 %v5819_v0, %v5021_v31 }
 0x10c   : > { %10908 = vst [vmem:[#allocation228_spill] sm:$0xff] %v8508_v42  ;;  %v5915_v15 = vld [vmem:[%s10338_s1 + $0xabc] sm:$0xf]  ;;  %v5405_v59 = vld [vmem:[%s10338_s1 + $0xad0] sm:$0xf0]  ;;  %2942 = vmatpush.bf16.msrb.mxu0 %v8487_v60  ;;  %v8535_v18 = vor.u32 %v5867_v4, %v5213_v63 }
 0x10d   : > { %v2562_v2 = vld.sshfl [vmem:[#allocation1 + $0x8] sm:$0xff pattern:$0x75316420]  ;;  %10909 = vst [vmem:[#allocation229_spill] sm:$0xff] %v8523_v61  ;;  %v4805_v55 = vld [vmem:[%s10338_s1 + $0x620] sm:$0xf0]  ;;  %2968 = vmatpush.bf16.msrb.mxu2 %v8496_v51  ;;  %v8547_v51 = vor.u32 %v5915_v15, %v5405_v59  ;;  %v2727_v63 = vpop.f32.mrf.mxu3 }
 0x10e   : > { %v5765_v52 = vld [vmem:[%s10338_s1 + $0x60c] sm:$0xf]  ;;  %2955 = vmatpush.bf16.msrb.mxu1 %v8494_v36  ;;  %10910 = vst [vmem:[#allocation230_spill] sm:$0xff] %v8535_v18  ;;  %v4997_v39 = vld [vmem:[%s10338_s1 + $0x7a0] sm:$0xf0]  ;;  %2981 = vmatpush.bf16.msrb.mxu3 %v8508_v42  ;;  %v2687_v36 = vadd.f32 %v8409_v20, %v2562_v2 }
 0x10f   : > { %v5813_v43 = vld [vmem:[%s10338_s1 + $0x78c] sm:$0xf]  ;;  %v5189_v0 = vld [vmem:[%s10338_s1 + $0x920] sm:$0xf0]  ;;  %v4211_v35 = vld [vmem:[%s10338_s1 + $0x160] sm:$0xf]  ;;  %v8569_v42 = vor.u32 %v5765_v52, %v4805_v55 }
 0x110   : > { %v5861_v60 = vld [vmem:[%s10338_s1 + $0x90c] sm:$0xf]  ;;  %v5381_v4 = vld [vmem:[%s10338_s1 + $0xaa0] sm:$0xf0]  ;;  %v5619_v15 = vld [vmem:[%s10338_s1 + $0x174] sm:$0xf0]  ;;  %2943 = vmatpush.bf16.msrb.mxu0 %v8523_v61  ;;  %v8582_v28 = vor.u32 %v5813_v43, %v4997_v39 }
 0x111   : > { %v5909_v31 = vld [vmem:[%s10338_s1 + $0xa8c] sm:$0xf]  ;;  %v4403_v59 = vld [vmem:[%s10338_s1 + $0x2e0] sm:$0xf]  ;;  %v5667_v20 = vld [vmem:[%s10338_s1 + $0x2f4] sm:$0xf0]  ;;  %2969 = vmatpush.bf16.msrb.mxu2 %v8535_v18  ;;  %v8584_v55 = vor.u32 %v5861_v60, %v5189_v0  ;;  %v8595_v23 = vor.u32 %v5619_v15, %v4211_v35  ;;  %v2700_v18 = vadd.f32 %v8426_v13, %v2687_v36 }
 0x112   : > { %v4595_v2 = vld [vmem:[%s10338_s1 + $0x460] sm:$0xf]  ;;  %v5715_v63 = vld [vmem:[%s10338_s1 + $0x474] sm:$0xf0]  ;;  %2956 = vmatpush.bf16.msrb.mxu1 %v8533_v40  ;;  %2982 = vmatpush.bf16.msrb.mxu3 %v8547_v51  ;;  %v8593_v27 = vor.u32 %v5909_v31, %v5381_v4  ;;  %v8598_v43 = vor.u32 %v5667_v20, %v4403_v59  ;;  %v4187_v39 = vld [vmem:[%s10338_s1 + $0x130] sm:$0xf] }
 0x113   : > { %10911 = vst [vmem:[#allocation231_spill] sm:$0xff] %v8584_v55  ;;  %v4787_v52 = vld [vmem:[%s10338_s1 + $0x5e0] sm:$0xf]  ;;  %v5763_v61 = vld [vmem:[%s10338_s1 + $0x5f4] sm:$0xf0]  ;;  %v8600_v60 = vor.u32 %v5715_v63, %v4595_v2  ;;  %v2713_v20 = vadd.f32 %v8464_v48, %v2700_v18 }
 0x114   : > { %10912 = vst [vmem:[#allocation232_spill] sm:$0xff] %v8593_v27  ;;  %v5613_v0 = vld [vmem:[%s10338_s1 + $0x144] sm:$0xf0]  ;;  %v4379_v31 = vld [vmem:[%s10338_s1 + $0x2b0] sm:$0xf]  ;;  %2944 = vmatpush.bf16.msrb.mxu0 %v8569_v42  ;;  %v8612_v4 = vor.u32 %v5763_v61, %v4787_v52 }
 0x115   : > { %10913 = vst [vmem:[#allocation233_spill] sm:$0xff] %v8595_v23  ;;  %v5661_v36 = vld [vmem:[%s10338_s1 + $0x2c4] sm:$0xf0]  ;;  %v4571_v13 = vld [vmem:[%s10338_s1 + $0x430] sm:$0xf]  ;;  %2970 = vmatpush.bf16.msrb.mxu2 %v8584_v55  ;;  %v8633_v59 = vor.u32 %v5613_v0, %v4187_v39 }
 0x116   : > { %10914 = vst [vmem:[#allocation234_spill] sm:$0xff] %v8598_v43  ;;  %v5709_v35 = vld [vmem:[%s10338_s1 + $0x444] sm:$0xf0]  ;;  %2957 = vmatpush.bf16.msrb.mxu1 %v8582_v28  ;;  %v4763_v61 = vld [vmem:[%s10338_s1 + $0x5b0] sm:$0xf]  ;;  %2983 = vmatpush.bf16.msrb.mxu3 %v8593_v27  ;;  %v8638_v2 = vor.u32 %v5661_v36, %v4379_v31 }
 0x117   : > { %10915 = vst [vmem:[#allocation235_spill] sm:$0xff] %v8600_v60  ;;  %v5757_v15 = vld [vmem:[%s10338_s1 + $0x5c4] sm:$0xf0]  ;;  %v8640_v63 = vor.u32 %v5709_v35, %v4571_v13  ;;  %v4163_v52 = vld [vmem:[%s10338_s1 + $0x100] sm:$0xf]  ;;  %2945 = vmatmul.bf16.vlgmr.msrb.gmra.mxu0 %v8057_v26  ;;  %v2726_v35 = vadd.f32 %v8478_v19, %v2713_v20  ;;  %v2635_v19 = vadd.f32 %v8138_v49, %v8040_v1 }
 0x118   : > { %10916 = vst [vmem:[#allocation236_spill] sm:$0xff] %v8612_v4  ;;  %2989 = vmatpush.bf16.msra.mxu0 %v8595_v23  ;;  %v5607_v23 = vld [vmem:[%s10338_s1 + $0x114] sm:$0xf0]  ;;  %v4355_v39 = vld [vmem:[%s10338_s1 + $0x280] sm:$0xf]  ;;  %2971 = vmatmul.bf16.vlgmr.msrb.gmra.mxu2 %v8037_v10  ;;  %v8653_v18 = vor.u32 %v5757_v15, %v4763_v61 }
 0x119   : > { %10917 = vst [vmem:[#allocation237_spill] sm:$0xff] %v8633_v59  ;;  %3015 = vmatpush.bf16.msra.mxu2 %v8600_v60  ;;  %v5655_v48 = vld [vmem:[%s10338_s1 + $0x294] sm:$0xf0]  ;;  %v4547_v0 = vld [vmem:[%s10338_s1 + $0x400] sm:$0xf]  ;;  %2984 = vmatmul.bf16.vlgmr.msrb.gmra.mxu3 %v8060_v24  ;;  %v8674_v13 = vor.u32 %v5607_v23, %v4163_v52 }
 0x11a   : > { %3002 = vmatpush.bf16.msra.mxu1 %v8598_v43  ;;  %10918 = vst [vmem:[#allocation238_spill] sm:$0xff] %v8638_v2  ;;  %3028 = vmatpush.bf16.msra.mxu3 %v8612_v4  ;;  %v5703_v31 = vld [vmem:[%s10338_s1 + $0x414] sm:$0xf0]  ;;  %v4739_v10 = vld [vmem:[%s10338_s1 + $0x580] sm:$0xf]  ;;  %v8679_v26 = vor.u32 %v5655_v48, %v4355_v39 }
 0x11b   : > { %10919 = vst [vmem:[#allocation239_spill] sm:$0xff] %v8640_v63  ;;  %v5751_v36 = vld [vmem:[%s10338_s1 + $0x594] sm:$0xf0]  ;;  %2958 = vmatmul.bf16.vlgmr.msrb.gmra.mxu1 %v8066_v11  ;;  %v8681_v24 = vor.u32 %v5703_v31, %v4547_v0  ;;  %v4139_v61 = vld [vmem:[%s10338_s1 + $0xd0] sm:$0xf]  ;;  %v2738_v0 = vpop.f32.mrf.mxu0 }
 0x11c   : > { %10920 = vst [vmem:[#allocation240_spill] sm:$0xff] %v8653_v18  ;;  %2990 = vmatpush.bf16.msra.mxu0 %v8633_v59  ;;  %v5601_v23 = vld [vmem:[%s10338_s1 + $0xe4] sm:$0xf0]  ;;  %v4331_v11 = vld [vmem:[%s10338_s1 + $0x250] sm:$0xf]  ;;  %v8695_v15 = vor.u32 %v5751_v36, %v4739_v10  ;;  %v2739_v36 = vadd.f32 %v2738_v0, %v2726_v35 }
 0x11d   : > { %10921 = vst [vmem:[#allocation241_spill] sm:$0xff] %v8674_v13  ;;  %3016 = vmatpush.bf16.msra.mxu2 %v8640_v63  ;;  %v5649_v20 = vld [vmem:[%s10338_s1 + $0x264] sm:$0xf0]  ;;  %v4523_v52 = vld [vmem:[%s10338_s1 + $0x3d0] sm:$0xf]  ;;  %v8713_v48 = vor.u32 %v5601_v23, %v4139_v61 }
 0x11e   : > { %3003 = vmatpush.bf16.msra.mxu1 %v8638_v2  ;;  %10922 = vst [vmem:[#allocation242_spill] sm:$0xff] %v8679_v26  ;;  %3029 = vmatpush.bf16.msra.mxu3 %v8653_v18  ;;  %v5697_v39 = vld [vmem:[%s10338_s1 + $0x3e4] sm:$0xf0]  ;;  %v4715_v1 = vld [vmem:[%s10338_s1 + $0x550] sm:$0xf]  ;;  %v8718_v31 = vor.u32 %v5649_v20, %v4331_v11  ;;  %v2751_v18 = vpop.f32.mrf.mxu1  ;;  %v2648_v11 = vadd.f32 %v8143_v22, %v2635_v19 }
 0x11f   : > { %10923 = vst [vmem:[#allocation243_spill] sm:$0xff] %v8681_v24  ;;  %v5745_v49 = vld [vmem:[%s10338_s1 + $0x564] sm:$0xf0]  ;;  %v8720_v10 = vor.u32 %v5697_v39, %v4523_v52  ;;  %v4115_v63 = vld [vmem:[%s10338_s1 + $0xa0] sm:$0xf]  ;;  %v2752_v0 = vadd.f32 %v2751_v18, %v2739_v36  ;;  %v2764_v36 = vpop.f32.mrf.mxu2 }
 0x120   : > { %10924 = vst [vmem:[#allocation244_spill] sm:$0xff] %v8695_v15  ;;  %2991 = vmatpush.bf16.msra.mxu0 %v8674_v13  ;;  %v5595_v61 = vld [vmem:[%s10338_s1 + $0xb4] sm:$0xf0]  ;;  %v4307_v23 = vld [vmem:[%s10338_s1 + $0x220] sm:$0xf]  ;;  %v8733_v20 = vor.u32 %v5745_v49, %v4715_v1 }
 0x121   : > { %10925 = vst [vmem:[#allocation245_spill] sm:$0xff] %v8713_v48  ;;  %3017 = vmatpush.bf16.msra.mxu2 %v8681_v24  ;;  %v5643_v35 = vld [vmem:[%s10338_s1 + $0x234] sm:$0xf0]  ;;  %v4499_v52 = vld [vmem:[%s10338_s1 + $0x3a0] sm:$0xf]  ;;  %v8751_v1 = vor.u32 %v5595_v61, %v4115_v63 }
 0x122   : > { %3004 = vmatpush.bf16.msra.mxu1 %v8679_v26  ;;  %10926 = vst [vmem:[#allocation246_spill] sm:$0xff] %v8718_v31  ;;  %3030 = vmatpush.bf16.msra.mxu3 %v8695_v15  ;;  %v5691_v39 = vld [vmem:[%s10338_s1 + $0x3b4] sm:$0xf0]  ;;  %v4691_v22 = vld [vmem:[%s10338_s1 + $0x520] sm:$0xf]  ;;  %v8759_v18 = vor.u32 %v5643_v35, %v4307_v23  ;;  %v2765_v35 = vadd.f32 %v2764_v36, %v2752_v0 }
 0x123   : > { %10927 = vst [vmem:[#allocation247_spill] sm:$0xff] %v8720_v10  ;;  %v5739_v19 = vld [vmem:[%s10338_s1 + $0x534] sm:$0xf0]  ;;  %v8761_v49 = vor.u32 %v5691_v39, %v4499_v52  ;;  %v4091_v15 = vld [vmem:[%s10338_s1 + $0x70] sm:$0xf]  ;;  %v2777_v52 = vpop.f32.mrf.mxu3  ;;  %v2740_v36 = vpop.f32.mrf.mxu0 }
 0x124   : > { %10928 = vst [vmem:[#allocation248_spill] sm:$0xff] %v8733_v20  ;;  %2992 = vmatpush.bf16.msra.mxu0 %v8713_v48  ;;  %v5589_v63 = vld [vmem:[%s10338_s1 + $0x84] sm:$0xf0]  ;;  %v4283_v61 = vld [vmem:[%s10338_s1 + $0x1f0] sm:$0xf]  ;;  %v8774_v23 = vor.u32 %v5739_v19, %v4691_v22  ;;  %v2778_v0 = vadd.f32 %v2777_v52, %v2765_v35 }
 0x125   : > { %10929 = vst [vmem:[#allocation249_spill] sm:$0xff] %v8751_v1  ;;  %3018 = vmatpush.bf16.msra.mxu2 %v8720_v10  ;;  %v5637_v39 = vld [vmem:[%s10338_s1 + $0x204] sm:$0xf0]  ;;  %v4475_v10 = vld [vmem:[%s10338_s1 + $0x370] sm:$0xf]  ;;  %v8792_v22 = vor.u32 %v5589_v63, %v4091_v15 }
 0x126   : > { %3005 = vmatpush.bf16.msra.mxu1 %v8718_v31  ;;  %10930 = vst [vmem:[#allocation250_spill] sm:$0xff] %v8759_v18  ;;  %v2661_v31 = vadd.f32 %v8178_v32, %v2648_v11  ;;  %3031 = vmatpush.bf16.msra.mxu3 %v8733_v20  ;;  %v5685_v48 = vld [vmem:[%s10338_s1 + $0x384] sm:$0xf0]  ;;  %v4667_v32 = vld [vmem:[%s10338_s1 + $0x4f0] sm:$0xf]  ;;  %v8799_v20 = vor.u32 %v5637_v39, %v4283_v61  ;;  %v2753_v52 = vpop.f32.mrf.mxu1 }
 0x127   : > { %10931 = vst [vmem:[#allocation251_spill] sm:$0xff] %v8761_v49  ;;  %v5733_v11 = vld [vmem:[%s10338_s1 + $0x504] sm:$0xf0]  ;;  %v4067_v19 = vld [vmem:[%s10338_s1 + $0x40] sm:$0xf]  ;;  %v8801_v24 = vor.u32 %v5685_v48, %v4475_v10  ;;  %v3203_v48 = vrot.slane %v2778_v0, 4 }
 0x128   : > { %10932 = vst [vmem:[#allocation252_spill] sm:$0xff] %v8774_v23  ;;  %2993 = vmatpush.bf16.msra.mxu0 %v8751_v1  ;;  %v5583_v35 = vld [vmem:[%s10338_s1 + $0x54] sm:$0xf0]  ;;  %v4259_v15 = vld [vmem:[%s10338_s1 + $0x1c0] sm:$0xf]  ;;  %v2674_v36 = vadd.f32 %v8201_v53, %v2661_v31  ;;  %v8814_v10 = vor.u32 %v5733_v11, %v4667_v32 }
 0x129   : > { %10933 = vst [vmem:[#allocation253_spill] sm:$0xff] %v8792_v22  ;;  %3019 = vmatpush.bf16.msra.mxu2 %v8761_v49  ;;  %v5631_v63 = vld [vmem:[%s10338_s1 + $0x1d4] sm:$0xf0]  ;;  %v4451_v61 = vld [vmem:[%s10338_s1 + $0x340] sm:$0xf]  ;;  %v8830_v32 = vor.u32 %v5583_v35, %v4067_v19 }
 0x12a   : > { %3006 = vmatpush.bf16.msra.mxu1 %v8759_v18  ;;  %10934 = vst [vmem:[#allocation254_spill] sm:$0xff] %v8799_v20  ;;  %3032 = vmatpush.bf16.msra.mxu3 %v8774_v23  ;;  %v5679_v39 = vld [vmem:[%s10338_s1 + $0x354] sm:$0xf0]  ;;  %v4643_v49 = vld [vmem:[%s10338_s1 + $0x4c0] sm:$0xf]  ;;  %v3207_v31 = vsel %vm3206_vm0, %v2674_v36, %v3203_v48  ;;  %v8844_v52 = vor.u32 %v5631_v63, %v4259_v15 }
 0x12b   : > { %10935 = vst [vmem:[#allocation255_spill] sm:$0xff] %v8801_v24  ;;  %v5727_v53 = vld [vmem:[%s10338_s1 + $0x4d4] sm:$0xf0]  ;;  %v4043_v11 = vld [vmem:[%s10338_s1 + $0x10] sm:$0xf]  ;;  %v8846_v19 = vor.u32 %v5679_v39, %v4451_v61  ;;  %v2779_v39 = vpop.f32.mrf.mxu3 }
 0x12c   : > { %10936 = vst [vmem:[#allocation256_spill] sm:$0xff] %v8814_v10  ;;  %2994 = vmatpush.bf16.msra.mxu0 %v8792_v22  ;;  %v5577_v0 = vld [vmem:[%s10338_s1 + $0x24] sm:$0xf0]  ;;  %v4235_v35 = vld [vmem:[%s10338_s1 + $0x190] sm:$0xf] }
 0x12d   : > { %10937 = vst [vmem:[#allocation257_spill] sm:$0xff] %v8830_v32  ;;  %3020 = vmatpush.bf16.msra.mxu2 %v8801_v24  ;;  %v5625_v36 = vld [vmem:[%s10338_s1 + $0x1a4] sm:$0xf0]  ;;  %v4427_v48 = vld [vmem:[%s10338_s1 + $0x310] sm:$0xf]  ;;  %v8858_v24 = vor.u32 %v5727_v53, %v4643_v49 }
 0x12e   : > { %3213 = vst [vmem:[%s8839_s6] sm:$0xff] %v3207_v31  ;;  %3007 = vmatpush.bf16.msra.mxu1 %v8799_v20  ;;  %v2766_v31 = vpop.f32.mrf.mxu2  ;;  %3033 = vmatpush.bf16.msra.mxu3 %v8814_v10  ;;  %v5673_v15 = vld [vmem:[%s10338_s1 + $0x324] sm:$0xf0]  ;;  %v4619_v63 = vld [vmem:[%s10338_s1 + $0x490] sm:$0xf]  ;;  %v5811_v49 = vld [vmem:[%s10338_s1 + $0x774] sm:$0xf0]  ;;  %v8879_v10 = vor.u32 %v5577_v0, %v4043_v11  ;;  %v8892_v23 = vor.u32 %v5625_v36, %v4235_v35 }
 0x12f   : > { %10938 = vst [vmem:[#allocation258_spill] sm:$0xff] %v8844_v52  ;;  %v5721_v61 = vld [vmem:[%s10338_s1 + $0x4a4] sm:$0xf0]  ;;  %v4979_v31 = vld [vmem:[%s10338_s1 + $0x760] sm:$0xf]  ;;  %v8894_v11 = vor.u32 %v5673_v15, %v4427_v48 }
 0x130   : > { %10939 = vst [vmem:[#allocation259_spill] sm:$0xff] %v8846_v19  ;;  %v5171_v53 = vld [vmem:[%s10338_s1 + $0x8e0] sm:$0xf]  ;;  %2995 = vmatpush.bf16.msra.mxu0 %v8830_v32  ;;  %v5859_v39 = vld [vmem:[%s10338_s1 + $0x8f4] sm:$0xf0]  ;;  %v8903_v18 = vor.u32 %v5721_v61, %v4619_v63  ;;  %v8905_v1 = vor.u32 %v5811_v49, %v4979_v31 }
 0x131   : > { %10940 = vst [vmem:[#allocation260_spill] sm:$0xff] %v8858_v24  ;;  %v5363_v20 = vld [vmem:[%s10338_s1 + $0xa60] sm:$0xf]  ;;  %v5907_v22 = vld [vmem:[%s10338_s1 + $0xa74] sm:$0xf0]  ;;  %3021 = vmatpush.bf16.msra.mxu2 %v8846_v19 }
 0x132   : > { %10941 = vst [vmem:[#allocation261_spill] sm:$0xff] %v8879_v10  ;;  %3008 = vmatpush.bf16.msra.mxu1 %v8844_v52  ;;  %v5555_v0 = vld [vmem:[%s10338_s1 + $0xbe0] sm:$0xf]  ;;  %v5955_v32 = vld [vmem:[%s10338_s1 + $0xbf4] sm:$0xf0]  ;;  %3034 = vmatpush.bf16.msra.mxu3 %v8858_v24  ;;  %v8907_v52 = vor.u32 %v5859_v39, %v5171_v53  ;;  %v8909_v35 = vor.u32 %v5907_v22, %v5363_v20  ;;  %v8950_v39 = vld [vmem:[%s10339_s2 + $0x8] sm:$0xff] }
 0x133   : > { %10942 = vst [vmem:[#allocation262_spill] sm:$0xff] %v8892_v23  ;;  %v4955_v36 = vld [vmem:[%s10338_s1 + $0x730] sm:$0xf]  ;;  %v5805_v48 = vld [vmem:[%s10338_s1 + $0x744] sm:$0xf0]  ;;  %v8921_v63 = vor.u32 %v5955_v32, %v5555_v0 }
 0x134   : > { %10943 = vst [vmem:[#allocation263_spill] sm:$0xff] %v8894_v11  ;;  %v5147_v15 = vld [vmem:[%s10338_s1 + $0x8b0] sm:$0xf]  ;;  %2996 = vmatpush.bf16.msra.mxu0 %v8879_v10  ;;  %v5853_v20 = vld [vmem:[%s10338_s1 + $0x8c4] sm:$0xf0]  ;;  %v8942_v49 = vor.u32 %v5805_v48, %v4955_v36 }
 0x135   : > { %10944 = vst [vmem:[#allocation264_spill] sm:$0xff] %v8903_v18  ;;  %v5339_v22 = vld [vmem:[%s10338_s1 + $0xa30] sm:$0xf]  ;;  %v5901_v61 = vld [vmem:[%s10338_s1 + $0xa44] sm:$0xf0]  ;;  %3022 = vmatpush.bf16.msra.mxu2 %v8894_v11  ;;  %v8954_v0 = vor.u32 %v5853_v20, %v5147_v15 }
 0x136   : > { %10945 = vst [vmem:[#allocation265_spill] sm:$0xff] %v8905_v1  ;;  %3009 = vmatpush.bf16.msra.mxu1 %v8892_v23  ;;  %v5531_v32 = vld [vmem:[%s10338_s1 + $0xbb0] sm:$0xf]  ;;  %v5949_v31 = vld [vmem:[%s10338_s1 + $0xbc4] sm:$0xf0]  ;;  %3035 = vmatpush.bf16.msra.mxu3 %v8903_v18  ;;  %v8956_v18 = vor.u32 %v5901_v61, %v5339_v22 }
 0x137   : > { %10946 = vst [vmem:[#allocation266_spill] sm:$0xff] %v8907_v52  ;;  %v4931_v53 = vld [vmem:[%s10338_s1 + $0x700] sm:$0xf]  ;;  %v5799_v36 = vld [vmem:[%s10338_s1 + $0x714] sm:$0xf0]  ;;  %2997 = vmatmul.bf16.vlgmr.msra.gmra.mxu0 %v6688_v30 }
 0x138   : > { %10947 = vst [vmem:[#allocation267_spill] sm:$0xff] %v8909_v35  ;;  %3041 = vmatpush.bf16.msrb.mxu0 %v8905_v1  ;;  %v5123_v48 = vld [vmem:[%s10338_s1 + $0x880] sm:$0xf]  ;;  %v8966_v1 = vor.u32 %v5949_v31, %v5531_v32  ;;  %v5847_v15 = vld [vmem:[%s10338_s1 + $0x894] sm:$0xf0]  ;;  %3023 = vmatmul.bf16.vlgmr.msra.gmra.mxu2 %v8356_v37  ;;  %v8987_v31 = vor.u32 %v5799_v36, %v4931_v53 }
 0x139   : > { %10948 = vst [vmem:[#allocation268_spill] sm:$0xff] %v8921_v63  ;;  %3067 = vmatpush.bf16.msrb.mxu2 %v8909_v35  ;;  %v5315_v20 = vld [vmem:[%s10338_s1 + $0xa00] sm:$0xf]  ;;  %v5895_v22 = vld [vmem:[%s10338_s1 + $0xa14] sm:$0xf0]  ;;  %3036 = vmatmul.bf16.vlgmr.msra.gmra.mxu3 %v8366_v47 }
 0x13a   : > { %10949 = vst [vmem:[#allocation269_spill] sm:$0xff] %v8942_v49  ;;  %3054 = vmatpush.bf16.msrb.mxu1 %v8907_v52  ;;  %3080 = vmatpush.bf16.msrb.mxu3 %v8921_v63  ;;  %v5507_v61 = vld [vmem:[%s10338_s1 + $0xb80] sm:$0xf]  ;;  %v5943_v32 = vld [vmem:[%s10338_s1 + $0xb94] sm:$0xf0]  ;;  %v8992_v63 = vor.u32 %v5847_v15, %v5123_v48  ;;  %v8994_v35 = vor.u32 %v5895_v22, %v5315_v20 }
 0x13b   : > { %10950 = vst [vmem:[#allocation270_spill] sm:$0xff] %v8954_v0  ;;  %3010 = vmatmul.bf16.vlgmr.msra.gmra.mxu1 %v6701_v54  ;;  %v4907_v52 = vld [vmem:[%s10338_s1 + $0x6d0] sm:$0xf]  ;;  %v9006_v36 = vor.u32 %v5943_v32, %v5507_v61  ;;  %v5841_v48 = vld [vmem:[%s10338_s1 + $0x864] sm:$0xf0] }
 0x13c   : > { %10951 = vst [vmem:[#allocation271_spill] sm:$0xff] %v8956_v18  ;;  %3042 = vmatpush.bf16.msrb.mxu0 %v8942_v49  ;;  %v5793_v49 = vld [vmem:[%s10338_s1 + $0x6e4] sm:$0xf0]  ;;  %v5099_v53 = vld [vmem:[%s10338_s1 + $0x850] sm:$0xf] }
 0x13d   : > { %2558 = vst [vmem:[#allocation1 + $0x10] ss:$2 sm:$0xff] %v8950_v39  ;;  %3068 = vmatpush.bf16.msrb.mxu2 %v8956_v18  ;;  %v5291_v15 = vld [vmem:[%s10338_s1 + $0x9d0] sm:$0xf]  ;;  %v5889_v20 = vld [vmem:[%s10338_s1 + $0x9e4] sm:$0xf0]  ;;  %v9024_v32 = vor.u32 %v5793_v49, %v4907_v52  ;;  %v2790_v18 = vpop.f32.mrf.mxu0 }
 0x13e   : > { %10952 = vst [vmem:[#allocation272_spill] sm:$0xff] %v8966_v1  ;;  %3055 = vmatpush.bf16.msrb.mxu1 %v8954_v0  ;;  %3081 = vmatpush.bf16.msrb.mxu3 %v8966_v1  ;;  %v5483_v22 = vld [vmem:[%s10338_s1 + $0xb50] sm:$0xf]  ;;  %v5937_v61 = vld [vmem:[%s10338_s1 + $0xb64] sm:$0xf0]  ;;  %v9028_v0 = vor.u32 %v5841_v48, %v5099_v53  ;;  %v9030_v11 = vor.u32 %v5889_v20, %v5291_v15 }
 0x13f   : > { %10953 = vst [vmem:[#allocation273_spill] sm:$0xff] %v8987_v31  ;;  %v4883_v23 = vld [vmem:[%s10338_s1 + $0x6a0] sm:$0xf]  ;;  %v9042_v53 = vor.u32 %v5937_v61, %v5483_v22  ;;  %v5835_v48 = vld [vmem:[%s10338_s1 + $0x834] sm:$0xf0] }
 0x140   : > { %10954 = vst [vmem:[#allocation274_spill] sm:$0xff] %v8992_v63  ;;  %3043 = vmatpush.bf16.msrb.mxu0 %v8987_v31  ;;  %v5787_v31 = vld [vmem:[%s10338_s1 + $0x6b4] sm:$0xf0]  ;;  %v5075_v52 = vld [vmem:[%s10338_s1 + $0x820] sm:$0xf] }
 0x141   : > { %10955 = vst [vmem:[#allocation275_spill] sm:$0xff] %v8994_v35  ;;  %3069 = vmatpush.bf16.msrb.mxu2 %v8994_v35  ;;  %v5267_v15 = vld [vmem:[%s10338_s1 + $0x9a0] sm:$0xf]  ;;  %v5883_v20 = vld [vmem:[%s10338_s1 + $0x9b4] sm:$0xf0]  ;;  %v9060_v61 = vor.u32 %v5787_v31, %v4883_v23  ;;  %v2816_v31 = vpop.f32.mrf.mxu2 }
 0x142   : > { %10956 = vst [vmem:[#allocation276_spill] sm:$0xff] %v9006_v36  ;;  %3056 = vmatpush.bf16.msrb.mxu1 %v8992_v63  ;;  %v2803_v63 = vpop.f32.mrf.mxu1  ;;  %3082 = vmatpush.bf16.msrb.mxu3 %v9006_v36  ;;  %v9064_v36 = vor.u32 %v5835_v48, %v5075_v52  ;;  %v9066_v35 = vor.u32 %v5883_v20, %v5267_v15  ;;  %v4859_v10 = vld [vmem:[%s10338_s1 + $0x670] sm:$0xf]  ;;  %v5829_v52 = vld [vmem:[%s10338_s1 + $0x804] sm:$0xf0] }
 0x143   : > { %10957 = vst [vmem:[#allocation277_spill] sm:$0xff] %v9024_v32  ;;  %v5051_v23 = vld [vmem:[%s10338_s1 + $0x7f0] sm:$0xf]  ;;  %v5877_v15 = vld [vmem:[%s10338_s1 + $0x984] sm:$0xf0] }
 0x144   : > { %v2563_v1 = vld.sshfl [vmem:[#allocation1 + $0x10] sm:$0xff pattern:$0x75316420]  ;;  %10958 = vst [vmem:[#allocation278_spill] sm:$0xff] %v9028_v0  ;;  %3044 = vmatpush.bf16.msrb.mxu0 %v9024_v32  ;;  %v4835_v24 = vld [vmem:[%s10338_s1 + $0x640] sm:$0xf] }
 0x145   : > { %10959 = vst [vmem:[#allocation279_spill] sm:$0xff] %v9030_v11  ;;  %v2791_v49 = vadd.f32 %v2790_v18, %v2563_v1  ;;  %v5459_v1 = vld [vmem:[%s10338_s1 + $0xb20] sm:$0xf]  ;;  %v5931_v18 = vld [vmem:[%s10338_s1 + $0xb34] sm:$0xf0]  ;;  %3070 = vmatpush.bf16.msrb.mxu2 %v9030_v11  ;;  %v2829_v11 = vpop.f32.mrf.mxu3  ;;  %v2792_v32 = vpop.f32.mrf.mxu0 }
 0x146   : > { %10960 = vst [vmem:[#allocation280_spill] sm:$0xff] %v9042_v53  ;;  %3057 = vmatpush.bf16.msrb.mxu1 %v9028_v0  ;;  %3083 = vmatpush.bf16.msrb.mxu3 %v9042_v53  ;;  %v5243_v48 = vld [vmem:[%s10338_s1 + $0x970] sm:$0xf]  ;;  %v5580_v2 = vld [vmem:[%s10338_s1 + $0x44] sm:$0xf] }
 0x147   : > { %v2804_v22 = vadd.f32 %v2803_v63, %v2791_v49  ;;  %10961 = vst [vmem:[#allocation281_spill] sm:$0xff] %v9060_v61  ;;  %v5781_v63 = vld [vmem:[%s10338_s1 + $0x684] sm:$0xf0]  ;;  %v9078_v49 = vor.u32 %v5931_v18, %v5459_v1  ;;  %v5435_v53 = vld [vmem:[%s10338_s1 + $0xaf0] sm:$0xf] }
 0x148   : > { %10962 = vst [vmem:[#allocation282_spill] sm:$0xff] %v9064_v36  ;;  %v5925_v1 = vld [vmem:[%s10338_s1 + $0xb04] sm:$0xf0]  ;;  %3045 = vmatpush.bf16.msrb.mxu0 %v9060_v61  ;;  %v9096_v18 = vor.u32 %v5781_v63, %v4859_v10  ;;  %v5775_v10 = vld [vmem:[%s10338_s1 + $0x654] sm:$0xf0] }
 0x149   : > { %10963 = vst [vmem:[#allocation283_spill] sm:$0xff] %v9066_v35  ;;  %v2817_v20 = vadd.f32 %v2816_v31, %v2804_v22  ;;  %3071 = vmatpush.bf16.msrb.mxu2 %v9066_v35  ;;  %v9102_v22 = vor.u32 %v5829_v52, %v5051_v23  ;;  %v9104_v31 = vor.u32 %v5877_v15, %v5243_v48  ;;  %v5823_v23 = vld [vmem:[%s10338_s1 + $0x7d4] sm:$0xf0]  ;;  %v5219_v52 = vld [vmem:[%s10338_s1 + $0x940] sm:$0xf] }
 0x14a   : > { %10964 = vst [vmem:[#allocation284_spill] sm:$0xff] %v9078_v49  ;;  %3058 = vmatpush.bf16.msrb.mxu1 %v9064_v36  ;;  %v2805_v32 = vpop.f32.mrf.mxu1  ;;  %3084 = vmatpush.bf16.msrb.mxu3 %v9078_v49  ;;  %v9116_v63 = vor.u32 %v5925_v1, %v5435_v53  ;;  %v5871_v48 = vld [vmem:[%s10338_s1 + $0x954] sm:$0xf0]  ;;  %v5411_v15 = vld [vmem:[%s10338_s1 + $0xac0] sm:$0xf]  ;;  %v2818_v36 = vpop.f32.mrf.mxu2 }
 0x14b   : > { %10965 = vst [vmem:[#allocation285_spill] sm:$0xff] %v9096_v18  ;;  %v9098_v0 = vadd.f32 %v2829_v11, %v2817_v20  ;;  %v5027_v11 = vld [vmem:[%s10338_s1 + $0x7c0] sm:$0xf]  ;;  %v5919_v53 = vld [vmem:[%s10338_s1 + $0xad4] sm:$0xf0]  ;;  %v9134_v20 = vor.u32 %v5775_v10, %v4835_v24  ;;  %v9146_v35 = vor.u32 %v5871_v48, %v5219_v52 }
 0x14c   : > { %10966 = vst [vmem:[#allocation286_spill] sm:$0xff] %v9102_v22  ;;  %3046 = vmatpush.bf16.msrb.mxu0 %v9096_v18  ;;  %v4811_v1 = vld [vmem:[%s10338_s1 + $0x610] sm:$0xf]  ;;  %v5769_v32 = vld [vmem:[%s10338_s1 + $0x624] sm:$0xf0]  ;;  %v9144_v49 = vor.u32 %v5823_v23, %v5027_v11 }
 0x14d   : > { %10967 = vst [vmem:[#allocation287_spill] sm:$0xff] %v9104_v31  ;;  %3072 = vmatpush.bf16.msrb.mxu2 %v9104_v31  ;;  %v5003_v24 = vld [vmem:[%s10338_s1 + $0x790] sm:$0xf]  ;;  %v5817_v10 = vld [vmem:[%s10338_s1 + $0x7a4] sm:$0xf0]  ;;  %v9158_v31 = vor.u32 %v5919_v53, %v5411_v15  ;;  %v2831_v48 = vpop.f32.mrf.mxu3 }
 0x14e   : > { %10968 = vst [vmem:[#allocation288_spill] sm:$0xff] %v9116_v63  ;;  %3059 = vmatpush.bf16.msrb.mxu1 %v9102_v22  ;;  %v5195_v18 = vld [vmem:[%s10338_s1 + $0x910] sm:$0xf]  ;;  %3085 = vmatpush.bf16.msrb.mxu3 %v9116_v63  ;;  %v5865_v11 = vld [vmem:[%s10338_s1 + $0x924] sm:$0xf0]  ;;  %v9179_v63 = vor.u32 %v5769_v32, %v4811_v1  ;;  %v9192_v19 = vor.u32 %v5817_v10, %v5003_v24 }
 0x14f   : > { %10969 = vst [vmem:[#allocation289_spill] sm:$0xff] %v9134_v20  ;;  %v5387_v23 = vld [vmem:[%s10338_s1 + $0xa90] sm:$0xf]  ;;  %v5913_v52 = vld [vmem:[%s10338_s1 + $0xaa4] sm:$0xf0]  ;;  %v9194_v1 = vor.u32 %v5865_v11, %v5195_v18 }
 0x150   : > { %10970 = vst [vmem:[#allocation290_spill] sm:$0xff] %v9144_v49  ;;  %v5616_v36 = vld [vmem:[%s10338_s1 + $0x164] sm:$0xf]  ;;  %v4213_v15 = vld [vmem:[%s10338_s1 + $0x178] sm:$0xf0]  ;;  %3047 = vmatpush.bf16.msrb.mxu0 %v9134_v20  ;;  %v9203_v26 = vor.u32 %v5913_v52, %v5387_v23 }
 0x151   : > { %10971 = vst [vmem:[#allocation291_spill] sm:$0xff] %v9146_v35  ;;  %v5664_v53 = vld [vmem:[%s10338_s1 + $0x2e4] sm:$0xf]  ;;  %v4405_v48 = vld [vmem:[%s10338_s1 + $0x2f8] sm:$0xf0]  ;;  %3073 = vmatpush.bf16.msrb.mxu2 %v9146_v35  ;;  %v9205_v13 = vor.u32 %v5616_v36, %v4213_v15 }
 0x152   : > { %10972 = vst [vmem:[#allocation292_spill] sm:$0xff] %v9158_v31  ;;  %v5712_v22 = vld [vmem:[%s10338_s1 + $0x464] sm:$0xf]  ;;  %v4597_v61 = vld [vmem:[%s10338_s1 + $0x478] sm:$0xf0]  ;;  %3060 = vmatpush.bf16.msrb.mxu1 %v9144_v49  ;;  %3086 = vmatpush.bf16.msrb.mxu3 %v9158_v31  ;;  %v9207_v49 = vor.u32 %v5664_v53, %v4405_v48 }
 0x153   : > { %10973 = vst [vmem:[#allocation293_spill] sm:$0xff] %v9179_v63  ;;  %v5760_v32 = vld [vmem:[%s10338_s1 + $0x5e4] sm:$0xf]  ;;  %v4789_v20 = vld [vmem:[%s10338_s1 + $0x5f8] sm:$0xf0]  ;;  %v9209_v24 = vor.u32 %v5712_v22, %v4597_v61 }
 0x154   : > { %10974 = vst [vmem:[#allocation294_spill] sm:$0xff] %v9192_v19  ;;  %v5610_v18 = vld [vmem:[%s10338_s1 + $0x134] sm:$0xf]  ;;  %v4189_v10 = vld [vmem:[%s10338_s1 + $0x148] sm:$0xf0]  ;;  %3048 = vmatpush.bf16.msrb.mxu0 %v9179_v63  ;;  %v9221_v23 = vor.u32 %v5760_v32, %v4789_v20 }
 0x155   : > { %10975 = vst [vmem:[#allocation295_spill] sm:$0xff] %v9194_v1  ;;  %v5658_v11 = vld [vmem:[%s10338_s1 + $0x2b4] sm:$0xf]  ;;  %v4381_v61 = vld [vmem:[%s10338_s1 + $0x2c8] sm:$0xf0]  ;;  %3074 = vmatpush.bf16.msrb.mxu2 %v9194_v1  ;;  %v9242_v15 = vor.u32 %v5610_v18, %v4189_v10 }
 0x156   : > { %10976 = vst [vmem:[#allocation296_spill] sm:$0xff] %v9203_v26  ;;  %v5706_v22 = vld [vmem:[%s10338_s1 + $0x434] sm:$0xf]  ;;  %v4573_v52 = vld [vmem:[%s10338_s1 + $0x448] sm:$0xf0]  ;;  %3061 = vmatpush.bf16.msrb.mxu1 %v9192_v19  ;;  %3087 = vmatpush.bf16.msrb.mxu3 %v9203_v26  ;;  %v9246_v53 = vor.u32 %v5658_v11, %v4381_v61 }
 0x157   : > { %10977 = vst [vmem:[#allocation297_spill] sm:$0xff] %v9205_v13  ;;  %v5754_v20 = vld [vmem:[%s10338_s1 + $0x5b4] sm:$0xf]  ;;  %v4765_v36 = vld [vmem:[%s10338_s1 + $0x5c8] sm:$0xf0]  ;;  %v9248_v48 = vor.u32 %v5706_v22, %v4573_v52 }
 0x158   : > { %10978 = vst [vmem:[#allocation298_spill] sm:$0xff] %v9207_v49  ;;  %3093 = vmatpush.bf16.msra.mxu0 %v9205_v13  ;;  %v5604_v32 = vld [vmem:[%s10338_s1 + $0x104] sm:$0xf]  ;;  %v4165_v26 = vld [vmem:[%s10338_s1 + $0x118] sm:$0xf0]  ;;  %v9260_v10 = vor.u32 %v5754_v20, %v4765_v36 }
 0x159   : > { %10979 = vst [vmem:[#allocation299_spill] sm:$0xff] %v9209_v24  ;;  %3119 = vmatpush.bf16.msra.mxu2 %v9209_v24  ;;  %v5652_v18 = vld [vmem:[%s10338_s1 + $0x284] sm:$0xf]  ;;  %v9262_v11 = vld.sshfl [vmem:[#allocation1 + $0x30] sm:$0xff pattern:$0x73625140] }
 0x15a   : > { %10980 = vst [vmem:[#allocation300_spill] sm:$0xff] %v9221_v23  ;;  %3106 = vmatpush.bf16.msra.mxu1 %v9207_v49  ;;  %3132 = vmatpush.bf16.msra.mxu3 %v9221_v23  ;;  %v4357_v61 = vld [vmem:[%s10338_s1 + $0x298] sm:$0xf0]  ;;  %v5700_v22 = vld [vmem:[%s10338_s1 + $0x404] sm:$0xf]  ;;  %v9287_v49 = vor.u32 %v5604_v32, %v4165_v26 }
 0x15b   : > { %10981 = vst [vmem:[#allocation301_spill] sm:$0xff] %v9242_v15  ;;  %3075 = vmatmul.bf16.vlgmr.msrb.gmra.mxu2 %v9262_v11  ;;  %v4549_v52 = vld [vmem:[%s10338_s1 + $0x418] sm:$0xf0]  ;;  %v5748_v20 = vld [vmem:[%s10338_s1 + $0x584] sm:$0xf]  ;;  %v9294_v1 = vor.u32 %v5652_v18, %v4357_v61 }
 0x15c   : > { %10982 = vst [vmem:[#allocation302_spill] sm:$0xff] %v9246_v53  ;;  %v4741_v36 = vld [vmem:[%s10338_s1 + $0x598] sm:$0xf0]  ;;  %v9280_v23 = vld.sshfl [vmem:[#allocation1 + $0x20] sm:$0xff pattern:$0x73625140]  ;;  %3094 = vmatpush.bf16.msra.mxu0 %v9242_v15  ;;  %v9296_v19 = vor.u32 %v5700_v22, %v4549_v52 }
 0x15d   : > { %10983 = vst [vmem:[#allocation303_spill] sm:$0xff] %v9248_v48  ;;  %3049 = vmatmul.bf16.vlgmr.msrb.gmra.mxu0 %v9280_v23  ;;  %v9283_v24 = vld.sshfl [vmem:[#allocation1 + $0x38] sm:$0xff pattern:$0x73625140]  ;;  %3120 = vmatpush.bf16.msra.mxu2 %v9248_v48  ;;  %v5598_v63 = vld [vmem:[%s10338_s1 + $0xd4] sm:$0xf] }
 0x15e   : > { %10984 = vst [vmem:[#allocation304_spill] sm:$0xff] %v9260_v10  ;;  %3088 = vmatmul.bf16.vlgmr.msrb.gmra.mxu3 %v9283_v24  ;;  %v9289_v13 = vld.sshfl [vmem:[#allocation1 + $0x28] sm:$0xff pattern:$0x73625140]  ;;  %3107 = vmatpush.bf16.msra.mxu1 %v9246_v53  ;;  %v5646_v32 = vld [vmem:[%s10338_s1 + $0x254] sm:$0xf]  ;;  %v9308_v53 = vor.u32 %v5748_v20, %v4741_v36 }
 0x15f   : > { %10985 = vst [vmem:[#allocation305_spill] sm:$0xff] %v9287_v49  ;;  %3062 = vmatmul.bf16.vlgmr.msrb.gmra.mxu1 %v9289_v13  ;;  %v4141_v26 = vld [vmem:[%s10338_s1 + $0xe8] sm:$0xf0]  ;;  %3133 = vmatpush.bf16.msra.mxu3 %v9260_v10  ;;  %v5694_v61 = vld [vmem:[%s10338_s1 + $0x3d4] sm:$0xf]  ;;  %v2842_v10 = vpop.f32.mrf.mxu0 }
 0x160   : > { %10986 = vst [vmem:[#allocation306_spill] sm:$0xff] %v9294_v1  ;;  %v4333_v18 = vld [vmem:[%s10338_s1 + $0x268] sm:$0xf0]  ;;  %v5742_v52 = vld [vmem:[%s10338_s1 + $0x554] sm:$0xf]  ;;  %3095 = vmatpush.bf16.msra.mxu0 %v9287_v49  ;;  %v9326_v36 = vor.u32 %v5598_v63, %v4141_v26  ;;  %v2843_v26 = vadd.f32 %v2842_v10, %v9098_v0 }
 0x161   : > { %10987 = vst [vmem:[#allocation307_spill] sm:$0xff] %v9296_v19  ;;  %v4525_v22 = vld [vmem:[%s10338_s1 + $0x3e8] sm:$0xf0]  ;;  %3121 = vmatpush.bf16.msra.mxu2 %v9296_v19  ;;  %v9330_v48 = vor.u32 %v5646_v32, %v4333_v18  ;;  %v5592_v31 = vld [vmem:[%s10338_s1 + $0xa4] sm:$0xf] }
 0x162   : > { %10988 = vst [vmem:[#allocation308_spill] sm:$0xff] %v9308_v53  ;;  %v4717_v20 = vld [vmem:[%s10338_s1 + $0x568] sm:$0xf0]  ;;  %3108 = vmatpush.bf16.msra.mxu1 %v9294_v1  ;;  %v9332_v15 = vor.u32 %v5694_v61, %v4525_v22  ;;  %v4117_v35 = vld [vmem:[%s10338_s1 + $0xb8] sm:$0xf0]  ;;  %v2855_v1 = vpop.f32.mrf.mxu1 }
 0x163   : > { %10989 = vst [vmem:[#allocation309_spill] sm:$0xff] %v9326_v36  ;;  %v5640_v63 = vld [vmem:[%s10338_s1 + $0x224] sm:$0xf]  ;;  %3134 = vmatpush.bf16.msra.mxu3 %v9308_v53  ;;  %v9345_v32 = vor.u32 %v5742_v52, %v4717_v20  ;;  %v4309_v18 = vld [vmem:[%s10338_s1 + $0x238] sm:$0xf0]  ;;  %v9362_v52 = vadd.f32 %v2855_v1, %v2843_v26  ;;  %v9365_v20 = vor.u32 %v5592_v31, %v4117_v35  ;;  %v9382_v31 = vpop.f32.mrf.mxu2 }
 0x164   : > { %10990 = vst [vmem:[#allocation310_spill] sm:$0xff] %v9330_v48  ;;  %v5688_v61 = vld [vmem:[%s10338_s1 + $0x3a4] sm:$0xf]  ;;  %v4501_v22 = vld [vmem:[%s10338_s1 + $0x3b8] sm:$0xf0]  ;;  %3096 = vmatpush.bf16.msra.mxu0 %v9326_v36  ;;  %v9369_v53 = vor.u32 %v5640_v63, %v4309_v18 }
 0x165   : > { %10991 = vst [vmem:[#allocation311_spill] sm:$0xff] %v9332_v15  ;;  %v5736_v0 = vld [vmem:[%s10338_s1 + $0x524] sm:$0xf]  ;;  %v4693_v10 = vld [vmem:[%s10338_s1 + $0x538] sm:$0xf0]  ;;  %3122 = vmatpush.bf16.msra.mxu2 %v9332_v15  ;;  %v9371_v19 = vor.u32 %v5688_v61, %v4501_v22  ;;  %v9396_v22 = vpop.f32.mrf.mxu3 }
 0x166   : > { %10992 = vst [vmem:[#allocation312_spill] sm:$0xff] %v9345_v32  ;;  %3109 = vmatpush.bf16.msra.mxu1 %v9330_v48  ;;  %v5586_v49 = vld [vmem:[%s10338_s1 + $0x74] sm:$0xf]  ;;  %v4093_v1 = vld [vmem:[%s10338_s1 + $0x88] sm:$0xf0]  ;;  %v9385_v63 = vor.u32 %v5736_v0, %v4693_v10 }
 0x167   : > { %10993 = vst [vmem:[#allocation313_spill] sm:$0xff] %v9365_v20  ;;  %v5634_v35 = vld [vmem:[%s10338_s1 + $0x1f4] sm:$0xf]  ;;  %3135 = vmatpush.bf16.msra.mxu3 %v9345_v32  ;;  %v4285_v26 = vld [vmem:[%s10338_s1 + $0x208] sm:$0xf0]  ;;  %v9405_v10 = vor.u32 %v5586_v49, %v4093_v1  ;;  %v2844_v15 = vpop.f32.mrf.mxu0 }
 0x168   : > { %10994 = vst [vmem:[#allocation314_spill] sm:$0xff] %v9369_v53  ;;  %v5682_v18 = vld [vmem:[%s10338_s1 + $0x374] sm:$0xf]  ;;  %v4477_v61 = vld [vmem:[%s10338_s1 + $0x388] sm:$0xf0]  ;;  %3097 = vmatpush.bf16.msra.mxu0 %v9365_v20  ;;  %v9409_v48 = vor.u32 %v5634_v35, %v4285_v26 }
 0x169   : > { %10995 = vst [vmem:[#allocation315_spill] sm:$0xff] %v9371_v19  ;;  %v5730_v32 = vld [vmem:[%s10338_s1 + $0x4f4] sm:$0xf]  ;;  %v4669_v0 = vld [vmem:[%s10338_s1 + $0x508] sm:$0xf0]  ;;  %3123 = vmatpush.bf16.msra.mxu2 %v9371_v19  ;;  %v9411_v36 = vor.u32 %v5682_v18, %v4477_v61 }
 0x16a   : > { %10996 = vst [vmem:[#allocation316_spill] sm:$0xff] %v9385_v63  ;;  %3110 = vmatpush.bf16.msra.mxu1 %v9369_v53  ;;  %v4069_v20 = vld [vmem:[%s10338_s1 + $0x58] sm:$0xf0]  ;;  %v5628_v49 = vld [vmem:[%s10338_s1 + $0x1c4] sm:$0xf]  ;;  %v2857_v15 = vpop.f32.mrf.mxu1  ;;  %v9423_v1 = vor.u32 %v5730_v32, %v4669_v0 }
 0x16b   : > { %10997 = vst [vmem:[#allocation317_spill] sm:$0xff] %v9405_v10  ;;  %3136 = vmatpush.bf16.msra.mxu3 %v9385_v63  ;;  %v4261_v35 = vld [vmem:[%s10338_s1 + $0x1d8] sm:$0xf0]  ;;  %v5676_v26 = vld [vmem:[%s10338_s1 + $0x344] sm:$0xf]  ;;  %v5561_v15 = vld [vmem:[%s6602_s9 + $0x10] sm:$0xff]  ;;  %v9445_v63 = vor.u32 %v5580_v2, %v4069_v20  ;;  %v2870_v43 = vpop.f32.mrf.mxu2 }
 0x16c   : > { %10998 = vst [vmem:[#allocation318_spill] sm:$0xff] %v9409_v48  ;;  %v4453_v18 = vld [vmem:[%s10338_s1 + $0x358] sm:$0xf0]  ;;  %v5724_v61 = vld [vmem:[%s10338_s1 + $0x4c4] sm:$0xf]  ;;  %3098 = vmatpush.bf16.msra.mxu0 %v9405_v10  ;;  %v9458_v4 = vor.u32 %v5628_v49, %v4261_v35 }
 0x16d   : > { %10999 = vst [vmem:[#allocation319_spill] sm:$0xff] %v9411_v36  ;;  %v4645_v32 = vld [vmem:[%s10338_s1 + $0x4d8] sm:$0xf0]  ;;  %v5574_v0 = vld [vmem:[%s10338_s1 + $0x14] sm:$0xf]  ;;  %3124 = vmatpush.bf16.msra.mxu2 %v9411_v36  ;;  %v9460_v2 = vor.u32 %v5676_v26, %v4453_v18  ;;  %v2883_v18 = vpop.f32.mrf.mxu3 }
 0x16e   : > { %11000 = vst [vmem:[#allocation320_spill] sm:$0xff] %v9423_v1  ;;  %v4045_v19 = vld [vmem:[%s10338_s1 + $0x28] sm:$0xf0]  ;;  %v5622_v53 = vld [vmem:[%s10338_s1 + $0x194] sm:$0xf]  ;;  %3111 = vmatpush.bf16.msra.mxu1 %v9409_v48  ;;  %v9472_v36 = vor.u32 %v5724_v61, %v4645_v32 }
 0x16f   : > { %11001 = vst [vmem:[#allocation321_spill] sm:$0xff] %v9445_v63  ;;  %v4237_v59 = vld [vmem:[%s10338_s1 + $0x1a8] sm:$0xf0]  ;;  %v5670_v20 = vld [vmem:[%s10338_s1 + $0x314] sm:$0xf]  ;;  %3137 = vmatpush.bf16.msra.mxu3 %v9423_v1  ;;  %v9493_v1 = vor.u32 %v5574_v0, %v4045_v19 }
 0x170   : > { %11002 = vst [vmem:[#allocation322_spill] sm:$0xff] %v9458_v4  ;;  %v4429_v10 = vld [vmem:[%s10338_s1 + $0x328] sm:$0xf0]  ;;  %v5718_v60 = vld [vmem:[%s10338_s1 + $0x494] sm:$0xf]  ;;  %3099 = vmatpush.bf16.msra.mxu0 %v9445_v63  ;;  %v9502_v27 = vor.u32 %v5622_v53, %v4237_v59 }
 0x171   : > { %11003 = vst [vmem:[#allocation323_spill] sm:$0xff] %v9460_v2  ;;  %v4621_v49 = vld [vmem:[%s10338_s1 + $0x4a8] sm:$0xf0]  ;;  %v5808_v35 = vld [vmem:[%s10338_s1 + $0x764] sm:$0xf]  ;;  %3125 = vmatpush.bf16.msra.mxu2 %v9460_v2  ;;  %v9504_v55 = vor.u32 %v5670_v20, %v4429_v10 }
 0x172   : > { %v4981_v26 = vld [vmem:[%s10338_s1 + $0x778] sm:$0xf0]  ;;  %v5856_v43 = vld [vmem:[%s10338_s1 + $0x8e4] sm:$0xf]  ;;  %3112 = vmatpush.bf16.msra.mxu1 %v9458_v4  ;;  %v9513_v0 = vor.u32 %v5718_v60, %v4621_v49  ;;  %v5802_v53 = vld [vmem:[%s10338_s1 + $0x734] sm:$0xf] }
 0x173   : > { %v5173_v61 = vld [vmem:[%s10338_s1 + $0x8f8] sm:$0xf0]  ;;  %v5904_v32 = vld [vmem:[%s10338_s1 + $0xa64] sm:$0xf]  ;;  %3138 = vmatpush.bf16.msra.mxu3 %v9472_v36  ;;  %v9515_v4 = vor.u32 %v5808_v35, %v4981_v26  ;;  %v4957_v10 = vld [vmem:[%s10338_s1 + $0x748] sm:$0xf0] }
 0x174   : > { %v5365_v18 = vld [vmem:[%s10338_s1 + $0xa78] sm:$0xf0]  ;;  %v5952_v63 = vld [vmem:[%s10338_s1 + $0xbe4] sm:$0xf]  ;;  %11004 = vst [vmem:[#allocation324_spill] sm:$0xff] %v9513_v0  ;;  %v9517_v2 = vor.u32 %v5856_v43, %v5173_v61  ;;  %3100 = vmatpush.bf16.msra.mxu0 %v9493_v1  ;;  %v9552_v43 = vor.u32 %v5802_v53, %v4957_v10 }
 0x175   : > { %v9498_v48 = vld.sshfl [vmem:[#allocation1 + $0x18] sm:$0xff pattern:$0x75316420]  ;;  %11005 = vst [vmem:[#allocation325_spill] sm:$0xff] %v9515_v4  ;;  %v9519_v59 = vor.u32 %v5904_v32, %v5365_v18  ;;  %v5149_v20 = vld [vmem:[%s10338_s1 + $0x8c8] sm:$0xf0]  ;;  %3126 = vmatpush.bf16.msra.mxu2 %v9504_v55 }
 0x176   : > { %v5557_v19 = vld [vmem:[%s10338_s1 + $0xbf8] sm:$0xf0]  ;;  %3220 = vst [vmem:[#allocation1] ss:$4 sm:$0xff] %v5561_v15  ;;  %v5850_v15 = vld [vmem:[%s10338_s1 + $0x8b4] sm:$0xf]  ;;  %3113 = vmatpush.bf16.msra.mxu1 %v9502_v27 }
 0x177   : > { %11006 = vst [vmem:[#allocation326_spill] sm:$0xff] %v9517_v2  ;;  %v9531_v60 = vor.u32 %v5952_v63, %v5557_v19  ;;  %v5898_v49 = vld [vmem:[%s10338_s1 + $0xa34] sm:$0xf]  ;;  %v5341_v35 = vld [vmem:[%s10338_s1 + $0xa48] sm:$0xf0]  ;;  %3139 = vmatpush.bf16.msra.mxu3 %v9513_v0  ;;  %v9556_v61 = vor.u32 %v5850_v15, %v5149_v20  ;;  %3101 = vmatmul.bf16.vlgmr.msra.gmra.mxu0 %v6688_v30 }
 0x178   : > { %11007 = vst [vmem:[#allocation327_spill] sm:$0xff] %v9519_v59  ;;  %v5946_v63 = vld [vmem:[%s10338_s1 + $0xbb4] sm:$0xf]  ;;  %v5533_v26 = vld [vmem:[%s10338_s1 + $0xbc8] sm:$0xf0]  ;;  %3145 = vmatpush.bf16.msrb.mxu0 %v9515_v4  ;;  %v9558_v32 = vor.u32 %v5898_v49, %v5341_v35  ;;  %3127 = vmatmul.bf16.vlgmr.msra.gmra.mxu2 %v8356_v37 }
 0x179   : > { %11008 = vst [vmem:[#allocation328_spill] sm:$0xff] %v9531_v60  ;;  %3171 = vmatpush.bf16.msrb.mxu2 %v9519_v59  ;;  %v5796_v18 = vld [vmem:[%s10338_s1 + $0x704] sm:$0xf]  ;;  %v4933_v19 = vld [vmem:[%s10338_s1 + $0x718] sm:$0xf0]  ;;  %v9570_v10 = vor.u32 %v5946_v63, %v5533_v26  ;;  %3114 = vmatmul.bf16.vlgmr.msra.gmra.mxu1 %v6701_v54 }
 0x17a   : > { %11009 = vst [vmem:[#allocation329_spill] sm:$0xff] %v9552_v43  ;;  %3158 = vmatpush.bf16.msrb.mxu1 %v9517_v2  ;;  %v5844_v53 = vld [vmem:[%s10338_s1 + $0x884] sm:$0xf]  ;;  %v5125_v15 = vld [vmem:[%s10338_s1 + $0x898] sm:$0xf0]  ;;  %3140 = vmatmul.bf16.vlgmr.msra.gmra.mxu3 %v8366_v47  ;;  %v9591_v26 = vor.u32 %v5796_v18, %v4933_v19 }
 0x17b   : > { %11010 = vst [vmem:[#allocation330_spill] sm:$0xff] %v9556_v61  ;;  %3184 = vmatpush.bf16.msrb.mxu3 %v9531_v60  ;;  %v5892_v20 = vld [vmem:[%s10338_s1 + $0xa04] sm:$0xf]  ;;  %v5317_v49 = vld [vmem:[%s10338_s1 + $0xa18] sm:$0xf0]  ;;  %v9596_v37 = vor.u32 %v5844_v53, %v5125_v15 }
 0x17c   : > { %11011 = vst [vmem:[#allocation331_spill] sm:$0xff] %v9558_v32  ;;  %v5940_v35 = vld [vmem:[%s10338_s1 + $0xb84] sm:$0xf]  ;;  %v5509_v63 = vld [vmem:[%s10338_s1 + $0xb98] sm:$0xf0]  ;;  %3146 = vmatpush.bf16.msrb.mxu0 %v9552_v43  ;;  %v9598_v60 = vor.u32 %v5892_v20, %v5317_v49 }
 0x17d   : > { %11012 = vst [vmem:[#allocation332_spill] sm:$0xff] %v9570_v10  ;;  %3172 = vmatpush.bf16.msrb.mxu2 %v9558_v32  ;;  %v5790_v30 = vld [vmem:[%s10338_s1 + $0x6d4] sm:$0xf]  ;;  %v4909_v47 = vld [vmem:[%s10338_s1 + $0x6e8] sm:$0xf0]  ;;  %v9610_v18 = vor.u32 %v5940_v35, %v5509_v63  ;;  %v9630_v63 = vpop.f32.mrf.mxu0 }
 0x17e   : > { %11013 = vst [vmem:[#allocation333_spill] sm:$0xff] %v9591_v26  ;;  %3159 = vmatpush.bf16.msrb.mxu1 %v9556_v61  ;;  %v5838_v54 = vld [vmem:[%s10338_s1 + $0x854] sm:$0xf]  ;;  %v5101_v19 = vld [vmem:[%s10338_s1 + $0x868] sm:$0xf0]  ;;  %v9628_v35 = vor.u32 %v5790_v30, %v4909_v47  ;;  %v9647_v47 = vpop.f32.mrf.mxu1 }
 0x17f   : > { %11014 = vst [vmem:[#allocation334_spill] sm:$0xff] %v9596_v37  ;;  %3185 = vmatpush.bf16.msrb.mxu3 %v9570_v10  ;;  %v5886_v53 = vld [vmem:[%s10338_s1 + $0x9d4] sm:$0xf]  ;;  %v5293_v15 = vld [vmem:[%s10338_s1 + $0x9e8] sm:$0xf0]  ;;  %v9634_v10 = vor.u32 %v5838_v54, %v5101_v19 }
 0x180   : > { %11015 = vst [vmem:[#allocation335_spill] sm:$0xff] %v9598_v60  ;;  %v5934_v20 = vld [vmem:[%s10338_s1 + $0xb54] sm:$0xf]  ;;  %v5485_v49 = vld [vmem:[%s10338_s1 + $0xb68] sm:$0xf0]  ;;  %3147 = vmatpush.bf16.msrb.mxu0 %v9591_v26  ;;  %v9636_v32 = vor.u32 %v5886_v53, %v5293_v15 }
 0x181   : > { %11016 = vst [vmem:[#allocation336_spill] sm:$0xff] %v9610_v18  ;;  %3173 = vmatpush.bf16.msrb.mxu2 %v9598_v60  ;;  %v5784_v61 = vld [vmem:[%s10338_s1 + $0x6a4] sm:$0xf]  ;;  %v4885_v26 = vld [vmem:[%s10338_s1 + $0x6b8] sm:$0xf0]  ;;  %v9650_v54 = vor.u32 %v5934_v20, %v5485_v49 }
 0x182   : > { %11017 = vst [vmem:[#allocation337_spill] sm:$0xff] %v9628_v35  ;;  %3160 = vmatpush.bf16.msrb.mxu1 %v9596_v37  ;;  %v5832_v30 = vld [vmem:[%s10338_s1 + $0x824] sm:$0xf]  ;;  %v5077_v19 = vld [vmem:[%s10338_s1 + $0x838] sm:$0xf0]  ;;  %v9668_v49 = vor.u32 %v5784_v61, %v4885_v26  ;;  %v2920_v26 = vpop.f32.mrf.mxu2 }
 0x183   : > { %11018 = vst [vmem:[#allocation338_spill] sm:$0xff] %v9634_v10  ;;  %3186 = vmatpush.bf16.msrb.mxu3 %v9610_v18  ;;  %v5880_v53 = vld [vmem:[%s10338_s1 + $0x9a4] sm:$0xf]  ;;  %v5269_v15 = vld [vmem:[%s10338_s1 + $0x9b8] sm:$0xf0]  ;;  %v9672_v18 = vor.u32 %v5832_v30, %v5077_v19 }
 0x184   : > { %11019 = vst [vmem:[#allocation339_spill] sm:$0xff] %v9636_v32  ;;  %v5928_v60 = vld [vmem:[%s10338_s1 + $0xb24] sm:$0xf]  ;;  %v5461_v20 = vld [vmem:[%s10338_s1 + $0xb38] sm:$0xf0]  ;;  %3148 = vmatpush.bf16.msrb.mxu0 %v9628_v35  ;;  %v9674_v37 = vor.u32 %v5880_v53, %v5269_v15  ;;  %v9697_v15 = vpop.f32.mrf.mxu3 }
 0x185   : > { %11020 = vst [vmem:[#allocation340_spill] sm:$0xff] %v9650_v54  ;;  %3174 = vmatpush.bf16.msrb.mxu2 %v9636_v32  ;;  %v5778_v43 = vld [vmem:[%s10338_s1 + $0x674] sm:$0xf]  ;;  %v4861_v59 = vld [vmem:[%s10338_s1 + $0x688] sm:$0xf0]  ;;  %v9686_v32 = vor.u32 %v5928_v60, %v5461_v20 }
 0x186   : > { %3161 = vmatpush.bf16.msrb.mxu1 %v9634_v10  ;;  %11021 = vst [vmem:[#allocation341_spill] sm:$0xff] %v9672_v18  ;;  %v5826_v61 = vld [vmem:[%s10338_s1 + $0x7f4] sm:$0xf]  ;;  %v5053_v30 = vld [vmem:[%s10338_s1 + $0x808] sm:$0xf0]  ;;  %v9706_v20 = vor.u32 %v5778_v43, %v4861_v59  ;;  %v2896_v10 = vpop.f32.mrf.mxu0  ;;  %v2909_v43 = vpop.f32.mrf.mxu1 }
 0x187   : > { %11022 = vst [vmem:[#allocation342_spill] sm:$0xff] %v9674_v37  ;;  %3187 = vmatpush.bf16.msrb.mxu3 %v9650_v54  ;;  %v5874_v19 = vld [vmem:[%s10338_s1 + $0x974] sm:$0xf]  ;;  %v5245_v53 = vld [vmem:[%s10338_s1 + $0x988] sm:$0xf0]  ;;  %v9710_v35 = vor.u32 %v5826_v61, %v5053_v30 }
 0x188   : > { %11023 = vst [vmem:[#allocation343_spill] sm:$0xff] %v9686_v32  ;;  %v5922_v54 = vld [vmem:[%s10338_s1 + $0xaf4] sm:$0xf]  ;;  %v5437_v60 = vld [vmem:[%s10338_s1 + $0xb08] sm:$0xf0]  ;;  %3149 = vmatpush.bf16.msrb.mxu0 %v9668_v49  ;;  %v9712_v2 = vor.u32 %v5874_v19, %v5245_v53 }
 0x189   : > { %3175 = vmatpush.bf16.msrb.mxu2 %v9674_v37  ;;  %11024 = vst [vmem:[#allocation344_spill] sm:$0xff] %v9710_v35  ;;  %v5772_v4 = vld [vmem:[%s10338_s1 + $0x644] sm:$0xf]  ;;  %v4837_v0 = vld [vmem:[%s10338_s1 + $0x658] sm:$0xf0]  ;;  %v9724_v10 = vor.u32 %v5922_v54, %v5437_v60 }
 0x18a   : > { %3162 = vmatpush.bf16.msrb.mxu1 %v9672_v18  ;;  %11025 = vst [vmem:[#allocation345_spill] sm:$0xff] %v9712_v2  ;;  %v5820_v59 = vld [vmem:[%s10338_s1 + $0x7c4] sm:$0xf]  ;;  %v5029_v61 = vld [vmem:[%s10338_s1 + $0x7d8] sm:$0xf0]  ;;  %v9742_v60 = vor.u32 %v5772_v4, %v4837_v0  ;;  %v2922_v0 = vpop.f32.mrf.mxu2 }
 0x18b   : > { %3188 = vmatpush.bf16.msrb.mxu3 %v9686_v32  ;;  %11026 = vst [vmem:[#allocation346_spill] sm:$0xff] %v9724_v10  ;;  %v5868_v30 = vld [vmem:[%s10338_s1 + $0x944] sm:$0xf]  ;;  %v5221_v19 = vld [vmem:[%s10338_s1 + $0x958] sm:$0xf0]  ;;  %v9746_v43 = vor.u32 %v5820_v59, %v5029_v61  ;;  %v2895_v0 = vadd.f32 %v9630_v63, %v9498_v48 }
 0x18c   : > { %v5916_v53 = vld [vmem:[%s10338_s1 + $0xac4] sm:$0xf]  ;;  %v5413_v54 = vld [vmem:[%s10338_s1 + $0xad8] sm:$0xf0]  ;;  %3150 = vmatpush.bf16.msrb.mxu0 %v9706_v20  ;;  %v9748_v32 = vor.u32 %v5868_v30, %v5221_v19  ;;  %v5766_v37 = vld [vmem:[%s10338_s1 + $0x614] sm:$0xf]  ;;  %v2935_v19 = vpop.f32.mrf.mxu3 }
 0x18d   : > { %3176 = vmatpush.bf16.msrb.mxu2 %v9712_v2  ;;  %v4813_v18 = vld [vmem:[%s10338_s1 + $0x628] sm:$0xf0]  ;;  %v5814_v4 = vld [vmem:[%s10338_s1 + $0x794] sm:$0xf]  ;;  %v9760_v2 = vor.u32 %v5916_v53, %v5413_v54  ;;  %v2908_v63 = vadd.f32 %v9647_v47, %v2895_v0 }
 0x18e   : > { %3163 = vmatpush.bf16.msrb.mxu1 %v9710_v35  ;;  %v5005_v59 = vld [vmem:[%s10338_s1 + $0x7a8] sm:$0xf0]  ;;  %v5862_v61 = vld [vmem:[%s10338_s1 + $0x914] sm:$0xf] }
 0x18f   : > { %3189 = vmatpush.bf16.msrb.mxu3 %v9724_v10  ;;  %v5197_v30 = vld [vmem:[%s10338_s1 + $0x928] sm:$0xf0]  ;;  %v5910_v53 = vld [vmem:[%s10338_s1 + $0xa94] sm:$0xf]  ;;  %v9780_v10 = vor.u32 %v5766_v37, %v4813_v18  ;;  %v9784_v19 = vor.u32 %v5814_v4, %v5005_v59  ;;  %v2921_v37 = vadd.f32 %v2920_v26, %v2908_v63  ;;  %v11045_v63 = vld [vmem:[#allocation23_spill] sm:$0xff] }
 0x190   : > { %v5389_v54 = vld [vmem:[%s10338_s1 + $0xaa8] sm:$0xf0]  ;;  %3151 = vmatpush.bf16.msrb.mxu0 %v9742_v60  ;;  %v9786_v35 = vor.u32 %v5862_v61, %v5197_v30  ;;  %v11040_v59 = vld [vmem:[#allocation18_spill] sm:$0xff]  ;;  %v11041_v61 = vld [vmem:[#allocation19_spill] sm:$0xff] }
 0x191   : > { %3177 = vmatpush.bf16.msrb.mxu2 %v9748_v32  ;;  %v9789_v48 = vor.u32 %v5910_v53, %v5389_v54  ;;  %v2934_v18 = vadd.f32 %v9697_v15, %v2921_v37  ;;  %v11038_v15 = vld [vmem:[#allocation16_spill] sm:$0xff]  ;;  %v11039_v4 = vld [vmem:[#allocation17_spill] sm:$0xff]  ;;  %v11044_v54 = vld [vmem:[#allocation22_spill] sm:$0xff] }
 0x192   : > { %3164 = vmatpush.bf16.msrb.mxu1 %v9746_v43  ;;  %v11042_v30 = vld [vmem:[#allocation20_spill] sm:$0xff]  ;;  %v11043_v0 = vld [vmem:[#allocation21_spill] sm:$0xff] }
 0x193   : > { %3190 = vmatpush.bf16.msrb.mxu3 %v9760_v2 }
 0x194   : > { %3152 = vmatpush.bf16.msrb.mxu0 %v9780_v10 }
 0x195   : > { %3178 = vmatpush.bf16.msrb.mxu2 %v9786_v35 }
 0x196   : > { %3165 = vmatpush.bf16.msrb.mxu1 %v9784_v19 }
 0x197   : > { %3191 = vmatpush.bf16.msrb.mxu3 %v9789_v48  ;;  %3153 = vmatmul.bf16.vlgmr.msrb.gmra.mxu0 %v9280_v23  ;;  %v11031_v23 = vld [vmem:[#allocation9_spill] sm:$0xff] }
 0x198   : > { %3257 = vmatpush.bf16.msra.mxu0 %v6191_v3  ;;  %3179 = vmatmul.bf16.vlgmr.msrb.gmra.mxu2 %v9262_v11  ;;  %v2946_v3 = vpop.f32.mrf.mxu0  ;;  %v11032_v11 = vld [vmem:[#allocation10_spill] sm:$0xff] }
 0x199   : > { %3283 = vmatpush.bf16.msra.mxu2 %v6204_v8  ;;  %3166 = vmatmul.bf16.vlgmr.msrb.gmra.mxu1 %v9289_v13  ;;  %v2959_v8 = vpop.f32.mrf.mxu1  ;;  %v11029_v13 = vld [vmem:[#allocation7_spill] sm:$0xff] }
 0x19a   : > { %3270 = vmatpush.bf16.msra.mxu1 %v6202_v7  ;;  %3192 = vmatmul.bf16.vlgmr.msrb.gmra.mxu3 %v9283_v24  ;;  %v2947_v7 = vadd.f32 %v2946_v3, %v2934_v18  ;;  %v11030_v24 = vld [vmem:[#allocation8_spill] sm:$0xff] }
 0x19b   : > { %3296 = vmatpush.bf16.msra.mxu3 %v6216_v12  ;;  %v11046_v3 = vld [vmem:[#allocation24_spill] sm:$0xff] }
 0x19c   : > { %3258 = vmatpush.bf16.msra.mxu0 %v6229_v16  ;;  %v2960_v12 = vadd.f32 %v2959_v8, %v2947_v7  ;;  %v2972_v16 = vpop.f32.mrf.mxu2 }
 0x19d   : > { %3284 = vmatpush.bf16.msra.mxu2 %v6243_v21 }
 0x19e   : > { %3271 = vmatpush.bf16.msra.mxu1 %v6231_v17  ;;  %v2869_v17 = vadd.f32 %v9382_v31, %v9362_v52  ;;  %v2973_v21 = vadd.f32 %v2972_v16, %v2960_v12  ;;  %v11034_v52 = vld [vmem:[#allocation12_spill] sm:$0xff]  ;;  %v11035_v31 = vld [vmem:[#allocation13_spill] sm:$0xff] }
 0x19f   : > { %3297 = vmatpush.bf16.msra.mxu3 %v6254_v25  ;;  %v2985_v25 = vpop.f32.mrf.mxu3  ;;  %v11047_v16 = vld [vmem:[#allocation25_spill] sm:$0xff] }
 0x1a0   : > { %3259 = vmatpush.bf16.msra.mxu0 %v6266_v29  ;;  %v2986_v29 = vadd.f32 %v2985_v25, %v2973_v21  ;;  %v11049_v21 = vld [vmem:[#allocation27_spill] sm:$0xff] }
 0x1a1   : > { %3285 = vmatpush.bf16.msra.mxu2 %v6281_v34  ;;  %v2961_v34 = vpop.f32.mrf.mxu1 }
 0x1a2   : > { %3272 = vmatpush.bf16.msra.mxu1 %v6279_v33  ;;  %v2948_v33 = vpop.f32.mrf.mxu0 }
 0x1a3   : > { %3298 = vmatpush.bf16.msra.mxu3 %v6293_v38  ;;  %v2882_v38 = vadd.f32 %v9396_v22, %v2869_v17  ;;  %v11037_v22 = vld [vmem:[#allocation15_spill] sm:$0xff]  ;;  %v11048_v17 = vld [vmem:[#allocation26_spill] sm:$0xff] }
 0x1a4   : > { %3260 = vmatpush.bf16.msra.mxu0 %v6311_v44  ;;  %v3204_v44 = vrot.slane %v2986_v29, 4  ;;  %v11050_v29 = vld [vmem:[#allocation28_spill] sm:$0xff] }
 0x1a5   : > { %3286 = vmatpush.bf16.msra.mxu2 %v6317_v46  ;;  %v9826_v46 = vld.sshfl [vmem:[#allocation1 + $0x10] sm:$0xff pattern:$0x73625140] }
 0x1a6   : > { %3273 = vmatpush.bf16.msra.mxu1 %v6315_v45  ;;  %v3208_v45 = vsel %vm3206_vm0, %v2882_v38, %v3204_v44  ;;  %v11051_v38 = vld [vmem:[#allocation29_spill] sm:$0xff] }
 0x1a7   : > { %3299 = vmatpush.bf16.msra.mxu3 %v6329_v50  ;;  %v9828_v50 = vld.sshfl [vmem:[#allocation1] sm:$0xff pattern:$0x73625140]  ;;  %3214 = vst [vmem:[%s8839_s6 + $0x8] sm:$0xff] %v3208_v45 }
 0x1a8   : > { %3261 = vmatpush.bf16.msra.mxu0 %v6347_v56  ;;  %v2974_v56 = vpop.f32.mrf.mxu2 }
 0x1a9   : > { %3287 = vmatpush.bf16.msra.mxu2 %v6353_v58  ;;  %v609_v58 = vld [vmem:[%s10339_s2 + $0x10] sm:$0xff] }
 0x1aa   : > { %3274 = vmatpush.bf16.msra.mxu1 %v6351_v57  ;;  %v9833_v57 = vld.sshfl [vmem:[#allocation1 + $0x18] sm:$0xff pattern:$0x73625140]  ;;  %2560 = vst [vmem:[#allocation1 + $0x20] ss:$2 sm:$0xff] %v609_v58  ;;  %v11052_v56 = vld [vmem:[#allocation30_spill] sm:$0xff] }
 0x1ab   : > { %3300 = vmatpush.bf16.msra.mxu3 %v6365_v62  ;;  %v2987_v62 = vpop.f32.mrf.mxu3  ;;  %3242 = vst [vmem:[#allocation1 + $0x10] ss:$2 sm:$0xff] %v8950_v39  ;;  %v5562_v39 = vld [vmem:[%s6602_s9 + $0x18] sm:$0xff]  ;;  %s5957_s9 = smul.u32 48, %s6095_s15  ;;  %s3901_s15 = scalar_lea.sflag [#allocation3], %s203_s11 }
 0x1ac   : > { %3262 = vmatpush.bf16.msra.mxu0 %v6383_v5  ;;  %v9840_v5 = vld.sshfl [vmem:[#allocation1 + $0x8] sm:$0xff pattern:$0x73625140]  ;;  %v11053_v62 = vld [vmem:[#allocation31_spill] sm:$0xff] }
 0x1ad   : > { %3288 = vmatpush.bf16.msra.mxu2 %v6389_v9  ;;  %3240 = vst [vmem:[#allocation1] ss:$2 sm:$0xff] %v7727_v41  ;;  %v11028_v9 = vld [vmem:[#allocation6_spill] sm:$0xff]  ;;  %s3915_s29 = scalar_lea.hbm %s10340_s3, %s5957_s9 }
 0x1ae   : > { %3275 = vmatpush.bf16.msra.mxu1 %v6387_v6  ;;  %v11027_v6 = vld [vmem:[#allocation5_spill] sm:$0xff]  ;;  %v11036_v41 = vld [vmem:[#allocation14_spill] sm:$0xff]  ;;  %s3918_s4 = sshll.u32 %s3915_s29, 4  ;;  %s3919_s4 = int_to_ptr.hbm [resolvable:$true] %s3918_s4 }
 0x1af   : > { %3301 = vmatpush.bf16.msra.mxu3 %v6401_v14  ;;  %v11033_v14 = vld [vmem:[#allocation11_spill] sm:$0xff]  ;;  %s6039_s5 = sshra.s32 %s3919_s4, 4  ;;  %s6040_s5 = int_to_ptr.hbm [resolvable:$true] %s6039_s5 }
 0x1b0   : > { %3263 = vmatpush.bf16.msra.mxu0 %v11027_v6  ;;  %v11054_v6 = vld [vmem:[#allocation32_spill] sm:$0xff]  ;;  %s6041_s7 = scalar_lea.hbm %s6040_s5, 48  ;;  %p6046_p1 = scmp.lt.s32.totalorder %s6040_s5, %s10340_s3 }
 0x1b1   : > { %3289 = vmatpush.bf16.msra.mxu2 %v11029_v13  ;;  %v2565_v47 = vld.sshfl [vmem:[#allocation1 + $0x20] sm:$0xff pattern:$0x75316420]  ;;  %v9855_v26 = vld.sshfl [vmem:[#allocation1 + $0x28] sm:$0xff pattern:$0x75316420]  ;;  %p6042_p12 = scmp.ne.s32.totalorder %s6040_s5, %s6041_s7  ;;  %p6047_p2 = scmp.lt.s32.totalorder %s6045_s21, %s6041_s7 }
 0x1b2   : > { %3276 = vmatpush.bf16.msra.mxu1 %v11028_v9  ;;  %3223 = vst [vmem:[#allocation1 + $0x20] ss:$4 sm:$0xff] %v5562_v39  ;;  %v11055_v9 = vld [vmem:[#allocation33_spill] sm:$0xff]  ;;  %v11056_v13 = vld [vmem:[#allocation34_spill] sm:$0xff] }
 0x1b3   : > { %3302 = vmatpush.bf16.msra.mxu3 %v11030_v24  ;;  %v11057_v24 = vld [vmem:[#allocation35_spill] sm:$0xff]  ;;  %v11059_v39 = vld [vmem:[#allocation37_spill] sm:$0xff]  ;;  %p6043_p13 = pnand %p6042_p12, %p6167_p4  ;;  %p6048_p3 = por %p6047_p2, %p6046_p1 }
 0x1b4   : > { %3264 = vmatpush.bf16.msra.mxu0 %v11031_v23  ;;  %v2998_v53 = vpop.f32.mrf.mxu0 }
 0x1b5   : > { %3290 = vmatpush.bf16.msra.mxu2 %v11033_v14  ;;  %v2999_v37 = vadd.f32 %v2998_v53, %v2565_v47  ;;  %v11064_v47 = vld [vmem:[#allocation42_spill] sm:$0xff]  ;;  %v11069_v53 = vld [vmem:[#allocation47_spill] sm:$0xff]  ;;  %p6044_p0 = pneg %p6043_p13 }
 0x1b6   : > { %3277 = vmatpush.bf16.msra.mxu1 %v11032_v11  ;;  %v11058_v11 = vld [vmem:[#allocation36_spill] sm:$0xff] }
 0x1b7   : > { %3303 = vmatpush.bf16.msra.mxu3 %v11034_v52  ;;  %3265 = vmatmul.bf16.vlgmr.msra.gmra.mxu0 %v9828_v50  ;;  %v11060_v52 = vld [vmem:[#allocation38_spill] sm:$0xff]  ;;  %p6049_p5 = pnand %p6048_p3, %p6044_p0 }
 0x1b8   : > { %3309 = vmatpush.bf16.msrb.mxu0 %v11035_v31  ;;  %3291 = vmatmul.bf16.vlgmr.msra.gmra.mxu2 %v9826_v46  ;;  %v3011_v18 = vpop.f32.mrf.mxu1  ;;  %v11061_v31 = vld [vmem:[#allocation39_spill] sm:$0xff] }
 0x1b9   : > { %3335 = vmatpush.bf16.msrb.mxu2 %v11037_v22  ;;  %3278 = vmatmul.bf16.vlgmr.msra.gmra.mxu1 %v9840_v5  ;;  %v9870_v7 = vld.sshfl [vmem:[#allocation1 + $0x20] sm:$0xff pattern:$0x73625140]  ;;  %v9872_v8 = vld.sshfl [vmem:[#allocation1 + $0x28] sm:$0xff pattern:$0x73625140]  ;;  %v3012_v12 = vadd.f32 %v3011_v18, %v2999_v37 }
 0x1ba   : > { %3322 = vmatpush.bf16.msrb.mxu1 %v11036_v41  ;;  %3304 = vmatmul.bf16.vlgmr.msra.gmra.mxu3 %v9833_v57  ;;  %3244 = vst [vmem:[#allocation1 + $0x20] ss:$2 sm:$0xff] %v609_v58  ;;  %v11062_v41 = vld [vmem:[#allocation40_spill] sm:$0xff]  ;;  %v11063_v22 = vld [vmem:[#allocation41_spill] sm:$0xff]  ;;  %v11072_v37 = vld [vmem:[#allocation50_spill] sm:$0xff] }
 0x1bb   : > { %3348 = vmatpush.bf16.msrb.mxu3 %v11038_v15  ;;  %v3024_v25 = vpop.f32.mrf.mxu2  ;;  %v11065_v15 = vld [vmem:[#allocation43_spill] sm:$0xff] }
 0x1bc   : > { %3310 = vmatpush.bf16.msrb.mxu0 %v11039_v4  ;;  %v3025_v33 = vadd.f32 %v3024_v25, %v3012_v12  ;;  %v3037_v34 = vpop.f32.mrf.mxu3  ;;  %v3000_v45 = vpop.f32.mrf.mxu0  ;;  %v9893_v4 = vld.sshfl [vmem:[#allocation1 + $0x30] sm:$0xff pattern:$0x73625140]  ;;  %v11073_v18 = vld [vmem:[#allocation51_spill] sm:$0xff]  ;;  %v11075_v12 = vld [vmem:[#allocation53_spill] sm:$0xff] }
 0x1bd   : > { %3336 = vmatpush.bf16.msrb.mxu2 %v11041_v61  ;;  %v11067_v61 = vld [vmem:[#allocation45_spill] sm:$0xff]  ;;  %v11080_v45 = vld [vmem:[#allocation58_spill] sm:$0xff] }
 0x1be   : > { %3323 = vmatpush.bf16.msrb.mxu1 %v11040_v59  ;;  %v3038_v44 = vadd.f32 %v3037_v34, %v3025_v33  ;;  %v11066_v59 = vld [vmem:[#allocation44_spill] sm:$0xff] }
 0x1bf   : > { %3349 = vmatpush.bf16.msrb.mxu3 %v11042_v30  ;;  %v9897_v30 = vld.sshfl [vmem:[#allocation1 + $0x38] sm:$0xff pattern:$0x73625140]  ;;  %v11078_v33 = vld [vmem:[#allocation56_spill] sm:$0xff] }
 0x1c0   : > { %3311 = vmatpush.bf16.msrb.mxu0 %v11043_v0  ;;  %v3013_v58 = vpop.f32.mrf.mxu1  ;;  %v11068_v0 = vld [vmem:[#allocation46_spill] sm:$0xff] }
 0x1c1   : > { %3337 = vmatpush.bf16.msrb.mxu2 %v11045_v63  ;;  %v11071_v63 = vld [vmem:[#allocation49_spill] sm:$0xff]  ;;  %v11082_v58 = vld [vmem:[#allocation60_spill] sm:$0xff] }
 0x1c2   : > { %3324 = vmatpush.bf16.msrb.mxu1 %v11044_v54  ;;  %v11070_v54 = vld [vmem:[#allocation48_spill] sm:$0xff] }
 0x1c3   : > { %3350 = vmatpush.bf16.msrb.mxu3 %v11046_v3  ;;  %v3026_v23 = vpop.f32.mrf.mxu2  ;;  %v11074_v3 = vld [vmem:[#allocation52_spill] sm:$0xff] }
 0x1c4   : > { %3312 = vmatpush.bf16.msrb.mxu0 %v11047_v16  ;;  %v3039_v14 = vpop.f32.mrf.mxu3 }
 0x1c5   : > { %3338 = vmatpush.bf16.msrb.mxu2 %v11049_v21  ;;  %v11077_v21 = vld [vmem:[#allocation55_spill] sm:$0xff]  ;;  %v11087_v14 = vld [vmem:[#allocation65_spill] sm:$0xff] }
 0x1c6   : > { %3325 = vmatpush.bf16.msrb.mxu1 %v11048_v17  ;;  %v11076_v17 = vld [vmem:[#allocation54_spill] sm:$0xff] }
 0x1c7   : > { %3351 = vmatpush.bf16.msrb.mxu3 %v11050_v29 }
 0x1c8   : > { %3313 = vmatpush.bf16.msrb.mxu0 %v11051_v38  ;;  %v11079_v38 = vld [vmem:[#allocation57_spill] sm:$0xff] }
 0x1c9   : > { %3339 = vmatpush.bf16.msrb.mxu2 %v11053_v62 }
 0x1ca   : > { %3326 = vmatpush.bf16.msrb.mxu1 %v11052_v56  ;;  %v11081_v56 = vld [vmem:[#allocation59_spill] sm:$0xff] }
 0x1cb   : > { %3352 = vmatpush.bf16.msrb.mxu3 %v11054_v6 }
 0x1cc   : > { %3314 = vmatpush.bf16.msrb.mxu0 %v11055_v9  ;;  %v11083_v9 = vld [vmem:[#allocation61_spill] sm:$0xff] }
 0x1cd   : > { %3340 = vmatpush.bf16.msrb.mxu2 %v11057_v24  ;;  %v11085_v24 = vld [vmem:[#allocation63_spill] sm:$0xff] }
 0x1ce   : > { %3327 = vmatpush.bf16.msrb.mxu1 %v11056_v13  ;;  %v11084_v13 = vld [vmem:[#allocation62_spill] sm:$0xff] }
 0x1cf   : > { %3353 = vmatpush.bf16.msrb.mxu3 %v11058_v11  ;;  %v11086_v11 = vld [vmem:[#allocation64_spill] sm:$0xff] }
 0x1d0   : > { %3315 = vmatpush.bf16.msrb.mxu0 %v11059_v39  ;;  %v11088_v39 = vld [vmem:[#allocation66_spill] sm:$0xff] }
 0x1d1   : > { %3341 = vmatpush.bf16.msrb.mxu2 %v11061_v31 }
 0x1d2   : > { %3328 = vmatpush.bf16.msrb.mxu1 %v11060_v52  ;;  %v11089_v52 = vld [vmem:[#allocation67_spill] sm:$0xff] }
 0x1d3   : > { %3354 = vmatpush.bf16.msrb.mxu3 %v11062_v41  ;;  %v11090_v41 = vld [vmem:[#allocation68_spill] sm:$0xff] }
 0x1d4   : > { %3316 = vmatpush.bf16.msrb.mxu0 %v11063_v22 }
 0x1d5   : > { %3342 = vmatpush.bf16.msrb.mxu2 %v11065_v15  ;;  %v11092_v15 = vld [vmem:[#allocation70_spill] sm:$0xff] }
 0x1d6   : > { %3329 = vmatpush.bf16.msrb.mxu1 %v11064_v47  ;;  %v11091_v47 = vld [vmem:[#allocation69_spill] sm:$0xff] }
 0x1d7   : > { %3355 = vmatpush.bf16.msrb.mxu3 %v11066_v59  ;;  %3317 = vmatmul.bf16.vlgmr.msrb.gmra.mxu0 %v9870_v7  ;;  %v11093_v59 = vld [vmem:[#allocation71_spill] sm:$0xff] }
 0x1d8   : > { %3361 = vmatpush.bf16.msra.mxu0 %v11067_v61  ;;  %3343 = vmatmul.bf16.vlgmr.msrb.gmra.mxu2 %v9893_v4  ;;  %v11094_v61 = vld [vmem:[#allocation72_spill] sm:$0xff] }
 0x1d9   : > { %3387 = vmatpush.bf16.msra.mxu2 %v11069_v53  ;;  %3330 = vmatmul.bf16.vlgmr.msrb.gmra.mxu1 %v9872_v8  ;;  %v11096_v53 = vld [vmem:[#allocation74_spill] sm:$0xff] }
 0x1da   : > { %3374 = vmatpush.bf16.msra.mxu1 %v11068_v0  ;;  %3356 = vmatmul.bf16.vlgmr.msrb.gmra.mxu3 %v9897_v30  ;;  %v3050_v16 = vpop.f32.mrf.mxu0  ;;  %v11095_v0 = vld [vmem:[#allocation73_spill] sm:$0xff] }
 0x1db   : > { %3400 = vmatpush.bf16.msra.mxu3 %v11070_v54  ;;  %v3051_v25 = vadd.f32 %v3050_v16, %v3038_v44  ;;  %v11097_v54 = vld [vmem:[#allocation75_spill] sm:$0xff]  ;;  %v11103_v16 = vld [vmem:[#allocation81_spill] sm:$0xff] }
 0x1dc   : > { %3362 = vmatpush.bf16.msra.mxu0 %v11071_v63  ;;  %v3063_v29 = vpop.f32.mrf.mxu1  ;;  %v11098_v63 = vld [vmem:[#allocation76_spill] sm:$0xff] }
 0x1dd   : > { %3388 = vmatpush.bf16.msra.mxu2 %v11073_v18  ;;  %v9914_v34 = vadd.f32 %v3063_v29, %v3051_v25  ;;  %v11100_v18 = vld [vmem:[#allocation78_spill] sm:$0xff]  ;;  %v11106_v25 = vld [vmem:[#allocation84_spill] sm:$0xff]  ;;  %v11107_v29 = vld [vmem:[#allocation85_spill] sm:$0xff] }
 0x1de   : > { %3375 = vmatpush.bf16.msra.mxu1 %v11072_v37  ;;  %v9919_v62 = vpop.f32.mrf.mxu2  ;;  %v11099_v37 = vld [vmem:[#allocation77_spill] sm:$0xff] }
 0x1df   : > { %3401 = vmatpush.bf16.msra.mxu3 %v11074_v3  ;;  %v11101_v3 = vld [vmem:[#allocation79_spill] sm:$0xff] }
 0x1e0   : > { %3363 = vmatpush.bf16.msra.mxu0 %v11075_v12  ;;  %v11102_v12 = vld [vmem:[#allocation80_spill] sm:$0xff] }
 0x1e1   : > { %3389 = vmatpush.bf16.msra.mxu2 %v11077_v21  ;;  %v9922_v6 = vpop.f32.mrf.mxu3  ;;  %v11105_v21 = vld [vmem:[#allocation83_spill] sm:$0xff] }
 0x1e2   : > { %3376 = vmatpush.bf16.msra.mxu1 %v11076_v17  ;;  %v3052_v44 = vpop.f32.mrf.mxu0  ;;  %v11104_v17 = vld [vmem:[#allocation82_spill] sm:$0xff] }
 0x1e3   : > { %3402 = vmatpush.bf16.msra.mxu3 %v11078_v33  ;;  %v11112_v44 = vld [vmem:[#allocation90_spill] sm:$0xff] }
 0x1e4   : > { %3364 = vmatpush.bf16.msra.mxu0 %v11079_v38  ;;  %v3065_v23 = vpop.f32.mrf.mxu1  ;;  %v11108_v38 = vld [vmem:[#allocation86_spill] sm:$0xff] }
 0x1e5   : > { %3390 = vmatpush.bf16.msra.mxu2 %v11081_v56  ;;  %v11114_v23 = vld [vmem:[#allocation92_spill] sm:$0xff] }
 0x1e6   : > { %3377 = vmatpush.bf16.msra.mxu1 %v11080_v45  ;;  %v3078_v31 = vpop.f32.mrf.mxu2  ;;  %v11109_v45 = vld [vmem:[#allocation87_spill] sm:$0xff] }
 0x1e7   : > { %3403 = vmatpush.bf16.msra.mxu3 %v11082_v58  ;;  %v11110_v58 = vld [vmem:[#allocation88_spill] sm:$0xff]  ;;  %v11117_v31 = vld [vmem:[#allocation95_spill] sm:$0xff] }
 0x1e8   : > { %3365 = vmatpush.bf16.msra.mxu0 %v11083_v9  ;;  %v11111_v9 = vld [vmem:[#allocation89_spill] sm:$0xff] }
 0x1e9   : > { %3391 = vmatpush.bf16.msra.mxu2 %v11085_v24  ;;  %v3091_v22 = vpop.f32.mrf.mxu3 }
 0x1ea   : > { %3378 = vmatpush.bf16.msra.mxu1 %v11084_v13  ;;  %v11113_v13 = vld [vmem:[#allocation91_spill] sm:$0xff]  ;;  %v11118_v22 = vld [vmem:[#allocation96_spill] sm:$0xff] }
 0x1eb   : > { %3404 = vmatpush.bf16.msra.mxu3 %v11086_v11 }
 0x1ec   : > { %3366 = vmatpush.bf16.msra.mxu0 %v11087_v14  ;;  %v11115_v14 = vld [vmem:[#allocation93_spill] sm:$0xff] }
 0x1ed   : > { %3392 = vmatpush.bf16.msra.mxu2 %v11089_v52  ;;  %v11116_v52 = vld [vmem:[#allocation94_spill] sm:$0xff] }
 0x1ee   : > { %3379 = vmatpush.bf16.msra.mxu1 %v11088_v39 }
 0x1ef   : > { %3405 = vmatpush.bf16.msra.mxu3 %v11090_v41 }
 0x1f0   : > { %3367 = vmatpush.bf16.msra.mxu0 %v11091_v47  ;;  %v11119_v47 = vld [vmem:[#allocation97_spill] sm:$0xff] }
 0x1f1   : > { %3393 = vmatpush.bf16.msra.mxu2 %v11093_v59  ;;  %v11121_v59 = vld [vmem:[#allocation99_spill] sm:$0xff] }
 0x1f2   : > { %3380 = vmatpush.bf16.msra.mxu1 %v11092_v15  ;;  %v11120_v15 = vld [vmem:[#allocation98_spill] sm:$0xff] }
 0x1f3   : > { %3406 = vmatpush.bf16.msra.mxu3 %v11094_v61 }
 0x1f4   : > { %3368 = vmatpush.bf16.msra.mxu0 %v11095_v0  ;;  %v3102_v33 = vpop.f32.mrf.mxu0  ;;  %v11122_v0 = vld [vmem:[#allocation100_spill] sm:$0xff] }
 0x1f5   : > { %3394 = vmatpush.bf16.msra.mxu2 %v11097_v54  ;;  %v3103_v54 = vadd.f32 %v3102_v33, %v9855_v26  ;;  %v11132_v26 = vld [vmem:[#allocation110_spill] sm:$0xff]  ;;  %v11133_v33 = vld [vmem:[#allocation111_spill] sm:$0xff] }
 0x1f6   : > { %3381 = vmatpush.bf16.msra.mxu1 %v11096_v53  ;;  %v3115_v56 = vpop.f32.mrf.mxu1 }
 0x1f7   : > { %3407 = vmatpush.bf16.msra.mxu3 %v11098_v63  ;;  %3369 = vmatmul.bf16.vlgmr.msra.gmra.mxu0 %v9828_v50  ;;  %v11123_v63 = vld [vmem:[#allocation101_spill] sm:$0xff] }
 0x1f8   : > { %3413 = vmatpush.bf16.msrb.mxu0 %v11099_v37  ;;  %3395 = vmatmul.bf16.vlgmr.msra.gmra.mxu2 %v9826_v46  ;;  %v11124_v37 = vld [vmem:[#allocation102_spill] sm:$0xff] }
 0x1f9   : > { %3439 = vmatpush.bf16.msrb.mxu2 %v11101_v3  ;;  %3382 = vmatmul.bf16.vlgmr.msra.gmra.mxu1 %v9840_v5  ;;  %v11126_v3 = vld [vmem:[#allocation104_spill] sm:$0xff] }
 0x1fa   : > { %3426 = vmatpush.bf16.msrb.mxu1 %v11100_v18  ;;  %3408 = vmatmul.bf16.vlgmr.msra.gmra.mxu3 %v9833_v57  ;;  %v11125_v18 = vld [vmem:[#allocation103_spill] sm:$0xff] }
 0x1fb   : > { %3452 = vmatpush.bf16.msrb.mxu3 %v11102_v12  ;;  %v3128_v24 = vpop.f32.mrf.mxu2  ;;  %v3116_v12 = vadd.f32 %v3115_v56, %v3103_v54  ;;  %v11135_v56 = vld [vmem:[#allocation113_spill] sm:$0xff] }
 0x1fc   : > { %3414 = vmatpush.bf16.msrb.mxu0 %v11103_v16  ;;  %v3104_v39 = vpop.f32.mrf.mxu0  ;;  %v11127_v16 = vld [vmem:[#allocation105_spill] sm:$0xff] }
 0x1fd   : > { %3440 = vmatpush.bf16.msrb.mxu2 %v11105_v21  ;;  %v3141_v11 = vpop.f32.mrf.mxu3  ;;  %v11129_v21 = vld [vmem:[#allocation107_spill] sm:$0xff] }
 0x1fe   : > { %3427 = vmatpush.bf16.msrb.mxu1 %v11104_v17  ;;  %v3117_v41 = vpop.f32.mrf.mxu1  ;;  %v11128_v17 = vld [vmem:[#allocation106_spill] sm:$0xff]  ;;  %v11141_v39 = vld [vmem:[#allocation119_spill] sm:$0xff] }
 0x1ff   : > { %3453 = vmatpush.bf16.msrb.mxu3 %v11106_v25  ;;  %v11130_v25 = vld [vmem:[#allocation108_spill] sm:$0xff] }
 0x200   : > { %3415 = vmatpush.bf16.msrb.mxu0 %v11107_v29  ;;  %v11131_v29 = vld [vmem:[#allocation109_spill] sm:$0xff]  ;;  %v11142_v41 = vld [vmem:[#allocation120_spill] sm:$0xff] }
 0x201   : > { %3441 = vmatpush.bf16.msrb.mxu2 %v11109_v45  ;;  %v11134_v45 = vld [vmem:[#allocation112_spill] sm:$0xff] }
 0x202   : > { %3428 = vmatpush.bf16.msrb.mxu1 %v11108_v38  ;;  %v3129_v38 = vadd.f32 %v3128_v24, %v3116_v12  ;;  %v11139_v24 = vld [vmem:[#allocation117_spill] sm:$0xff]  ;;  %v11149_v12 = vld [vmem:[#allocation127_spill] sm:$0xff] }
 0x203   : > { %3454 = vmatpush.bf16.msrb.mxu3 %v11110_v58  ;;  %v3130_v61 = vpop.f32.mrf.mxu2 }
 0x204   : > { %3416 = vmatpush.bf16.msrb.mxu0 %v11111_v9  ;;  %v3142_v58 = vadd.f32 %v3141_v11, %v3129_v38  ;;  %v11136_v9 = vld [vmem:[#allocation114_spill] sm:$0xff]  ;;  %v3077_v61 = vadd.f32 %v9919_v62, %v9914_v34  ;;  %v11151_v62 = vld [vmem:[#allocation129_spill] sm:$0xff]  ;;  %v11154_v38 = vld [vmem:[#allocation132_spill] sm:$0xff] }
 0x205   : > { %3442 = vmatpush.bf16.msrb.mxu2 %v11113_v13  ;;  %v3143_v53 = vpop.f32.mrf.mxu3  ;;  %v11138_v13 = vld [vmem:[#allocation116_spill] sm:$0xff]  ;;  %v11144_v11 = vld [vmem:[#allocation122_spill] sm:$0xff] }
 0x206   : > { %3429 = vmatpush.bf16.msrb.mxu1 %v11112_v44  ;;  %v11137_v44 = vld [vmem:[#allocation115_spill] sm:$0xff] }
 0x207   : > { %3455 = vmatpush.bf16.msrb.mxu3 %v11114_v23 }
 0x208   : > { %3417 = vmatpush.bf16.msrb.mxu0 %v11115_v14  ;;  %v11140_v14 = vld [vmem:[#allocation118_spill] sm:$0xff] }
 0x209   : > { %3443 = vmatpush.bf16.msrb.mxu2 %v11117_v31 }
 0x20a   : > { %3430 = vmatpush.bf16.msrb.mxu1 %v11116_v52 }
 0x20b   : > { %3456 = vmatpush.bf16.msrb.mxu3 %v11118_v22 }
 0x20c   : > { %3418 = vmatpush.bf16.msrb.mxu0 %v11119_v47  ;;  %v11143_v47 = vld [vmem:[#allocation121_spill] sm:$0xff] }
 0x20d   : > { %3444 = vmatpush.bf16.msrb.mxu2 %v11121_v59 }
 0x20e   : > { %3431 = vmatpush.bf16.msrb.mxu1 %v11120_v15  ;;  %v11145_v15 = vld [vmem:[#allocation123_spill] sm:$0xff] }
 0x20f   : > { %3457 = vmatpush.bf16.msrb.mxu3 %v11122_v0  ;;  %v11146_v0 = vld [vmem:[#allocation124_spill] sm:$0xff] }
 0x210   : > { %3419 = vmatpush.bf16.msrb.mxu0 %v11123_v63  ;;  %v11147_v63 = vld [vmem:[#allocation125_spill] sm:$0xff] }
 0x211   : > { %3445 = vmatpush.bf16.msrb.mxu2 %v11125_v18 }
 0x212   : > { %3432 = vmatpush.bf16.msrb.mxu1 %v11124_v37 }
 0x213   : > { %3458 = vmatpush.bf16.msrb.mxu3 %v11126_v3  ;;  %v11148_v3 = vld [vmem:[#allocation126_spill] sm:$0xff] }
 0x214   : > { %3420 = vmatpush.bf16.msrb.mxu0 %v11127_v16  ;;  %v3154_v23 = vpop.f32.mrf.mxu0 }
 0x215   : > { %3446 = vmatpush.bf16.msrb.mxu2 %v11129_v21  ;;  %v3155_v52 = vadd.f32 %v3154_v23, %v3142_v58  ;;  %v11150_v21 = vld [vmem:[#allocation128_spill] sm:$0xff]  ;;  %v11156_v58 = vld [vmem:[#allocation134_spill] sm:$0xff] }
 0x216   : > { %3433 = vmatpush.bf16.msrb.mxu1 %v11128_v17  ;;  %v3167_v31 = vpop.f32.mrf.mxu1  ;;  %v3090_v17 = vadd.f32 %v9922_v6, %v3077_v61  ;;  %v11157_v6 = vld [vmem:[#allocation135_spill] sm:$0xff]  ;;  %v11162_v23 = vld [vmem:[#allocation140_spill] sm:$0xff] }
 0x217   : > { %3459 = vmatpush.bf16.msrb.mxu3 %v11130_v25  ;;  %3421 = vmatmul.bf16.vlgmr.msrb.gmra.mxu0 %v9870_v7  ;;  %v3168_v22 = vadd.f32 %v3167_v31, %v3155_v52  ;;  %v11165_v52 = vld [vmem:[#allocation143_spill] sm:$0xff]  ;;  %v11166_v31 = vld [vmem:[#allocation144_spill] sm:$0xff] }
 0x218   : > { %3465 = vmatpush.bf16.msra.mxu0 %v11131_v29  ;;  %3447 = vmatmul.bf16.vlgmr.msrb.gmra.mxu2 %v9893_v4  ;;  %v11152_v29 = vld [vmem:[#allocation130_spill] sm:$0xff] }
 0x219   : > { %3491 = vmatpush.bf16.msra.mxu2 %v11133_v33  ;;  %3434 = vmatmul.bf16.vlgmr.msrb.gmra.mxu1 %v9872_v8 }
 0x21a   : > { %3478 = vmatpush.bf16.msra.mxu1 %v11132_v26  ;;  %3460 = vmatmul.bf16.vlgmr.msrb.gmra.mxu3 %v9897_v30  ;;  %v11153_v26 = vld [vmem:[#allocation131_spill] sm:$0xff] }
 0x21b   : > { %3504 = vmatpush.bf16.msra.mxu3 %v11134_v45  ;;  %v3180_v59 = vpop.f32.mrf.mxu2 }
 0x21c   : > { %3466 = vmatpush.bf16.msra.mxu0 %v11135_v56  ;;  %v3181_v53 = vadd.f32 %v3180_v59, %v3168_v22  ;;  %v3156_v18 = vpop.f32.mrf.mxu0  ;;  %v11155_v56 = vld [vmem:[#allocation133_spill] sm:$0xff]  ;;  %v11168_v22 = vld [vmem:[#allocation146_spill] sm:$0xff] }
 0x21d   : > { %3492 = vmatpush.bf16.msra.mxu2 %v11137_v44  ;;  %v3193_v54 = vpop.f32.mrf.mxu3  ;;  %v11159_v44 = vld [vmem:[#allocation137_spill] sm:$0xff] }
 0x21e   : > { %3479 = vmatpush.bf16.msra.mxu1 %v11136_v9  ;;  %v3194_v37 = vadd.f32 %v3193_v54, %v3181_v53  ;;  %v3169_v16 = vpop.f32.mrf.mxu1  ;;  %v11158_v9 = vld [vmem:[#allocation136_spill] sm:$0xff]  ;;  %v11171_v59 = vld [vmem:[#allocation149_spill] sm:$0xff]  ;;  %v11173_v53 = vld [vmem:[#allocation151_spill] sm:$0xff] }
 0x21f   : > { %3505 = vmatpush.bf16.msra.mxu3 %v11138_v13  ;;  %v11160_v13 = vld [vmem:[#allocation138_spill] sm:$0xff]  ;;  %v11177_v16 = vld [vmem:[#allocation155_spill] sm:$0xff] }
 0x220   : > { %3467 = vmatpush.bf16.msra.mxu0 %v11139_v24  ;;  %v3205_v25 = vrot.slane %v3194_v37, 4  ;;  %v11161_v24 = vld [vmem:[#allocation139_spill] sm:$0xff]  ;;  %v11174_v37 = vld [vmem:[#allocation152_spill] sm:$0xff] }
 0x221   : > { %3493 = vmatpush.bf16.msra.mxu2 %v11141_v39  ;;  %v11164_v39 = vld [vmem:[#allocation142_spill] sm:$0xff] }
 0x222   : > { %3480 = vmatpush.bf16.msra.mxu1 %v11140_v14  ;;  %v3209_v34 = vsel %vm3206_vm0, %v3090_v17, %v3205_v25  ;;  %v11163_v14 = vld [vmem:[#allocation141_spill] sm:$0xff] }
 0x223   : > { %3506 = vmatpush.bf16.msra.mxu3 %v11142_v41  ;;  %3215 = vst [vmem:[%s8839_s6 + $0x10] sm:$0xff] %v3209_v34  ;;  %v3182_v33 = vpop.f32.mrf.mxu2  ;;  %v11167_v41 = vld [vmem:[#allocation145_spill] sm:$0xff] }
 0x224   : > { %3468 = vmatpush.bf16.msra.mxu0 %v11143_v47  ;;  %v11169_v47 = vld [vmem:[#allocation147_spill] sm:$0xff]  ;;  %v11180_v33 = vld [vmem:[#allocation158_spill] sm:$0xff] }
 0x225   : > { %3494 = vmatpush.bf16.msra.mxu2 %v11145_v15  ;;  %v3195_v45 = vpop.f32.mrf.mxu3  ;;  %v3245_v15 = vld.sshfl [vmem:[#allocation1] sm:$0xff pattern:$0x75316420] }
 0x226   : > { %3481 = vmatpush.bf16.msra.mxu1 %v11144_v11  ;;  %v11170_v11 = vld [vmem:[#allocation148_spill] sm:$0xff] }
 0x227   : > { %3507 = vmatpush.bf16.msra.mxu3 %v11146_v0  ;;  %v11172_v0 = vld [vmem:[#allocation150_spill] sm:$0xff] }
 0x228   : > { %3469 = vmatpush.bf16.msra.mxu0 %v11147_v63 }
 0x229   : > { %3495 = vmatpush.bf16.msra.mxu2 %v11149_v12  ;;  %v11176_v12 = vld [vmem:[#allocation154_spill] sm:$0xff] }
 0x22a   : > { %3482 = vmatpush.bf16.msra.mxu1 %v11148_v3  ;;  %v11175_v3 = vld [vmem:[#allocation153_spill] sm:$0xff] }
 0x22b   : > { %3508 = vmatpush.bf16.msra.mxu3 %v11150_v21  ;;  %v11178_v21 = vld [vmem:[#allocation156_spill] sm:$0xff] }
 0x22c   : > { %3470 = vmatpush.bf16.msra.mxu0 %v11151_v62  ;;  %v11179_v62 = vld [vmem:[#allocation157_spill] sm:$0xff] }
 0x22d   : > { %3496 = vmatpush.bf16.msra.mxu2 %v11153_v26 }
 0x22e   : > { %3483 = vmatpush.bf16.msra.mxu1 %v11152_v29 }
 0x22f   : > { %3509 = vmatpush.bf16.msra.mxu3 %v11154_v38  ;;  %v11181_v38 = vld [vmem:[#allocation159_spill] sm:$0xff] }
 0x230   : > { %3471 = vmatpush.bf16.msra.mxu0 %v11155_v56  ;;  %v11182_v56 = vld [vmem:[#allocation160_spill] sm:$0xff] }
 0x231   : > { %3497 = vmatpush.bf16.msra.mxu2 %v11157_v6  ;;  %v11184_v6 = vld [vmem:[#allocation162_spill] sm:$0xff] }
 0x232   : > { %3484 = vmatpush.bf16.msra.mxu1 %v11156_v58  ;;  %v11183_v58 = vld [vmem:[#allocation161_spill] sm:$0xff] }
 0x233   : > { %3510 = vmatpush.bf16.msra.mxu3 %v11158_v9  ;;  %v11185_v9 = vld [vmem:[#allocation163_spill] sm:$0xff] }
 0x234   : > { %3472 = vmatpush.bf16.msra.mxu0 %v11159_v44  ;;  %v3266_v61 = vpop.f32.mrf.mxu0 }
 0x235   : > { %3498 = vmatpush.bf16.msra.mxu2 %v11161_v24  ;;  %v3267_v54 = vadd.f32 %v3266_v61, %v3245_v15  ;;  %v11196_v15 = vld [vmem:[#allocation174_spill] sm:$0xff]  ;;  %v11198_v61 = vld [vmem:[#allocation176_spill] sm:$0xff] }
 0x236   : > { %3485 = vmatpush.bf16.msra.mxu1 %v11160_v13  ;;  %v3279_v63 = vpop.f32.mrf.mxu1  ;;  %v11186_v13 = vld [vmem:[#allocation164_spill] sm:$0xff] }
 0x237   : > { %3511 = vmatpush.bf16.msra.mxu3 %v11162_v23  ;;  %3473 = vmatmul.bf16.vlgmr.msra.gmra.mxu0 %v9828_v50  ;;  %v3280_v18 = vadd.f32 %v3279_v63, %v3267_v54  ;;  %v11187_v23 = vld [vmem:[#allocation165_spill] sm:$0xff]  ;;  %v11201_v54 = vld [vmem:[#allocation179_spill] sm:$0xff]  ;;  %v11202_v63 = vld [vmem:[#allocation180_spill] sm:$0xff] }
 0x238   : > { %3517 = vmatpush.bf16.msrb.mxu0 %v11163_v14  ;;  %3499 = vmatmul.bf16.vlgmr.msra.gmra.mxu2 %v9826_v46  ;;  %v11188_v14 = vld [vmem:[#allocation166_spill] sm:$0xff] }
 0x239   : > { %3543 = vmatpush.bf16.msrb.mxu2 %v11165_v52  ;;  %3486 = vmatmul.bf16.vlgmr.msra.gmra.mxu1 %v9840_v5  ;;  %v11190_v52 = vld [vmem:[#allocation168_spill] sm:$0xff] }
 0x23a   : > { %3530 = vmatpush.bf16.msrb.mxu1 %v11164_v39  ;;  %3512 = vmatmul.bf16.vlgmr.msra.gmra.mxu3 %v9833_v57  ;;  %v11189_v39 = vld [vmem:[#allocation167_spill] sm:$0xff] }
 0x23b   : > { %3556 = vmatpush.bf16.msrb.mxu3 %v11166_v31  ;;  %v3292_v17 = vpop.f32.mrf.mxu2  ;;  %v11191_v31 = vld [vmem:[#allocation169_spill] sm:$0xff] }
 0x23c   : > { %3518 = vmatpush.bf16.msrb.mxu0 %v11167_v41  ;;  %v3293_v25 = vadd.f32 %v3292_v17, %v3280_v18  ;;  %v3268_v26 = vpop.f32.mrf.mxu0  ;;  %v11192_v41 = vld [vmem:[#allocation170_spill] sm:$0xff] }
 0x23d   : > { %3544 = vmatpush.bf16.msrb.mxu2 %v11169_v47  ;;  %v3305_v34 = vpop.f32.mrf.mxu3  ;;  %v11194_v47 = vld [vmem:[#allocation172_spill] sm:$0xff]  ;;  %v11209_v26 = vld [vmem:[#allocation187_spill] sm:$0xff] }
 0x23e   : > { %3531 = vmatpush.bf16.msrb.mxu1 %v11168_v22  ;;  %v3306_v29 = vadd.f32 %v3305_v34, %v3293_v25  ;;  %v3281_v45 = vpop.f32.mrf.mxu1  ;;  %v11193_v22 = vld [vmem:[#allocation171_spill] sm:$0xff]  ;;  %v11207_v34 = vld [vmem:[#allocation185_spill] sm:$0xff] }
 0x23f   : > { %3557 = vmatpush.bf16.msrb.mxu3 %v11170_v11  ;;  %v11195_v11 = vld [vmem:[#allocation173_spill] sm:$0xff] }
 0x240   : > { %3519 = vmatpush.bf16.msrb.mxu0 %v11171_v59  ;;  %v11197_v59 = vld [vmem:[#allocation175_spill] sm:$0xff] }
 0x241   : > { %3545 = vmatpush.bf16.msrb.mxu2 %v11173_v53  ;;  %v11200_v53 = vld [vmem:[#allocation178_spill] sm:$0xff] }
 0x242   : > { %3532 = vmatpush.bf16.msrb.mxu1 %v11172_v0  ;;  %v11199_v0 = vld [vmem:[#allocation177_spill] sm:$0xff] }
 0x243   : > { %3558 = vmatpush.bf16.msrb.mxu3 %v11174_v37  ;;  %v3294_v44 = vpop.f32.mrf.mxu2  ;;  %v11203_v37 = vld [vmem:[#allocation181_spill] sm:$0xff] }
 0x244   : > { %3520 = vmatpush.bf16.msrb.mxu0 %v11175_v3  ;;  %v11204_v3 = vld [vmem:[#allocation182_spill] sm:$0xff]  ;;  %v11214_v44 = vld [vmem:[#allocation192_spill] sm:$0xff] }
 0x245   : > { %3546 = vmatpush.bf16.msrb.mxu2 %v11177_v16  ;;  %v3307_v24 = vpop.f32.mrf.mxu3 }
 0x246   : > { %3533 = vmatpush.bf16.msrb.mxu1 %v11176_v12  ;;  %v11205_v12 = vld [vmem:[#allocation183_spill] sm:$0xff]  ;;  %v11216_v24 = vld [vmem:[#allocation194_spill] sm:$0xff] }
 0x247   : > { %3559 = vmatpush.bf16.msrb.mxu3 %v11178_v21  ;;  %v11206_v21 = vld [vmem:[#allocation184_spill] sm:$0xff] }
 0x248   : > { %3521 = vmatpush.bf16.msrb.mxu0 %v11179_v62  ;;  %v11208_v62 = vld [vmem:[#allocation186_spill] sm:$0xff] }
 0x249   : > { %3547 = vmatpush.bf16.msrb.mxu2 %v11181_v38  ;;  %v11210_v38 = vld [vmem:[#allocation188_spill] sm:$0xff] }
 0x24a   : > { %3534 = vmatpush.bf16.msrb.mxu1 %v11180_v33 }
 0x24b   : > { %3560 = vmatpush.bf16.msrb.mxu3 %v11182_v56  ;;  %v11211_v56 = vld [vmem:[#allocation189_spill] sm:$0xff] }
 0x24c   : > { %3522 = vmatpush.bf16.msrb.mxu0 %v11183_v58  ;;  %v11212_v58 = vld [vmem:[#allocation190_spill] sm:$0xff] }
 0x24d   : > { %3548 = vmatpush.bf16.msrb.mxu2 %v11185_v9 }
 0x24e   : > { %3535 = vmatpush.bf16.msrb.mxu1 %v11184_v6  ;;  %v11213_v6 = vld [vmem:[#allocation191_spill] sm:$0xff] }
 0x24f   : > { %3561 = vmatpush.bf16.msrb.mxu3 %v11186_v13  ;;  %v11215_v13 = vld [vmem:[#allocation193_spill] sm:$0xff] }
 0x250   : > { %3523 = vmatpush.bf16.msrb.mxu0 %v11187_v23  ;;  %v11217_v23 = vld [vmem:[#allocation195_spill] sm:$0xff] }
 0x251   : > { %3549 = vmatpush.bf16.msrb.mxu2 %v11189_v39  ;;  %v11218_v39 = vld [vmem:[#allocation196_spill] sm:$0xff] }
 0x252   : > { %3536 = vmatpush.bf16.msrb.mxu1 %v11188_v14 }
 0x253   : > { %3562 = vmatpush.bf16.msrb.mxu3 %v11190_v52 }
 0x254   : > { %3524 = vmatpush.bf16.msrb.mxu0 %v11191_v31  ;;  %v3318_v18 = vpop.f32.mrf.mxu0  ;;  %v11219_v31 = vld [vmem:[#allocation197_spill] sm:$0xff] }
 0x255   : > { %3550 = vmatpush.bf16.msrb.mxu2 %v11193_v22  ;;  %v3319_v16 = vadd.f32 %v3318_v18, %v3306_v29  ;;  %v11221_v22 = vld [vmem:[#allocation199_spill] sm:$0xff]  ;;  %v11232_v18 = vld [vmem:[#allocation210_spill] sm:$0xff] }
 0x256   : > { %3537 = vmatpush.bf16.msrb.mxu1 %v11192_v41  ;;  %v3331_v17 = vpop.f32.mrf.mxu1  ;;  %v11220_v41 = vld [vmem:[#allocation198_spill] sm:$0xff] }
 0x257   : > { %3563 = vmatpush.bf16.msrb.mxu3 %v11194_v47  ;;  %3525 = vmatmul.bf16.vlgmr.msrb.gmra.mxu0 %v9870_v7  ;;  %v10070_v25 = vadd.f32 %v3331_v17, %v3319_v16  ;;  %v11222_v47 = vld [vmem:[#allocation200_spill] sm:$0xff]  ;;  %v11235_v16 = vld [vmem:[#allocation213_spill] sm:$0xff] }
 0x258   : > { %3569 = vmatpush.bf16.msra.mxu0 %v11195_v11  ;;  %3551 = vmatmul.bf16.vlgmr.msrb.gmra.mxu2 %v9893_v4  ;;  %v11223_v11 = vld [vmem:[#allocation201_spill] sm:$0xff] }
 0x259   : > { %3595 = vmatpush.bf16.msra.mxu2 %v11197_v59  ;;  %3538 = vmatmul.bf16.vlgmr.msrb.gmra.mxu1 %v9872_v8  ;;  %v11225_v59 = vld [vmem:[#allocation203_spill] sm:$0xff] }
 0x25a   : > { %3582 = vmatpush.bf16.msra.mxu1 %v11196_v15  ;;  %3564 = vmatmul.bf16.vlgmr.msrb.gmra.mxu3 %v9897_v30  ;;  %v11224_v15 = vld [vmem:[#allocation202_spill] sm:$0xff] }
 0x25b   : > { %3608 = vmatpush.bf16.msra.mxu3 %v11198_v61  ;;  %v10075_v33 = vpop.f32.mrf.mxu2  ;;  %v11226_v61 = vld [vmem:[#allocation204_spill] sm:$0xff] }
 0x25c   : > { %3570 = vmatpush.bf16.msra.mxu0 %v11199_v0  ;;  %v3320_v29 = vpop.f32.mrf.mxu0  ;;  %v11227_v0 = vld [vmem:[#allocation205_spill] sm:$0xff] }
 0x25d   : > { %3596 = vmatpush.bf16.msra.mxu2 %v11201_v54  ;;  %v10078_v45 = vpop.f32.mrf.mxu3  ;;  %v11229_v54 = vld [vmem:[#allocation207_spill] sm:$0xff] }
 0x25e   : > { %3583 = vmatpush.bf16.msra.mxu1 %v11200_v53  ;;  %v3333_v9 = vpop.f32.mrf.mxu1  ;;  %v11228_v53 = vld [vmem:[#allocation206_spill] sm:$0xff]  ;;  %v11241_v29 = vld [vmem:[#allocation219_spill] sm:$0xff] }
 0x25f   : > { %3609 = vmatpush.bf16.msra.mxu3 %v11202_v63  ;;  %v11230_v63 = vld [vmem:[#allocation208_spill] sm:$0xff] }
 0x260   : > { %3571 = vmatpush.bf16.msra.mxu0 %v11203_v37  ;;  %v11231_v37 = vld [vmem:[#allocation209_spill] sm:$0xff] }
 0x261   : > { %3597 = vmatpush.bf16.msra.mxu2 %v11205_v12  ;;  %v11234_v12 = vld [vmem:[#allocation212_spill] sm:$0xff] }
 0x262   : > { %3584 = vmatpush.bf16.msra.mxu1 %v11204_v3  ;;  %v11233_v3 = vld [vmem:[#allocation211_spill] sm:$0xff] }
 0x263   : > { %3610 = vmatpush.bf16.msra.mxu3 %v11206_v21  ;;  %v3346_v14 = vpop.f32.mrf.mxu2  ;;  %v11236_v21 = vld [vmem:[#allocation214_spill] sm:$0xff] }
 0x264   : > { %3572 = vmatpush.bf16.msra.mxu0 %v11207_v34  ;;  %v11237_v34 = vld [vmem:[#allocation215_spill] sm:$0xff] }
 0x265   : > { %3598 = vmatpush.bf16.msra.mxu2 %v11209_v26  ;;  %v3359_v52 = vpop.f32.mrf.mxu3  ;;  %v11238_v26 = vld [vmem:[#allocation216_spill] sm:$0xff] }
 0x266   : > { %3585 = vmatpush.bf16.msra.mxu1 %v11208_v62  ;;  %v11247_v52 = vld [vmem:[#allocation225_spill] sm:$0xff] }
 0x267   : > { %3611 = vmatpush.bf16.msra.mxu3 %v11210_v38  ;;  %v11239_v38 = vld [vmem:[#allocation217_spill] sm:$0xff] }
 0x268   : > { %3573 = vmatpush.bf16.msra.mxu0 %v11211_v56  ;;  %v11240_v56 = vld [vmem:[#allocation218_spill] sm:$0xff] }
 0x269   : > { %3599 = vmatpush.bf16.msra.mxu2 %v11213_v6  ;;  %v11242_v6 = vld [vmem:[#allocation220_spill] sm:$0xff] }
 0x26a   : > { %3586 = vmatpush.bf16.msra.mxu1 %v11212_v58 }
 0x26b   : > { %3612 = vmatpush.bf16.msra.mxu3 %v11214_v44  ;;  %v11243_v44 = vld [vmem:[#allocation221_spill] sm:$0xff] }
 0x26c   : > { %3574 = vmatpush.bf16.msra.mxu0 %v11215_v13 }
 0x26d   : > { %3600 = vmatpush.bf16.msra.mxu2 %v11217_v23  ;;  %v11245_v23 = vld [vmem:[#allocation223_spill] sm:$0xff] }
 0x26e   : > { %3587 = vmatpush.bf16.msra.mxu1 %v11216_v24  ;;  %v11244_v24 = vld [vmem:[#allocation222_spill] sm:$0xff] }
 0x26f   : > { %3613 = vmatpush.bf16.msra.mxu3 %v11218_v39  ;;  %v11246_v39 = vld [vmem:[#allocation224_spill] sm:$0xff] }
 0x270   : > { %3575 = vmatpush.bf16.msra.mxu0 %v11219_v31  ;;  %v3246_v31 = vld.sshfl [vmem:[#allocation1 + $0x8] sm:$0xff pattern:$0x75316420] }
 0x271   : > { %3601 = vmatpush.bf16.msra.mxu2 %v11221_v22  ;;  %v11249_v22 = vld [vmem:[#allocation227_spill] sm:$0xff] }
 0x272   : > { %3588 = vmatpush.bf16.msra.mxu1 %v11220_v41  ;;  %v11248_v41 = vld [vmem:[#allocation226_spill] sm:$0xff] }
 0x273   : > { %3614 = vmatpush.bf16.msra.mxu3 %v11222_v47 }
 0x274   : > { %3576 = vmatpush.bf16.msra.mxu0 %v11223_v11  ;;  %v3370_v17 = vpop.f32.mrf.mxu0  ;;  %v11250_v11 = vld [vmem:[#allocation228_spill] sm:$0xff] }
 0x275   : > { %3602 = vmatpush.bf16.msra.mxu2 %v11225_v59  ;;  %v3371_v59 = vadd.f32 %v3370_v17, %v3246_v31  ;;  %v11262_v17 = vld [vmem:[#allocation240_spill] sm:$0xff] }
 0x276   : > { %3589 = vmatpush.bf16.msra.mxu1 %v11224_v15  ;;  %v3383_v62 = vpop.f32.mrf.mxu1 }
 0x277   : > { %3615 = vmatpush.bf16.msra.mxu3 %v11226_v61  ;;  %3577 = vmatmul.bf16.vlgmr.msra.gmra.mxu0 %v9828_v50  ;;  %v11251_v61 = vld [vmem:[#allocation229_spill] sm:$0xff] }
 0x278   : > { %3621 = vmatpush.bf16.msrb.mxu0 %v11227_v0  ;;  %3603 = vmatmul.bf16.vlgmr.msra.gmra.mxu2 %v9826_v46  ;;  %v11252_v0 = vld [vmem:[#allocation230_spill] sm:$0xff] }
 0x279   : > { %3647 = vmatpush.bf16.msrb.mxu2 %v11229_v54  ;;  %3590 = vmatmul.bf16.vlgmr.msra.gmra.mxu1 %v9840_v5  ;;  %v11253_v54 = vld [vmem:[#allocation231_spill] sm:$0xff] }
 0x27a   : > { %3634 = vmatpush.bf16.msrb.mxu1 %v11228_v53  ;;  %3616 = vmatmul.bf16.vlgmr.msra.gmra.mxu3 %v9833_v57  ;;  %v3384_v53 = vadd.f32 %v3383_v62, %v3371_v59  ;;  %v11264_v62 = vld [vmem:[#allocation242_spill] sm:$0xff]  ;;  %v11274_v59 = vld [vmem:[#allocation252_spill] sm:$0xff] }
 0x27b   : > { %3660 = vmatpush.bf16.msrb.mxu3 %v11230_v63  ;;  %v3396_v58 = vpop.f32.mrf.mxu2  ;;  %v11254_v63 = vld [vmem:[#allocation232_spill] sm:$0xff] }
 0x27c   : > { %3622 = vmatpush.bf16.msrb.mxu0 %v11231_v37  ;;  %v3372_v13 = vpop.f32.mrf.mxu0  ;;  %v11255_v37 = vld [vmem:[#allocation233_spill] sm:$0xff] }
 0x27d   : > { %3648 = vmatpush.bf16.msrb.mxu2 %v11233_v3  ;;  %v3409_v9 = vpop.f32.mrf.mxu3  ;;  %v11257_v3 = vld [vmem:[#allocation235_spill] sm:$0xff] }
 0x27e   : > { %3635 = vmatpush.bf16.msrb.mxu1 %v11232_v18  ;;  %v3385_v14 = vpop.f32.mrf.mxu1  ;;  %v11256_v18 = vld [vmem:[#allocation234_spill] sm:$0xff] }
 0x27f   : > { %3661 = vmatpush.bf16.msrb.mxu3 %v11234_v12  ;;  %v11258_v12 = vld [vmem:[#allocation236_spill] sm:$0xff] }
 0x280   : > { %3623 = vmatpush.bf16.msrb.mxu0 %v11235_v16  ;;  %v11261_v16 = vld [vmem:[#allocation239_spill] sm:$0xff] }
 0x281   : > { %3649 = vmatpush.bf16.msrb.mxu2 %v11237_v34 }
 0x282   : > { %3636 = vmatpush.bf16.msrb.mxu1 %v11236_v21  ;;  %v11263_v21 = vld [vmem:[#allocation241_spill] sm:$0xff] }
 0x283   : > { %3662 = vmatpush.bf16.msrb.mxu3 %v11238_v26  ;;  %v3398_v47 = vpop.f32.mrf.mxu2  ;;  %v11265_v26 = vld [vmem:[#allocation243_spill] sm:$0xff] }
 0x284   : > { %3624 = vmatpush.bf16.msrb.mxu0 %v11239_v38  ;;  %v11273_v47 = vld [vmem:[#allocation251_spill] sm:$0xff] }
 0x285   : > { %3650 = vmatpush.bf16.msrb.mxu2 %v11241_v29  ;;  %v3411_v15 = vpop.f32.mrf.mxu3  ;;  %v11266_v29 = vld [vmem:[#allocation244_spill] sm:$0xff] }
 0x286   : > { %3637 = vmatpush.bf16.msrb.mxu1 %v11240_v56 }
 0x287   : > { %3663 = vmatpush.bf16.msrb.mxu3 %v11242_v6  ;;  %v11267_v6 = vld [vmem:[#allocation245_spill] sm:$0xff] }
 0x288   : > { %3625 = vmatpush.bf16.msrb.mxu0 %v11243_v44  ;;  %v11269_v44 = vld [vmem:[#allocation247_spill] sm:$0xff] }
 0x289   : > { %3651 = vmatpush.bf16.msrb.mxu2 %v11245_v23  ;;  %v11270_v23 = vld [vmem:[#allocation248_spill] sm:$0xff] }
 0x28a   : > { %3638 = vmatpush.bf16.msrb.mxu1 %v11244_v24  ;;  %v3345_v24 = vadd.f32 %v10075_v33, %v10070_v25  ;;  %v11275_v33 = vld [vmem:[#allocation253_spill] sm:$0xff] }
 0x28b   : > { %3664 = vmatpush.bf16.msrb.mxu3 %v11246_v39 }
 0x28c   : > { %3626 = vmatpush.bf16.msrb.mxu0 %v11247_v52  ;;  %v11271_v52 = vld [vmem:[#allocation249_spill] sm:$0xff]  ;;  %v3358_v15 = vadd.f32 %v10078_v45, %v3345_v24  ;;  %v11281_v45 = vld [vmem:[#allocation259_spill] sm:$0xff] }
 0x28d   : > { %3652 = vmatpush.bf16.msrb.mxu2 %v11249_v22  ;;  %v11272_v22 = vld [vmem:[#allocation250_spill] sm:$0xff] }
 0x28e   : > { %3639 = vmatpush.bf16.msrb.mxu1 %v11248_v41 }
 0x28f   : > { %3665 = vmatpush.bf16.msrb.mxu3 %v11250_v11 }
 0x290   : > { %3627 = vmatpush.bf16.msrb.mxu0 %v11251_v61 }
 0x291   : > { %3653 = vmatpush.bf16.msrb.mxu2 %v11252_v0  ;;  %v11276_v0 = vld [vmem:[#allocation254_spill] sm:$0xff] }
 0x292   : > { %3640 = vmatpush.bf16.msrb.mxu1 %v8533_v40  ;;  %v3397_v40 = vadd.f32 %v3396_v58, %v3384_v53  ;;  %v11277_v53 = vld [vmem:[#allocation255_spill] sm:$0xff] }
 0x293   : > { %3666 = vmatpush.bf16.msrb.mxu3 %v8547_v51 }
 0x294   : > { %3628 = vmatpush.bf16.msrb.mxu0 %v8569_v42  ;;  %v3410_v51 = vadd.f32 %v3409_v9, %v3397_v40  ;;  %v11260_v42 = vld [vmem:[#allocation238_spill] sm:$0xff]  ;;  %v3422_v34 = vpop.f32.mrf.mxu0  ;;  %v11282_v40 = vld [vmem:[#allocation260_spill] sm:$0xff] }
 0x295   : > { %3654 = vmatpush.bf16.msrb.mxu2 %v11253_v54  ;;  %v11268_v9 = vld [vmem:[#allocation246_spill] sm:$0xff] }
 0x296   : > { %3641 = vmatpush.bf16.msrb.mxu1 %v8582_v28  ;;  %v11259_v28 = vld [vmem:[#allocation237_spill] sm:$0xff]  ;;  %v3423_v38 = vadd.f32 %v3422_v34, %v3410_v51  ;;  %v3435_v56 = vpop.f32.mrf.mxu1  ;;  %v11285_v51 = vld [vmem:[#allocation263_spill] sm:$0xff]  ;;  %v11290_v34 = vld [vmem:[#allocation268_spill] sm:$0xff] }
 0x297   : > { %3667 = vmatpush.bf16.msrb.mxu3 %v11254_v63  ;;  %3629 = vmatmul.bf16.vlgmr.msrb.gmra.mxu0 %v9870_v7  ;;  %v11278_v63 = vld [vmem:[#allocation256_spill] sm:$0xff] }
 0x298   : > { %3673 = vmatpush.bf16.msra.mxu0 %v11255_v37  ;;  %3655 = vmatmul.bf16.vlgmr.msrb.gmra.mxu2 %v9893_v4  ;;  %v3436_v58 = vadd.f32 %v3435_v56, %v3423_v38  ;;  %v11293_v38 = vld [vmem:[#allocation271_spill] sm:$0xff]  ;;  %v11294_v56 = vld [vmem:[#allocation272_spill] sm:$0xff] }
 0x299   : > { %3699 = vmatpush.bf16.msra.mxu2 %v11257_v3  ;;  %3642 = vmatmul.bf16.vlgmr.msrb.gmra.mxu1 %v9872_v8  ;;  %v11280_v3 = vld [vmem:[#allocation258_spill] sm:$0xff] }
 0x29a   : > { %3686 = vmatpush.bf16.msra.mxu1 %v11256_v18  ;;  %3668 = vmatmul.bf16.vlgmr.msrb.gmra.mxu3 %v9897_v30  ;;  %v11279_v18 = vld [vmem:[#allocation257_spill] sm:$0xff] }
 0x29b   : > { %3712 = vmatpush.bf16.msra.mxu3 %v11258_v12  ;;  %v3448_v13 = vpop.f32.mrf.mxu2  ;;  %v11283_v12 = vld [vmem:[#allocation261_spill] sm:$0xff] }
 0x29c   : > { %3674 = vmatpush.bf16.msra.mxu0 %v11259_v28  ;;  %v3449_v14 = vadd.f32 %v3448_v13, %v3436_v58  ;;  %v3424_v41 = vpop.f32.mrf.mxu0  ;;  %v11284_v28 = vld [vmem:[#allocation262_spill] sm:$0xff]  ;;  %v11295_v58 = vld [vmem:[#allocation273_spill] sm:$0xff] }
 0x29d   : > { %3700 = vmatpush.bf16.msra.mxu2 %v11261_v16  ;;  %v3461_v39 = vpop.f32.mrf.mxu3  ;;  %v11287_v16 = vld [vmem:[#allocation265_spill] sm:$0xff] }
 0x29e   : > { %3687 = vmatpush.bf16.msra.mxu1 %v11260_v42  ;;  %v3462_v31 = vadd.f32 %v3461_v39, %v3449_v14  ;;  %v3437_v11 = vpop.f32.mrf.mxu1  ;;  %v11286_v42 = vld [vmem:[#allocation264_spill] sm:$0xff]  ;;  %v11299_v39 = vld [vmem:[#allocation277_spill] sm:$0xff] }
 0x29f   : > { %3713 = vmatpush.bf16.msra.mxu3 %v11262_v17  ;;  %v11288_v17 = vld [vmem:[#allocation266_spill] sm:$0xff] }
 0x2a0   : > { %3675 = vmatpush.bf16.msra.mxu0 %v11263_v21  ;;  %v3887_v61 = vrot.slane %v3462_v31, 4  ;;  %v11289_v21 = vld [vmem:[#allocation267_spill] sm:$0xff] }
 0x2a1   : > { %3701 = vmatpush.bf16.msra.mxu2 %v11265_v26  ;;  %v11292_v26 = vld [vmem:[#allocation270_spill] sm:$0xff]  ;;  %v11301_v31 = vld [vmem:[#allocation279_spill] sm:$0xff] }
 0x2a2   : > { %3688 = vmatpush.bf16.msra.mxu1 %v11264_v62  ;;  %v3890_v25 = vsel %vm3206_vm0, %v3358_v15, %v3887_v61  ;;  %v11291_v62 = vld [vmem:[#allocation269_spill] sm:$0xff] }
 0x2a3   : > { %3714 = vmatpush.bf16.msra.mxu3 %v11266_v29  ;;  %5563 = vst [vmem:[%s8839_s6 + $0x18] sm:$0xff] %v3890_v25  ;;  %v3450_v54 = vpop.f32.mrf.mxu2  ;;  %v3247_v29 = vld.sshfl [vmem:[#allocation1 + $0x10] sm:$0xff pattern:$0x75316420]  ;;  %v11303_v15 = vld [vmem:[#allocation281_spill] sm:$0xff] }
 0x2a4   : > { %3676 = vmatpush.bf16.msra.mxu0 %v11267_v6  ;;  %v11304_v25 = vld [vmem:[#allocation282_spill] sm:$0xff]  ;;  %v11307_v54 = vld [vmem:[#allocation285_spill] sm:$0xff] }
 0x2a5   : > { %3702 = vmatpush.bf16.msra.mxu2 %v11269_v44  ;;  %v3463_v37 = vpop.f32.mrf.mxu3  ;;  %v11297_v44 = vld [vmem:[#allocation275_spill] sm:$0xff] }
 0x2a6   : > { %3689 = vmatpush.bf16.msra.mxu1 %v11268_v9  ;;  %v11296_v9 = vld [vmem:[#allocation274_spill] sm:$0xff]  ;;  %v11309_v37 = vld [vmem:[#allocation287_spill] sm:$0xff] }
 0x2a7   : > { %3715 = vmatpush.bf16.msra.mxu3 %v11270_v23  ;;  %v11298_v23 = vld [vmem:[#allocation276_spill] sm:$0xff] }
 0x2a8   : > { %3677 = vmatpush.bf16.msra.mxu0 %v11271_v52  ;;  %v11300_v52 = vld [vmem:[#allocation278_spill] sm:$0xff] }
 0x2a9   : > { %3703 = vmatpush.bf16.msra.mxu2 %v11273_v47 }
 0x2aa   : > { %3690 = vmatpush.bf16.msra.mxu1 %v11272_v22  ;;  %v11302_v22 = vld [vmem:[#allocation280_spill] sm:$0xff] }
 0x2ab   : > { %3716 = vmatpush.bf16.msra.mxu3 %v11274_v59 }
 0x2ac   : > { %3678 = vmatpush.bf16.msra.mxu0 %v11275_v33  ;;  %v11305_v33 = vld [vmem:[#allocation283_spill] sm:$0xff] }
 0x2ad   : > { %3704 = vmatpush.bf16.msra.mxu2 %v11277_v53  ;;  %v11306_v53 = vld [vmem:[#allocation284_spill] sm:$0xff] }
 0x2ae   : > { %3691 = vmatpush.bf16.msra.mxu1 %v11276_v0 }
 0x2af   : > { %3717 = vmatpush.bf16.msra.mxu3 %v11278_v63  ;;  %v11308_v63 = vld [vmem:[#allocation286_spill] sm:$0xff] }
 0x2b0   : > { %3679 = vmatpush.bf16.msra.mxu0 %v11279_v18 }
 0x2b1   : > { %3705 = vmatpush.bf16.msra.mxu2 %v11281_v45 }
 0x2b2   : > { %3692 = vmatpush.bf16.msra.mxu1 %v11280_v3  ;;  %v11310_v3 = vld [vmem:[#allocation288_spill] sm:$0xff] }
 0x2b3   : > { %3718 = vmatpush.bf16.msra.mxu3 %v11282_v40  ;;  %v11311_v40 = vld [vmem:[#allocation289_spill] sm:$0xff] }
 0x2b4   : > { %3680 = vmatpush.bf16.msra.mxu0 %v11283_v12  ;;  %v3474_v6 = vpop.f32.mrf.mxu0  ;;  %v11312_v12 = vld [vmem:[#allocation290_spill] sm:$0xff] }
 0x2b5   : > { %3706 = vmatpush.bf16.msra.mxu2 %v11285_v51  ;;  %v3475_v13 = vadd.f32 %v3474_v6, %v3247_v29  ;;  %v11314_v51 = vld [vmem:[#allocation292_spill] sm:$0xff]  ;;  %v11324_v29 = vld [vmem:[#allocation302_spill] sm:$0xff] }
 0x2b6   : > { %3693 = vmatpush.bf16.msra.mxu1 %v11284_v28  ;;  %v3487_v24 = vpop.f32.mrf.mxu1  ;;  %v11313_v28 = vld [vmem:[#allocation291_spill] sm:$0xff]  ;;  %v11326_v6 = vld [vmem:[#allocation304_spill] sm:$0xff] }
 0x2b7   : > { %3719 = vmatpush.bf16.msra.mxu3 %v11286_v42  ;;  %3681 = vmatmul.bf16.vlgmr.msra.gmra.mxu0 %v9828_v50  ;;  %v3488_v14 = vadd.f32 %v3487_v24, %v3475_v13  ;;  %v11315_v42 = vld [vmem:[#allocation293_spill] sm:$0xff]  ;;  %v11328_v13 = vld [vmem:[#allocation306_spill] sm:$0xff]  ;;  %v11329_v24 = vld [vmem:[#allocation307_spill] sm:$0xff] }
 0x2b8   : > { %3725 = vmatpush.bf16.msrb.mxu0 %v11287_v16  ;;  %3707 = vmatmul.bf16.vlgmr.msra.gmra.mxu2 %v9826_v46  ;;  %v11316_v16 = vld [vmem:[#allocation294_spill] sm:$0xff] }
 0x2b9   : > { %3751 = vmatpush.bf16.msrb.mxu2 %v11289_v21  ;;  %3694 = vmatmul.bf16.vlgmr.msra.gmra.mxu1 %v9840_v5  ;;  %v11318_v21 = vld [vmem:[#allocation296_spill] sm:$0xff] }
 0x2ba   : > { %3738 = vmatpush.bf16.msrb.mxu1 %v11288_v17  ;;  %3720 = vmatmul.bf16.vlgmr.msra.gmra.mxu3 %v9833_v57  ;;  %v11317_v17 = vld [vmem:[#allocation295_spill] sm:$0xff] }
 0x2bb   : > { %3764 = vmatpush.bf16.msrb.mxu3 %v11290_v34  ;;  %v3500_v41 = vpop.f32.mrf.mxu2  ;;  %v11319_v34 = vld [vmem:[#allocation297_spill] sm:$0xff] }
 0x2bc   : > { %3726 = vmatpush.bf16.msrb.mxu0 %v11291_v62  ;;  %v3501_v47 = vadd.f32 %v3500_v41, %v3488_v14  ;;  %v3476_v61 = vpop.f32.mrf.mxu0  ;;  %v11320_v62 = vld [vmem:[#allocation298_spill] sm:$0xff] }
 0x2bd   : > { %3752 = vmatpush.bf16.msrb.mxu2 %v11293_v38  ;;  %v3513_v11 = vpop.f32.mrf.mxu3  ;;  %v11322_v38 = vld [vmem:[#allocation300_spill] sm:$0xff]  ;;  %v11332_v41 = vld [vmem:[#allocation310_spill] sm:$0xff]  ;;  %v11335_v61 = vld [vmem:[#allocation313_spill] sm:$0xff] }
 0x2be   : > { %3739 = vmatpush.bf16.msrb.mxu1 %v11292_v26  ;;  %v3514_v59 = vadd.f32 %v3513_v11, %v3501_v47  ;;  %v3489_v0 = vpop.f32.mrf.mxu1  ;;  %v11321_v26 = vld [vmem:[#allocation299_spill] sm:$0xff]  ;;  %v11334_v11 = vld [vmem:[#allocation312_spill] sm:$0xff] }
 0x2bf   : > { %3765 = vmatpush.bf16.msrb.mxu3 %v11294_v56  ;;  %v11323_v56 = vld [vmem:[#allocation301_spill] sm:$0xff] }
 0x2c0   : > { %3727 = vmatpush.bf16.msrb.mxu0 %v11295_v58  ;;  %v11325_v58 = vld [vmem:[#allocation303_spill] sm:$0xff] }
 0x2c1   : > { %3753 = vmatpush.bf16.msrb.mxu2 %v11297_v44 }
 0x2c2   : > { %3740 = vmatpush.bf16.msrb.mxu1 %v11296_v9  ;;  %v11327_v9 = vld [vmem:[#allocation305_spill] sm:$0xff] }
 0x2c3   : > { %3766 = vmatpush.bf16.msrb.mxu3 %v11298_v23  ;;  %v3502_v18 = vpop.f32.mrf.mxu2 }
 0x2c4   : > { %3728 = vmatpush.bf16.msrb.mxu0 %v11299_v39  ;;  %v11330_v39 = vld [vmem:[#allocation308_spill] sm:$0xff] }
 0x2c5   : > { %3754 = vmatpush.bf16.msrb.mxu2 %v11301_v31  ;;  %v3515_v45 = vpop.f32.mrf.mxu3  ;;  %v11331_v31 = vld [vmem:[#allocation309_spill] sm:$0xff] }
 0x2c6   : > { %3741 = vmatpush.bf16.msrb.mxu1 %v11300_v52 }
 0x2c7   : > { %3767 = vmatpush.bf16.msrb.mxu3 %v11302_v22  ;;  %v11333_v22 = vld [vmem:[#allocation311_spill] sm:$0xff] }
 0x2c8   : > { %3729 = vmatpush.bf16.msrb.mxu0 %v11303_v15 }
 0x2c9   : > { %3755 = vmatpush.bf16.msrb.mxu2 %v11305_v33  ;;  %v11337_v33 = vld [vmem:[#allocation315_spill] sm:$0xff] }
 0x2ca   : > { %3742 = vmatpush.bf16.msrb.mxu1 %v11304_v25  ;;  %v11336_v25 = vld [vmem:[#allocation314_spill] sm:$0xff] }
 0x2cb   : > { %3768 = vmatpush.bf16.msrb.mxu3 %v11306_v53  ;;  %v11338_v53 = vld [vmem:[#allocation316_spill] sm:$0xff] }
 0x2cc   : > { %3730 = vmatpush.bf16.msrb.mxu0 %v11307_v54  ;;  %v11339_v54 = vld [vmem:[#allocation317_spill] sm:$0xff] }
 0x2cd   : > { %3756 = vmatpush.bf16.msrb.mxu2 %v11309_v37  ;;  %v11341_v37 = vld [vmem:[#allocation319_spill] sm:$0xff] }
 0x2ce   : > { %3743 = vmatpush.bf16.msrb.mxu1 %v11308_v63  ;;  %v11340_v63 = vld [vmem:[#allocation318_spill] sm:$0xff] }
 0x2cf   : > { %3769 = vmatpush.bf16.msrb.mxu3 %v11310_v3  ;;  %v11342_v3 = vld [vmem:[#allocation320_spill] sm:$0xff] }
 0x2d0   : > { %3731 = vmatpush.bf16.msrb.mxu0 %v11311_v40  ;;  %v11343_v40 = vld [vmem:[#allocation321_spill] sm:$0xff] }
 0x2d1   : > { %3757 = vmatpush.bf16.msrb.mxu2 %v11313_v28  ;;  %v11345_v28 = vld [vmem:[#allocation323_spill] sm:$0xff] }
 0x2d2   : > { %3744 = vmatpush.bf16.msrb.mxu1 %v11312_v12  ;;  %v11344_v12 = vld [vmem:[#allocation322_spill] sm:$0xff] }
 0x2d3   : > { %3770 = vmatpush.bf16.msrb.mxu3 %v11314_v51  ;;  %v11346_v51 = vld [vmem:[#allocation324_spill] sm:$0xff] }
 0x2d4   : > { %3732 = vmatpush.bf16.msrb.mxu0 %v11315_v42  ;;  %v3526_v44 = vpop.f32.mrf.mxu0  ;;  %v11347_v42 = vld [vmem:[#allocation325_spill] sm:$0xff] }
 0x2d5   : > { %3758 = vmatpush.bf16.msrb.mxu2 %v11317_v17  ;;  %v3527_v23 = vadd.f32 %v3526_v44, %v3514_v59  ;;  %v11349_v17 = vld [vmem:[#allocation327_spill] sm:$0xff]  ;;  %v11363_v44 = vld [vmem:[#allocation341_spill] sm:$0xff] }
 0x2d6   : > { %3745 = vmatpush.bf16.msrb.mxu1 %v11316_v16  ;;  %v3539_v14 = vpop.f32.mrf.mxu1  ;;  %v11348_v16 = vld [vmem:[#allocation326_spill] sm:$0xff] }
 0x2d7   : > { %3771 = vmatpush.bf16.msrb.mxu3 %v11318_v21  ;;  %3733 = vmatmul.bf16.vlgmr.msrb.gmra.mxu0 %v9870_v7  ;;  %v10225_v52 = vadd.f32 %v3539_v14, %v3527_v23  ;;  %v11350_v21 = vld [vmem:[#allocation328_spill] sm:$0xff]  ;;  %v11365_v23 = vld [vmem:[#allocation343_spill] sm:$0xff] }
 0x2d8   : > { %3777 = vmatpush.bf16.msra.mxu0 %v11319_v34  ;;  %3759 = vmatmul.bf16.vlgmr.msrb.gmra.mxu2 %v9893_v4  ;;  %v11355_v34 = vld [vmem:[#allocation333_spill] sm:$0xff]  ;;  %v3248_v14 = vld.sshfl [vmem:[#allocation1 + $0x18] sm:$0xff pattern:$0x75316420] }
 0x2d9   : > { %3803 = vmatpush.bf16.msra.mxu2 %v11321_v26  ;;  %3746 = vmatmul.bf16.vlgmr.msrb.gmra.mxu1 %v9872_v8  ;;  %v11356_v26 = vld [vmem:[#allocation334_spill] sm:$0xff] }
 0x2da   : > { %3790 = vmatpush.bf16.msra.mxu1 %v11320_v62  ;;  %3772 = vmatmul.bf16.vlgmr.msrb.gmra.mxu3 %v9897_v30 }
 0x2db   : > { %3816 = vmatpush.bf16.msra.mxu3 %v11322_v38  ;;  %v10230_v47 = vpop.f32.mrf.mxu2  ;;  %v11358_v38 = vld [vmem:[#allocation336_spill] sm:$0xff] }
 0x2dc   : > { %3778 = vmatpush.bf16.msra.mxu0 %v11323_v56  ;;  %v3528_v59 = vpop.f32.mrf.mxu0  ;;  %v11360_v56 = vld [vmem:[#allocation338_spill] sm:$0xff] }
 0x2dd   : > { %3804 = vmatpush.bf16.msra.mxu2 %v11325_v58  ;;  %v10233_v15 = vpop.f32.mrf.mxu3  ;;  %v11362_v58 = vld [vmem:[#allocation340_spill] sm:$0xff] }
 0x2de   : > { %3791 = vmatpush.bf16.msra.mxu1 %v11324_v29  ;;  %v3541_v0 = vpop.f32.mrf.mxu1 }
 0x2df   : > { %3817 = vmatpush.bf16.msra.mxu3 %v11326_v6 }
 0x2e0   : > { %3779 = vmatpush.bf16.msra.mxu0 %v11327_v9 }
 0x2e1   : > { %3805 = vmatpush.bf16.msra.mxu2 %v11329_v24 }
 0x2e2   : > { %3792 = vmatpush.bf16.msra.mxu1 %v11328_v13  ;;  %v11364_v13 = vld [vmem:[#allocation342_spill] sm:$0xff] }
 0x2e3   : > { %3818 = vmatpush.bf16.msra.mxu3 %v11330_v39  ;;  %v3554_v18 = vpop.f32.mrf.mxu2  ;;  %v11366_v39 = vld [vmem:[#allocation344_spill] sm:$0xff] }
 0x2e4   : > { %3780 = vmatpush.bf16.msra.mxu0 %v11331_v31  ;;  %v11367_v31 = vld [vmem:[#allocation345_spill] sm:$0xff] }
 0x2e5   : > { %3806 = vmatpush.bf16.msra.mxu2 %v11333_v22  ;;  %v3567_v45 = vpop.f32.mrf.mxu3  ;;  %v11368_v22 = vld [vmem:[#allocation346_spill] sm:$0xff] }
 0x2e6   : > { %3793 = vmatpush.bf16.msra.mxu1 %v11332_v41 }
 0x2e7   : > { %3819 = vmatpush.bf16.msra.mxu3 %v11334_v11 }
 0x2e8   : > { %3781 = vmatpush.bf16.msra.mxu0 %v11335_v61 }
 0x2e9   : > { %3807 = vmatpush.bf16.msra.mxu2 %v11337_v33 }
 0x2ea   : > { %3794 = vmatpush.bf16.msra.mxu1 %v11336_v25 }
 0x2eb   : > { %3820 = vmatpush.bf16.msra.mxu3 %v11338_v53 }
 0x2ec   : > { %3782 = vmatpush.bf16.msra.mxu0 %v11339_v54  ;;  %v3249_v54 = vld.sshfl [vmem:[#allocation1 + $0x20] sm:$0xff pattern:$0x75316420] }
 0x2ed   : > { %3808 = vmatpush.bf16.msra.mxu2 %v11341_v37 }
 0x2ee   : > { %3795 = vmatpush.bf16.msra.mxu1 %v11340_v63 }
 0x2ef   : > { %3821 = vmatpush.bf16.msra.mxu3 %v11342_v3 }
 0x2f0   : > { %3783 = vmatpush.bf16.msra.mxu0 %v11343_v40 }
 0x2f1   : > { %3809 = vmatpush.bf16.msra.mxu2 %v11345_v28 }
 0x2f2   : > { %3796 = vmatpush.bf16.msra.mxu1 %v11344_v12 }
 0x2f3   : > { %3822 = vmatpush.bf16.msra.mxu3 %v9472_v36  ;;  %v11351_v36 = vld [vmem:[#allocation329_spill] sm:$0xff] }
 0x2f4   : > { %3784 = vmatpush.bf16.msra.mxu0 %v9493_v1  ;;  %v11354_v1 = vld [vmem:[#allocation332_spill] sm:$0xff]  ;;  %v3578_v62 = vpop.f32.mrf.mxu0 }
 0x2f5   : > { %3810 = vmatpush.bf16.msra.mxu2 %v9504_v55  ;;  %v11353_v55 = vld [vmem:[#allocation331_spill] sm:$0xff] }
 0x2f6   : > { %3797 = vmatpush.bf16.msra.mxu1 %v9502_v27  ;;  %v11352_v27 = vld [vmem:[#allocation330_spill] sm:$0xff] }
 0x2f7   : > { %3823 = vmatpush.bf16.msra.mxu3 %v11346_v51  ;;  %3785 = vmatmul.bf16.vlgmr.msra.gmra.mxu0 %v9828_v50  ;;  %v11359_v50 = vld [vmem:[#allocation337_spill] sm:$0xff] }
 0x2f8   : > { %3829 = vmatpush.bf16.msrb.mxu0 %v11347_v42  ;;  %3811 = vmatmul.bf16.vlgmr.msra.gmra.mxu2 %v9826_v46  ;;  %v11357_v46 = vld [vmem:[#allocation335_spill] sm:$0xff] }
 0x2f9   : > { %3855 = vmatpush.bf16.msrb.mxu2 %v11349_v17  ;;  %3798 = vmatmul.bf16.vlgmr.msra.gmra.mxu1 %v9840_v5  ;;  %v11361_v5 = vld [vmem:[#allocation339_spill] sm:$0xff] }
 0x2fa   : > { %3842 = vmatpush.bf16.msrb.mxu1 %v11348_v16  ;;  %3824 = vmatmul.bf16.vlgmr.msra.gmra.mxu3 %v9833_v57  ;;  %v3591_v57 = vpop.f32.mrf.mxu1 }
 0x2fb   : > { %3868 = vmatpush.bf16.msrb.mxu3 %v11350_v21  ;;  %v3604_v29 = vpop.f32.mrf.mxu2 }
 0x2fc   : > { %3830 = vmatpush.bf16.msrb.mxu0 %v11351_v36  ;;  %v3580_v9 = vpop.f32.mrf.mxu0 }
 0x2fd   : > { %3856 = vmatpush.bf16.msrb.mxu2 %v11353_v55  ;;  %v3617_v6 = vpop.f32.mrf.mxu3 }
 0x2fe   : > { %3843 = vmatpush.bf16.msrb.mxu1 %v11352_v27 }
 0x2ff   : > { %3869 = vmatpush.bf16.msrb.mxu3 %v11354_v1 }
 0x300   : > { %3831 = vmatpush.bf16.msrb.mxu0 %v11355_v34 }
 0x301   : > { %3857 = vmatpush.bf16.msrb.mxu2 %v11357_v46 }
 0x302   : > { %3844 = vmatpush.bf16.msrb.mxu1 %v11356_v26  ;;  %v3593_v24 = vpop.f32.mrf.mxu1 }
 0x303   : > { %3870 = vmatpush.bf16.msrb.mxu3 %v11358_v38  ;;  %v3606_v41 = vpop.f32.mrf.mxu2 }
 0x304   : > { %3832 = vmatpush.bf16.msrb.mxu0 %v11359_v50 }
 0x305   : > { %3858 = vmatpush.bf16.msrb.mxu2 %v11361_v5  ;;  %v3619_v11 = vpop.f32.mrf.mxu3  ;;  %v3250_v5 = vld.sshfl [vmem:[#allocation1 + $0x28] sm:$0xff pattern:$0x75316420] }
 0x306   : > { %3845 = vmatpush.bf16.msrb.mxu1 %v11360_v56 }
 0x307   : > { %3871 = vmatpush.bf16.msrb.mxu3 %v11362_v58 }
 0x308   : > { %3833 = vmatpush.bf16.msrb.mxu0 %v9668_v49  ;;  %v3579_v49 = vadd.f32 %v3578_v62, %v3248_v14 }
 0x309   : > { %3859 = vmatpush.bf16.msrb.mxu2 %v11364_v13 }
 0x30a   : > { %3846 = vmatpush.bf16.msrb.mxu1 %v11363_v44  ;;  %v3592_v61 = vadd.f32 %v3591_v57, %v3579_v49 }
 0x30b   : > { %3872 = vmatpush.bf16.msrb.mxu3 %v11365_v23 }
 0x30c   : > { %3834 = vmatpush.bf16.msrb.mxu0 %v9706_v20  ;;  %v3605_v20 = vadd.f32 %v3604_v29, %v3592_v61 }
 0x30d   : > { %3860 = vmatpush.bf16.msrb.mxu2 %v11367_v31 }
 0x30e   : > { %3847 = vmatpush.bf16.msrb.mxu1 %v11366_v39 }
 0x30f   : > { %3873 = vmatpush.bf16.msrb.mxu3 %v11368_v22 }
 0x310   : > { %3835 = vmatpush.bf16.msrb.mxu0 %v9742_v60 }
 0x311   : > { %3861 = vmatpush.bf16.msrb.mxu2 %v9748_v32 }
 0x312   : > { %3848 = vmatpush.bf16.msrb.mxu1 %v9746_v43 }
 0x313   : > { %3874 = vmatpush.bf16.msrb.mxu3 %v9760_v2  ;;  %v3618_v2 = vadd.f32 %v3617_v6, %v3605_v20 }
 0x314   : > { %3836 = vmatpush.bf16.msrb.mxu0 %v9780_v10  ;;  %v3630_v32 = vpop.f32.mrf.mxu0 }
 0x315   : > { %3862 = vmatpush.bf16.msrb.mxu2 %v9786_v35  ;;  %v3631_v60 = vadd.f32 %v3630_v32, %v3618_v2  ;;  %v3553_v35 = vadd.f32 %v10230_v47, %v10225_v52 }
 0x316   : > { %3849 = vmatpush.bf16.msrb.mxu1 %v9784_v19  ;;  %v3643_v10 = vpop.f32.mrf.mxu1 }
 0x317   : > { %3875 = vmatpush.bf16.msrb.mxu3 %v9789_v48  ;;  %3837 = vmatmul.bf16.vlgmr.msrb.gmra.mxu0 %v9870_v7  ;;  %v3644_v43 = vadd.f32 %v3643_v10, %v3631_v60 }
 0x318   : > { %3863 = vmatmul.bf16.vlgmr.msrb.gmra.mxu2 %v9893_v4 }
 0x319   : > { %3850 = vmatmul.bf16.vlgmr.msrb.gmra.mxu1 %v9872_v8  ;;  %v3566_v8 = vadd.f32 %v10233_v15, %v3553_v35 }
 0x31a   : > { %3876 = vmatmul.bf16.vlgmr.msrb.gmra.mxu3 %v9897_v30 }
 0x31b   : > { %v3656_v19 = vpop.f32.mrf.mxu2 }
 0x31c   : > { %v3657_v48 = vadd.f32 %v3656_v19, %v3644_v43  ;;  %v3632_v7 = vpop.f32.mrf.mxu0 }
 0x31d   : > { %v3669_v59 = vpop.f32.mrf.mxu3 }
 0x31e   : > { %v3670_v25 = vadd.f32 %v3669_v59, %v3657_v48  ;;  %v3645_v33 = vpop.f32.mrf.mxu1 }
 0x320   : > { %v3888_v4 = vrot.slane %v3670_v25, 4 }
 0x322   : > { %v3891_v30 = vsel %vm3206_vm0, %v3566_v8, %v3888_v4 }
 0x323   : > { %5564 = vst [vmem:[%s8839_s6 + $0x20] sm:$0xff] %v3891_v30  ;;  %v3658_v0 = vpop.f32.mrf.mxu2 }
 0x325   : > { %v3671_v53 = vpop.f32.mrf.mxu3 }
 0x334   : > { %v3682_v63 = vpop.f32.mrf.mxu0 }
 0x335   : > { %v3683_v37 = vadd.f32 %v3682_v63, %v3249_v54 }
 0x336   : > { %v3695_v18 = vpop.f32.mrf.mxu1 }
 0x337   : > { %v3696_v3 = vadd.f32 %v3695_v18, %v3683_v37 }
 0x33b   : > { %v3708_v45 = vpop.f32.mrf.mxu2 }
 0x33c   : > { %v3709_v52 = vadd.f32 %v3708_v45, %v3696_v3  ;;  %v3684_v12 = vpop.f32.mrf.mxu0 }
 0x33d   : > { %v3721_v47 = vpop.f32.mrf.mxu3 }
 0x33e   : > { %v3722_v40 = vadd.f32 %v3721_v47, %v3709_v52  ;;  %v3697_v28 = vpop.f32.mrf.mxu1 }
 0x343   : > { %v3710_v51 = vpop.f32.mrf.mxu2 }
 0x345   : > { %v3723_v42 = vpop.f32.mrf.mxu3 }
 0x354   : > { %v3734_v15 = vpop.f32.mrf.mxu0 }
 0x355   : > { %v3735_v16 = vadd.f32 %v3734_v15, %v3722_v40 }
 0x356   : > { %v3747_v17 = vpop.f32.mrf.mxu1 }
 0x357   : > { %v3748_v21 = vadd.f32 %v3747_v17, %v3735_v16 }
 0x35b   : > { %v3760_v36 = vpop.f32.mrf.mxu2 }
 0x35c   : > { %v3736_v55 = vpop.f32.mrf.mxu0  ;;  %v3761_v41 = vadd.f32 %v3760_v36, %v3748_v21 }
 0x35d   : > { %v3773_v27 = vpop.f32.mrf.mxu3 }
 0x35e   : > { %v3749_v1 = vpop.f32.mrf.mxu1  ;;  %v3774_v2 = vadd.f32 %v3773_v27, %v3761_v41 }
 0x363   : > { %v3762_v34 = vpop.f32.mrf.mxu2 }
 0x365   : > { %v3775_v62 = vpop.f32.mrf.mxu3 }
 0x374   : > { %v3786_v26 = vpop.f32.mrf.mxu0 }
 0x375   : > { %v3787_v6 = vadd.f32 %v3786_v26, %v3250_v5 }
 0x376   : > { %v3799_v46 = vpop.f32.mrf.mxu1 }
 0x377   : > { %v3800_v9 = vadd.f32 %v3799_v46, %v3787_v6 }
 0x37b   : > { %v3812_v57 = vpop.f32.mrf.mxu2 }
 0x37c   : > { %v3788_v50 = vpop.f32.mrf.mxu0  ;;  %v3813_v44 = vadd.f32 %v3812_v57, %v3800_v9 }
 0x37d   : > { %v3825_v38 = vpop.f32.mrf.mxu3 }
 0x37e   : > { %v3801_v56 = vpop.f32.mrf.mxu1  ;;  %v3826_v13 = vadd.f32 %v3825_v38, %v3813_v44 }
 0x383   : > { %v3814_v29 = vpop.f32.mrf.mxu2 }
 0x385   : > { %v3827_v58 = vpop.f32.mrf.mxu3 }
 0x394   : > { %v3838_v24 = vpop.f32.mrf.mxu0 }
 0x395   : > { %v3839_v14 = vadd.f32 %v3838_v24, %v3826_v13 }
 0x396   : > { %v3851_v23 = vpop.f32.mrf.mxu1 }
 0x397   : > { %v3852_v39 = vadd.f32 %v3851_v23, %v3839_v14 }
 0x39b   : > { %v3864_v31 = vpop.f32.mrf.mxu2 }
 0x39c   : > { %v3865_v22 = vadd.f32 %v3864_v31, %v3852_v39  ;;  %v3840_v49 = vpop.f32.mrf.mxu0 }
 0x39d   : > { %v3877_v11 = vpop.f32.mrf.mxu3 }
 0x39e   : > { %v3853_v61 = vpop.f32.mrf.mxu1  ;;  %v3878_v20 = vadd.f32 %v3877_v11, %v3865_v22 }
 0x3a0   : > { %v3889_v32 = vrot.slane %v3878_v20, 4 }
 0x3a2   : > { %v3892_v60 = vsel %vm3206_vm0, %v3774_v2, %v3889_v32 }
 0x3a3   : > { %5565 = vst [vmem:[%s8839_s6 + $0x28] sm:$0xff] %v3892_v60  ;;  %v3866_v10 = vpop.f32.mrf.mxu2 }
 0x3a5   : > { %v3879_v43 = vpop.f32.mrf.mxu3 }
 0x3a6   : > { %6052 = shalt.err (!%p6049_p5)
}
 0x3a7   : > { %s6105_s11 = smov 384   ;;  %s6106_s6 = smov 24  }
 0x3a8   : > { %5958 = dma.vmem_to_hbm [thread:$0]  (%p6167_p4), %s3917_s30, 768, %s3919_s4, %s3901_s15, %s6105_s11, %s6105_s11, %s6106_s6  }
 0x3a9 PF: > { %p5964_p6 = scmp.ge.s32.totalorder %s6103_s17, 2  ;;  %s3933_s23 = sand.u32 1, %s6083_s12  }
 0x3aa   : > { %s3934_s26 = scalar_lea.sflag [#allocation3], %s3933_s23 }
 0x3ab   : > { %p5961_p7 = pnand %p5964_p6, %p6174_p8 }
 0x3ad   : > { %p5962_p9 = pneg %p5961_p7 }
 0x3af   : > { %6078 = dma.done.wait (%p5962_p9), %s3934_s26, 768  }
 0x3b0   : > { %6080 = vsyncadd (%p5962_p9), %s3934_s26, 4294966528  ;;  %s16_s17 = sadd.s32 1, %s6103_s17   ;;  %s11369_s12 = smov %s6087_s13 }
 0x3b1   : > { %p13_p10 = scmp.ge.s32.totalorder %s16_s17, 4   ;;  %s11370_s13 = smov %s6091_s14 }
 0x3b2   : > { %s11371_s14 = smov %s6180_s25  ;;  %s11372_s15 = smov %s6099_s16 }
 0x3b3   : > { %s11373_s16 = smov %s11375_s20  ;;  %15 = sbr.rel (!%p13_p10) target bundleno = 4 (0x4), region = 78 }
 0x3b8   :  { %3940 = vsyncpa [#allocation3], 1 }
 0x3b9   :  { %3942 = vsyncpa [#allocation3 + $0x1], 1 }

</bundles_post_ra>
